<compile_context>
chip_gen: v5e
topology: v5e:2x2
jax: 0.10.0
libtpu: 0.0.40
codegen_flags: <defaults>
</compile_context>

<pallas_src>
import numpy as np
import jax
import jax.numpy as jnp
from jax import lax
from jax.experimental import pallas as pl
from jax.experimental.pallas import tpu as pltpu


def point_attention_kernel(
    xyz_ref, feat_ref,
    qkW1, qkb1, aW2, ab2, bW2, bb2,   # fused fc_alpha/fc_beta layer 1, separate layer 2
    dW1, db1, dW2, db2,               # fc_delta : Linear(3,d) -> ReLU -> Linear(d,d)
    eW1, eb1, eW2, eb2,               # fc_epsilon: Linear(d,d) -> ReLU -> Linear(d,d)
    oW1, ob1, oW2, ob2,               # fc_omega : Linear(C,d) -> ReLU -> Linear(d,d)
    out_ref,
):
    Bt, M, _ = xyz_ref.shape
    d = aW2.shape[-1]
    R = Bt * M
    inv_sqrt_d = 1.0 / float(np.sqrt(d))

    def dot_bf16(x, w_ref):
        # bf16 inputs, f32 accumulation: single-pass native MXU on v5e/v6e/v7x.
        return jnp.dot(x.astype(jnp.bfloat16),
                       w_ref[...].astype(jnp.bfloat16),
                       preferred_element_type=jnp.float32)

    def mlp(x, w1, b1, w2, b2):
        h = jnp.maximum(dot_bf16(x, w1) + b1[...], 0.0)
        return dot_bf16(h, w2) + b2[...]

    xyz = xyz_ref[...]                                    # (Bt, M, 3) f32
    feat = feat_ref[...]                                  # (Bt, M, C) f32
    xyz2d = xyz.reshape(R, 3)
    feat2d = feat.reshape(R, C := feat.shape[-1])

    # ---- fc_alpha / fc_beta: fused first layer on the shared xyz input ----
    h_qk = jnp.maximum(dot_bf16(xyz2d, qkW1) + qkb1[...], 0.0)   # (R, 2d)
    q = dot_bf16(h_qk[:, :d], aW2) + ab2[...]                    # (R, d)
    k = dot_bf16(h_qk[:, d:], bW2) + bb2[...]                    # (R, d)

    # ---- fc_omega on features ----
    v = mlp(feat2d, oW1, ob1, oW2, ob2)                          # (R, d)

    # ---- pairwise |xi - xj| and fc_delta, flattened to one (Bt*M*M, 3) matmul ----
    dist = jnp.abs(xyz[:, :, None, :] - xyz[:, None, :, :])      # (Bt, M, M, 3)
    pij = mlp(dist.reshape(R * M, 3), dW1, db1, dW2, db2)        # (Bt*M*M, d)

    # ---- s_ij = (q_i - k_j + pij_ij)/sqrt(d) and fc_epsilon (needed for denom) ----
    q4 = q.reshape(Bt, M, d)[:, :, None, :]                      # (Bt, M, 1, d)
    k4 = k.reshape(Bt, M, d)[:, None, :, :]                      # (Bt, 1, M, d)
    s = (q4 - k4 + pij.reshape(Bt, M, M, d)) * inv_sqrt_d        # (Bt, M, M, d)
    w4 = mlp(s.reshape(R * M, d), eW1, eb1, eW2, eb2).reshape(Bt, M, M, d)

    # ---- softmax over j (axis 2): only max/sum stats + diagonal numerator needed ----
    m4 = jnp.max(w4, axis=2, keepdims=True)                      # (Bt, M, 1, d)
    denom = jnp.sum(jnp.exp(w4 - m4), axis=2)                    # (Bt, M, d)
    m = jnp.squeeze(m4, axis=2)                                  # (Bt, M, d)

    # diagonal j == i: dist == 0 there, so fc_delta(0) = relu(b1) @ W2 + b2 is constant.
    pij_diag = dot_bf16(jnp.maximum(db1[...], 0.0), dW2) + db2[...]      # (1, d)
    s_diag = (q - k + pij_diag) * inv_sqrt_d                              # (R, d)
    w_diag = mlp(s_diag, eW1, eb1, eW2, eb2).reshape(Bt, M, d)            # (Bt, M, d)
    num = jnp.exp(w_diag - m)                                             # (Bt, M, d)

    res = num * pl.reciprocal(denom, approx=True) * v.reshape(Bt, M, d)
    out_ref[...] = res.astype(out_ref.dtype)


def point_attention(pv_xyz, features, params, *, block_b=None):
    B, M, _ = pv_xyz.shape
    C = features.shape[-1]
    d_model = params["alpha"][2].shape[-1]

    if block_b is None:
        # keep >=2 grid steps when possible (v7x has 2 TensorCores) and cap the tile.
        block_b = max(1, min(B // 2, 256)) if B > 1 else 1
    while B % block_b:
        block_b -= 1

    # Host-side fusion of fc_alpha / fc_beta first layers (they share the xyz input).
    aW1, ab1, aW2, ab2 = params["alpha"]
    bW1, bb1, bW2, bb2 = params["beta"]
    qkW1 = jnp.concatenate([aW1, bW1], axis=1)     # (3, 2d)
    qkb1 = jnp.concatenate([ab1, bb1], axis=0)     # (2d,)

    weights = [qkW1, qkb1, aW2, ab2, bW2, bb2,
               *params["delta"], *params["epsilon"], *params["omega"]]
    weights = [w if w.ndim == 2 else w.reshape(1, -1) for w in weights]
    weight_specs = [pl.BlockSpec(w.shape, lambda b: (0, 0)) for w in weights]

    in_specs = [
        pl.BlockSpec((block_b, M, 3), lambda b: (b, 0, 0)),   # pv_xyz
        pl.BlockSpec((block_b, M, C), lambda b: (b, 0, 0)),   # features
    ] + weight_specs
    out_specs = pl.BlockSpec((block_b, M, d_model), lambda b: (b, 0, 0))

    res = pl.pallas_call(
        point_attention_kernel,
        out_shape=jax.ShapeDtypeStruct((B, M, d_model), jnp.float32),
        grid_spec=pltpu.PrefetchScalarGridSpec(
            num_scalar_prefetch=0,
            grid=(B // block_b,),
            in_specs=in_specs,
            out_specs=out_specs,
        ),
        compiler_params=pltpu.CompilerParams(
            dimension_semantics=("parallel",)),
    )(pv_xyz, features, *weights)

    # Feature passthrough concat stays in the wrapper (cheap XLA copy); the kernel's
    # output store stays a single contiguous (Bt, M, d_model) block.
    return jnp.concatenate([res, features], axis=-1)


def init_params(key, d_points, d_model):
    """Deterministic PyTorch-Linear-style init (uniform(-1/sqrt(fan_in), +))."""
    def linear(k, fan_in, fan_out):
        kw, kb = jax.random.split(k)
        bound = 1.0 / np.sqrt(fan_in)
        W = jax.random.uniform(kw, (fan_in, fan_out), jnp.float32, -bound, bound)
        b = jax.random.uniform(kb, (fan_out,), jnp.float32, -bound, bound)
        return W, b

    ks = jax.random.split(key, 10)

    def mlp_params(k1, k2, in_dim):
        W1, b1 = linear(k1, in_dim, d_model)
        W2, b2 = linear(k2, d_model, d_model)
        return (W1, b1, W2, b2)

    return {
        "alpha": mlp_params(ks[0], ks[1], 3),
        "beta": mlp_params(ks[2], ks[3], 3),
        "delta": mlp_params(ks[4], ks[5], 3),
        "epsilon": mlp_params(ks[6], ks[7], d_model),
        "omega": mlp_params(ks[8], ks[9], d_points),
    }


def reference(pv_xyz, features, params):
    """Pure-JAX (f32, highest precision) transcription of the PyTorch forward."""
    def mlp(x, W1, b1, W2, b2):
        h = jnp.maximum(jnp.dot(x, W1, precision=lax.Precision.HIGHEST) + b1, 0.0)
        return jnp.dot(h, W2, precision=lax.Precision.HIGHEST) + b2

    dist = jnp.abs(pv_xyz[:, :, None, :] - pv_xyz[:, None, :, :])   # (B, M, M, 3)
    pij = mlp(dist, *params["delta"])
    q = mlp(pv_xyz, *params["alpha"])
    k = mlp(pv_xyz, *params["beta"])
    v = mlp(features, *params["omega"])
    s = (q[:, :, None, :] - k[:, None, :, :] + pij) / np.sqrt(q.shape[-1])
    w = mlp(s, *params["epsilon"])
    wij = jax.nn.softmax(w, axis=-2)
    res = jnp.einsum("bmmf,bmf->bmf", wij, v)   # diagonal * v, as in torch
    return jnp.concatenate([res, features], axis=-1)


if __name__ == "__main__":
    key = jax.random.PRNGKey(0)
    # B here is (batch x num_voxels) flattened, M points per voxel.
    B, M, d_points, d_model = 8, 8, 4, 32
    kx, kf, kp = jax.random.split(key, 3)
    pv_xyz = jax.random.normal(kx, (B, M, 3), dtype=jnp.float32)
    features = jax.random.normal(kf, (B, M, d_points), dtype=jnp.float32)
    params = init_params(kp, d_points, d_model)

    out = jax.block_until_ready(point_attention(pv_xyz, features, params))

    ref = reference(pv_xyz, features, params)
    # bf16 MXU inputs (f32 accumulation) in the kernel vs. f32/highest reference.
    np.testing.assert_allclose(np.asarray(out), np.asarray(ref), rtol=2e-2, atol=2e-2)
    print("KERNEL_OK")
</pallas_src>

<mosaic_0001>
module attributes {stable_mosaic.version = 11 : i64} {
  func.func @point_attention_kernel(%arg0: i32, %arg1: memref<4x8x3xf32, #tpu.memory_space<vmem>>, %arg2: memref<4x8x4xf32, #tpu.memory_space<vmem>>, %arg3: memref<3x64xf32, #tpu.memory_space<vmem>>, %arg4: memref<1x64xf32, #tpu.memory_space<vmem>>, %arg5: memref<32x32xf32, #tpu.memory_space<vmem>>, %arg6: memref<1x32xf32, #tpu.memory_space<vmem>>, %arg7: memref<32x32xf32, #tpu.memory_space<vmem>>, %arg8: memref<1x32xf32, #tpu.memory_space<vmem>>, %arg9: memref<3x32xf32, #tpu.memory_space<vmem>>, %arg10: memref<1x32xf32, #tpu.memory_space<vmem>>, %arg11: memref<32x32xf32, #tpu.memory_space<vmem>>, %arg12: memref<1x32xf32, #tpu.memory_space<vmem>>, %arg13: memref<32x32xf32, #tpu.memory_space<vmem>>, %arg14: memref<1x32xf32, #tpu.memory_space<vmem>>, %arg15: memref<32x32xf32, #tpu.memory_space<vmem>>, %arg16: memref<1x32xf32, #tpu.memory_space<vmem>>, %arg17: memref<4x32xf32, #tpu.memory_space<vmem>>, %arg18: memref<1x32xf32, #tpu.memory_space<vmem>>, %arg19: memref<32x32xf32, #tpu.memory_space<vmem>>, %arg20: memref<1x32xf32, #tpu.memory_space<vmem>>, %arg21: memref<4x8x32xf32, #tpu.memory_space<vmem>>) attributes {dimension_semantics = [#tpu.dimension_semantics<parallel>], iteration_bounds = array<i64: 2>, scalar_prefetch = 0 : i64, scratch_operands = 0 : i64, tpu.core_type = #tpu.core_type<tc>, window_params = [{transform_indices = @transform_0, window_bounds = array<i64: 4, 8, 3>}, {transform_indices = @transform_1, window_bounds = array<i64: 4, 8, 4>}, {pipeline_mode = #tpu.pipeline_mode<synchronous>, transform_indices = @transform_2, window_bounds = array<i64: 3, 64>}, {pipeline_mode = #tpu.pipeline_mode<synchronous>, transform_indices = @transform_3, window_bounds = array<i64: 1, 64>}, {pipeline_mode = #tpu.pipeline_mode<synchronous>, transform_indices = @transform_4, window_bounds = array<i64: 32, 32>}, {pipeline_mode = #tpu.pipeline_mode<synchronous>, transform_indices = @transform_5, window_bounds = array<i64: 1, 32>}, {pipeline_mode = #tpu.pipeline_mode<synchronous>, transform_indices = @transform_6, window_bounds = array<i64: 32, 32>}, {pipeline_mode = #tpu.pipeline_mode<synchronous>, transform_indices = @transform_7, window_bounds = array<i64: 1, 32>}, {pipeline_mode = #tpu.pipeline_mode<synchronous>, transform_indices = @transform_8, window_bounds = array<i64: 3, 32>}, {pipeline_mode = #tpu.pipeline_mode<synchronous>, transform_indices = @transform_9, window_bounds = array<i64: 1, 32>}, {pipeline_mode = #tpu.pipeline_mode<synchronous>, transform_indices = @transform_10, window_bounds = array<i64: 32, 32>}, {pipeline_mode = #tpu.pipeline_mode<synchronous>, transform_indices = @transform_11, window_bounds = array<i64: 1, 32>}, {pipeline_mode = #tpu.pipeline_mode<synchronous>, transform_indices = @transform_12, window_bounds = array<i64: 32, 32>}, {pipeline_mode = #tpu.pipeline_mode<synchronous>, transform_indices = @transform_13, window_bounds = array<i64: 1, 32>}, {pipeline_mode = #tpu.pipeline_mode<synchronous>, transform_indices = @transform_14, window_bounds = array<i64: 32, 32>}, {pipeline_mode = #tpu.pipeline_mode<synchronous>, transform_indices = @transform_15, window_bounds = array<i64: 1, 32>}, {pipeline_mode = #tpu.pipeline_mode<synchronous>, transform_indices = @transform_16, window_bounds = array<i64: 4, 32>}, {pipeline_mode = #tpu.pipeline_mode<synchronous>, transform_indices = @transform_17, window_bounds = array<i64: 1, 32>}, {pipeline_mode = #tpu.pipeline_mode<synchronous>, transform_indices = @transform_18, window_bounds = array<i64: 32, 32>}, {pipeline_mode = #tpu.pipeline_mode<synchronous>, transform_indices = @transform_19, window_bounds = array<i64: 1, 32>}, {transform_indices = @transform_20, window_bounds = array<i64: 4, 8, 32>}]} {
    %c0 = arith.constant 0 : index
    %c0_0 = arith.constant 0 : index
    %c0_1 = arith.constant 0 : index
    %0 = vector.load %arg1[%c0, %c0_0, %c0_1] : memref<4x8x3xf32, #tpu.memory_space<vmem>>, vector<4x8x3xf32>
    %c0_2 = arith.constant 0 : index
    %c0_3 = arith.constant 0 : index
    %c0_4 = arith.constant 0 : index
    %1 = vector.load %arg2[%c0_2, %c0_3, %c0_4] : memref<4x8x4xf32, #tpu.memory_space<vmem>>, vector<4x8x4xf32>
    %2 = vector.shape_cast %0 : vector<4x8x3xf32> to vector<32x3xf32>
    %3 = vector.shape_cast %1 : vector<4x8x4xf32> to vector<32x4xf32>
    %4 = arith.truncf %2 : vector<32x3xf32> to vector<32x3xbf16>
    %c0_5 = arith.constant 0 : index
    %c0_6 = arith.constant 0 : index
    %5 = vector.load %arg3[%c0_5, %c0_6] : memref<3x64xf32, #tpu.memory_space<vmem>>, vector<3x64xf32>
    %6 = arith.truncf %5 : vector<3x64xf32> to vector<3x64xbf16>
    %cst = arith.constant dense<0.000000e+00> : vector<32x64xf32>
    %7 = tpu.matmul %4, %6, %cst {dimension_numbers = #tpu.dot_dimension_numbers<[1], [0], [0], [1], [0, 0, 1, 1], [], []>} : vector<32x3xbf16>, vector<3x64xbf16>, vector<32x64xf32> -> vector<32x64xf32>
    %c0_7 = arith.constant 0 : index
    %c0_8 = arith.constant 0 : index
    %8 = vector.load %arg4[%c0_7, %c0_8] : memref<1x64xf32, #tpu.memory_space<vmem>>, vector<1x64xf32>
    %9 = vector.broadcast %8 : vector<1x64xf32> to vector<32x64xf32>
    %10 = arith.addf %7, %9 : vector<32x64xf32>
    %cst_9 = arith.constant 0.000000e+00 : f32
    %11 = vector.broadcast %cst_9 : f32 to vector<32x64xf32>
    %12 = arith.maximumf %10, %11 : vector<32x64xf32>
    %13 = vector.extract_strided_slice %12 {offsets = [0, 0], sizes = [32, 32], strides = [1, 1]} : vector<32x64xf32> to vector<32x32xf32>
    %14 = arith.truncf %13 : vector<32x32xf32> to vector<32x32xbf16>
    %c0_10 = arith.constant 0 : index
    %c0_11 = arith.constant 0 : index
    %15 = vector.load %arg5[%c0_10, %c0_11] : memref<32x32xf32, #tpu.memory_space<vmem>>, vector<32x32xf32>
    %16 = arith.truncf %15 : vector<32x32xf32> to vector<32x32xbf16>
    %cst_12 = arith.constant dense<0.000000e+00> : vector<32x32xf32>
    %17 = tpu.matmul %14, %16, %cst_12 {dimension_numbers = #tpu.dot_dimension_numbers<[1], [0], [0], [1], [0, 0, 1, 1], [], []>} : vector<32x32xbf16>, vector<32x32xbf16>, vector<32x32xf32> -> vector<32x32xf32>
    %c0_13 = arith.constant 0 : index
    %c0_14 = arith.constant 0 : index
    %18 = vector.load %arg6[%c0_13, %c0_14] : memref<1x32xf32, #tpu.memory_space<vmem>>, vector<1x32xf32>
    %19 = vector.broadcast %18 : vector<1x32xf32> to vector<32x32xf32>
    %20 = arith.addf %17, %19 : vector<32x32xf32>
    %21 = vector.extract_strided_slice %12 {offsets = [0, 32], sizes = [32, 32], strides = [1, 1]} : vector<32x64xf32> to vector<32x32xf32>
    %22 = arith.truncf %21 : vector<32x32xf32> to vector<32x32xbf16>
    %c0_15 = arith.constant 0 : index
    %c0_16 = arith.constant 0 : index
    %23 = vector.load %arg7[%c0_15, %c0_16] : memref<32x32xf32, #tpu.memory_space<vmem>>, vector<32x32xf32>
    %24 = arith.truncf %23 : vector<32x32xf32> to vector<32x32xbf16>
    %cst_17 = arith.constant dense<0.000000e+00> : vector<32x32xf32>
    %25 = tpu.matmul %22, %24, %cst_17 {dimension_numbers = #tpu.dot_dimension_numbers<[1], [0], [0], [1], [0, 0, 1, 1], [], []>} : vector<32x32xbf16>, vector<32x32xbf16>, vector<32x32xf32> -> vector<32x32xf32>
    %c0_18 = arith.constant 0 : index
    %c0_19 = arith.constant 0 : index
    %26 = vector.load %arg8[%c0_18, %c0_19] : memref<1x32xf32, #tpu.memory_space<vmem>>, vector<1x32xf32>
    %27 = vector.broadcast %26 : vector<1x32xf32> to vector<32x32xf32>
    %28 = arith.addf %25, %27 : vector<32x32xf32>
    %29 = arith.truncf %3 : vector<32x4xf32> to vector<32x4xbf16>
    %c0_20 = arith.constant 0 : index
    %c0_21 = arith.constant 0 : index
    %30 = vector.load %arg17[%c0_20, %c0_21] : memref<4x32xf32, #tpu.memory_space<vmem>>, vector<4x32xf32>
    %31 = arith.truncf %30 : vector<4x32xf32> to vector<4x32xbf16>
    %cst_22 = arith.constant dense<0.000000e+00> : vector<32x32xf32>
    %32 = tpu.matmul %29, %31, %cst_22 {dimension_numbers = #tpu.dot_dimension_numbers<[1], [0], [0], [1], [0, 0, 1, 1], [], []>} : vector<32x4xbf16>, vector<4x32xbf16>, vector<32x32xf32> -> vector<32x32xf32>
    %c0_23 = arith.constant 0 : index
    %c0_24 = arith.constant 0 : index
    %33 = vector.load %arg18[%c0_23, %c0_24] : memref<1x32xf32, #tpu.memory_space<vmem>>, vector<1x32xf32>
    %34 = vector.broadcast %33 : vector<1x32xf32> to vector<32x32xf32>
    %35 = arith.addf %32, %34 : vector<32x32xf32>
    %cst_25 = arith.constant 0.000000e+00 : f32
    %36 = vector.broadcast %cst_25 : f32 to vector<32x32xf32>
    %37 = arith.maximumf %35, %36 : vector<32x32xf32>
    %38 = arith.truncf %37 : vector<32x32xf32> to vector<32x32xbf16>
    %c0_26 = arith.constant 0 : index
    %c0_27 = arith.constant 0 : index
    %39 = vector.load %arg19[%c0_26, %c0_27] : memref<32x32xf32, #tpu.memory_space<vmem>>, vector<32x32xf32>
    %40 = arith.truncf %39 : vector<32x32xf32> to vector<32x32xbf16>
    %cst_28 = arith.constant dense<0.000000e+00> : vector<32x32xf32>
    %41 = tpu.matmul %38, %40, %cst_28 {dimension_numbers = #tpu.dot_dimension_numbers<[1], [0], [0], [1], [0, 0, 1, 1], [], []>} : vector<32x32xbf16>, vector<32x32xbf16>, vector<32x32xf32> -> vector<32x32xf32>
    %c0_29 = arith.constant 0 : index
    %c0_30 = arith.constant 0 : index
    %42 = vector.load %arg20[%c0_29, %c0_30] : memref<1x32xf32, #tpu.memory_space<vmem>>, vector<1x32xf32>
    %43 = vector.broadcast %42 : vector<1x32xf32> to vector<32x32xf32>
    %44 = arith.addf %41, %43 : vector<32x32xf32>
    %45 = vector.shape_cast %0 : vector<4x8x3xf32> to vector<4x8x1x3xf32>
    %46 = vector.shape_cast %0 : vector<4x8x3xf32> to vector<4x1x8x3xf32>
    %47 = vector.broadcast %45 : vector<4x8x1x3xf32> to vector<4x8x8x3xf32>
    %48 = vector.broadcast %46 : vector<4x1x8x3xf32> to vector<4x8x8x3xf32>
    %49 = arith.subf %47, %48 : vector<4x8x8x3xf32>
    %50 = math.absf %49 : vector<4x8x8x3xf32>
    %51 = vector.shape_cast %50 : vector<4x8x8x3xf32> to vector<256x3xf32>
    %52 = arith.truncf %51 : vector<256x3xf32> to vector<256x3xbf16>
    %c0_31 = arith.constant 0 : index
    %c0_32 = arith.constant 0 : index
    %53 = vector.load %arg9[%c0_31, %c0_32] : memref<3x32xf32, #tpu.memory_space<vmem>>, vector<3x32xf32>
    %54 = arith.truncf %53 : vector<3x32xf32> to vector<3x32xbf16>
    %cst_33 = arith.constant dense<0.000000e+00> : vector<256x32xf32>
    %55 = tpu.matmul %52, %54, %cst_33 {dimension_numbers = #tpu.dot_dimension_numbers<[1], [0], [0], [1], [0, 0, 1, 1], [], []>} : vector<256x3xbf16>, vector<3x32xbf16>, vector<256x32xf32> -> vector<256x32xf32>
    %c0_34 = arith.constant 0 : index
    %c0_35 = arith.constant 0 : index
    %56 = vector.load %arg10[%c0_34, %c0_35] : memref<1x32xf32, #tpu.memory_space<vmem>>, vector<1x32xf32>
    %57 = vector.broadcast %56 : vector<1x32xf32> to vector<256x32xf32>
    %58 = arith.addf %55, %57 : vector<256x32xf32>
    %cst_36 = arith.constant 0.000000e+00 : f32
    %59 = vector.broadcast %cst_36 : f32 to vector<256x32xf32>
    %60 = arith.maximumf %58, %59 : vector<256x32xf32>
    %61 = arith.truncf %60 : vector<256x32xf32> to vector<256x32xbf16>
    %c0_37 = arith.constant 0 : index
    %c0_38 = arith.constant 0 : index
    %62 = vector.load %arg11[%c0_37, %c0_38] : memref<32x32xf32, #tpu.memory_space<vmem>>, vector<32x32xf32>
    %63 = arith.truncf %62 : vector<32x32xf32> to vector<32x32xbf16>
    %cst_39 = arith.constant dense<0.000000e+00> : vector<256x32xf32>
    %64 = tpu.matmul %61, %63, %cst_39 {dimension_numbers = #tpu.dot_dimension_numbers<[1], [0], [0], [1], [0, 0, 1, 1], [], []>} : vector<256x32xbf16>, vector<32x32xbf16>, vector<256x32xf32> -> vector<256x32xf32>
    %c0_40 = arith.constant 0 : index
    %c0_41 = arith.constant 0 : index
    %65 = vector.load %arg12[%c0_40, %c0_41] : memref<1x32xf32, #tpu.memory_space<vmem>>, vector<1x32xf32>
    %66 = vector.broadcast %65 : vector<1x32xf32> to vector<256x32xf32>
    %67 = arith.addf %64, %66 : vector<256x32xf32>
    %68 = vector.shape_cast %20 : vector<32x32xf32> to vector<4x8x32xf32>
    %69 = vector.shape_cast %68 : vector<4x8x32xf32> to vector<4x8x1x32xf32>
    %70 = vector.shape_cast %28 : vector<32x32xf32> to vector<4x8x32xf32>
    %71 = vector.shape_cast %70 : vector<4x8x32xf32> to vector<4x1x8x32xf32>
    %72 = vector.broadcast %69 : vector<4x8x1x32xf32> to vector<4x8x8x32xf32>
    %73 = vector.broadcast %71 : vector<4x1x8x32xf32> to vector<4x8x8x32xf32>
    %74 = arith.subf %72, %73 : vector<4x8x8x32xf32>
    %75 = vector.shape_cast %67 : vector<256x32xf32> to vector<4x8x8x32xf32>
    %76 = arith.addf %74, %75 : vector<4x8x8x32xf32>
    %cst_42 = arith.constant 0.176776692 : f32
    %77 = vector.broadcast %cst_42 : f32 to vector<4x8x8x32xf32>
    %78 = arith.mulf %76, %77 : vector<4x8x8x32xf32>
    %79 = vector.shape_cast %78 : vector<4x8x8x32xf32> to vector<256x32xf32>
    %80 = arith.truncf %79 : vector<256x32xf32> to vector<256x32xbf16>
    %c0_43 = arith.constant 0 : index
    %c0_44 = arith.constant 0 : index
    %81 = vector.load %arg13[%c0_43, %c0_44] : memref<32x32xf32, #tpu.memory_space<vmem>>, vector<32x32xf32>
    %82 = arith.truncf %81 : vector<32x32xf32> to vector<32x32xbf16>
    %cst_45 = arith.constant dense<0.000000e+00> : vector<256x32xf32>
    %83 = tpu.matmul %80, %82, %cst_45 {dimension_numbers = #tpu.dot_dimension_numbers<[1], [0], [0], [1], [0, 0, 1, 1], [], []>} : vector<256x32xbf16>, vector<32x32xbf16>, vector<256x32xf32> -> vector<256x32xf32>
    %c0_46 = arith.constant 0 : index
    %c0_47 = arith.constant 0 : index
    %84 = vector.load %arg14[%c0_46, %c0_47] : memref<1x32xf32, #tpu.memory_space<vmem>>, vector<1x32xf32>
    %85 = vector.broadcast %84 : vector<1x32xf32> to vector<256x32xf32>
    %86 = arith.addf %83, %85 : vector<256x32xf32>
    %cst_48 = arith.constant 0.000000e+00 : f32
    %87 = vector.broadcast %cst_48 : f32 to vector<256x32xf32>
    %88 = arith.maximumf %86, %87 : vector<256x32xf32>
    %89 = arith.truncf %88 : vector<256x32xf32> to vector<256x32xbf16>
    %c0_49 = arith.constant 0 : index
    %c0_50 = arith.constant 0 : index
    %90 = vector.load %arg15[%c0_49, %c0_50] : memref<32x32xf32, #tpu.memory_space<vmem>>, vector<32x32xf32>
    %91 = arith.truncf %90 : vector<32x32xf32> to vector<32x32xbf16>
    %cst_51 = arith.constant dense<0.000000e+00> : vector<256x32xf32>
    %92 = tpu.matmul %89, %91, %cst_51 {dimension_numbers = #tpu.dot_dimension_numbers<[1], [0], [0], [1], [0, 0, 1, 1], [], []>} : vector<256x32xbf16>, vector<32x32xbf16>, vector<256x32xf32> -> vector<256x32xf32>
    %c0_52 = arith.constant 0 : index
    %c0_53 = arith.constant 0 : index
    %93 = vector.load %arg16[%c0_52, %c0_53] : memref<1x32xf32, #tpu.memory_space<vmem>>, vector<1x32xf32>
    %94 = vector.broadcast %93 : vector<1x32xf32> to vector<256x32xf32>
    %95 = arith.addf %92, %94 : vector<256x32xf32>
    %96 = vector.shape_cast %95 : vector<256x32xf32> to vector<4x8x8x32xf32>
    %cst_54 = arith.constant dense<0xFF800000> : vector<4x8x32xf32>
    %97 = vector.multi_reduction <maximumf>, %96, %cst_54 [2] : vector<4x8x8x32xf32> to vector<4x8x32xf32>
    %98 = vector.shape_cast %97 : vector<4x8x32xf32> to vector<4x8x1x32xf32>
    %99 = vector.broadcast %98 : vector<4x8x1x32xf32> to vector<4x8x8x32xf32>
    %100 = arith.subf %96, %99 : vector<4x8x8x32xf32>
    %101 = math.exp %100 : vector<4x8x8x32xf32>
    %cst_55 = arith.constant dense<0.000000e+00> : vector<4x8x32xf32>
    %102 = vector.multi_reduction <add>, %101, %cst_55 [2] : vector<4x8x8x32xf32> to vector<4x8x32xf32>
    %103 = vector.shape_cast %98 : vector<4x8x1x32xf32> to vector<4x8x32xf32>
    %c0_56 = arith.constant 0 : index
    %c0_57 = arith.constant 0 : index
    %104 = vector.load %arg10[%c0_56, %c0_57] : memref<1x32xf32, #tpu.memory_space<vmem>>, vector<1x32xf32>
    %cst_58 = arith.constant 0.000000e+00 : f32
    %105 = vector.broadcast %cst_58 : f32 to vector<1x32xf32>
    %106 = arith.maximumf %104, %105 : vector<1x32xf32>
    %107 = arith.truncf %106 : vector<1x32xf32> to vector<1x32xbf16>
    %c0_59 = arith.constant 0 : index
    %c0_60 = arith.constant 0 : index
    %108 = vector.load %arg11[%c0_59, %c0_60] : memref<32x32xf32, #tpu.memory_space<vmem>>, vector<32x32xf32>
    %109 = arith.truncf %108 : vector<32x32xf32> to vector<32x32xbf16>
    %cst_61 = arith.constant dense<0.000000e+00> : vector<1x32xf32>
    %110 = tpu.matmul %107, %109, %cst_61 {dimension_numbers = #tpu.dot_dimension_numbers<[1], [0], [0], [1], [0, 0, 1, 1], [], []>} : vector<1x32xbf16>, vector<32x32xbf16>, vector<1x32xf32> -> vector<1x32xf32>
    %c0_62 = arith.constant 0 : index
    %c0_63 = arith.constant 0 : index
    %111 = vector.load %arg12[%c0_62, %c0_63] : memref<1x32xf32, #tpu.memory_space<vmem>>, vector<1x32xf32>
    %112 = arith.addf %110, %111 : vector<1x32xf32>
    %113 = arith.subf %20, %28 : vector<32x32xf32>
    %114 = vector.broadcast %112 : vector<1x32xf32> to vector<32x32xf32>
    %115 = arith.addf %113, %114 : vector<32x32xf32>
    %cst_64 = arith.constant 0.176776692 : f32
    %116 = vector.broadcast %cst_64 : f32 to vector<32x32xf32>
    %117 = arith.mulf %115, %116 : vector<32x32xf32>
    %118 = arith.truncf %117 : vector<32x32xf32> to vector<32x32xbf16>
    %c0_65 = arith.constant 0 : index
    %c0_66 = arith.constant 0 : index
    %119 = vector.load %arg13[%c0_65, %c0_66] : memref<32x32xf32, #tpu.memory_space<vmem>>, vector<32x32xf32>
    %120 = arith.truncf %119 : vector<32x32xf32> to vector<32x32xbf16>
    %cst_67 = arith.constant dense<0.000000e+00> : vector<32x32xf32>
    %121 = tpu.matmul %118, %120, %cst_67 {dimension_numbers = #tpu.dot_dimension_numbers<[1], [0], [0], [1], [0, 0, 1, 1], [], []>} : vector<32x32xbf16>, vector<32x32xbf16>, vector<32x32xf32> -> vector<32x32xf32>
    %c0_68 = arith.constant 0 : index
    %c0_69 = arith.constant 0 : index
    %122 = vector.load %arg14[%c0_68, %c0_69] : memref<1x32xf32, #tpu.memory_space<vmem>>, vector<1x32xf32>
    %123 = vector.broadcast %122 : vector<1x32xf32> to vector<32x32xf32>
    %124 = arith.addf %121, %123 : vector<32x32xf32>
    %cst_70 = arith.constant 0.000000e+00 : f32
    %125 = vector.broadcast %cst_70 : f32 to vector<32x32xf32>
    %126 = arith.maximumf %124, %125 : vector<32x32xf32>
    %127 = arith.truncf %126 : vector<32x32xf32> to vector<32x32xbf16>
    %c0_71 = arith.constant 0 : index
    %c0_72 = arith.constant 0 : index
    %128 = vector.load %arg15[%c0_71, %c0_72] : memref<32x32xf32, #tpu.memory_space<vmem>>, vector<32x32xf32>
    %129 = arith.truncf %128 : vector<32x32xf32> to vector<32x32xbf16>
    %cst_73 = arith.constant dense<0.000000e+00> : vector<32x32xf32>
    %130 = tpu.matmul %127, %129, %cst_73 {dimension_numbers = #tpu.dot_dimension_numbers<[1], [0], [0], [1], [0, 0, 1, 1], [], []>} : vector<32x32xbf16>, vector<32x32xbf16>, vector<32x32xf32> -> vector<32x32xf32>
    %c0_74 = arith.constant 0 : index
    %c0_75 = arith.constant 0 : index
    %131 = vector.load %arg16[%c0_74, %c0_75] : memref<1x32xf32, #tpu.memory_space<vmem>>, vector<1x32xf32>
    %132 = vector.broadcast %131 : vector<1x32xf32> to vector<32x32xf32>
    %133 = arith.addf %130, %132 : vector<32x32xf32>
    %134 = vector.shape_cast %133 : vector<32x32xf32> to vector<4x8x32xf32>
    %135 = arith.subf %134, %103 : vector<4x8x32xf32>
    %136 = math.exp %135 : vector<4x8x32xf32>
    %137 = tpu.reciprocal %102 {approx = true} : vector<4x8x32xf32> -> vector<4x8x32xf32>
    %138 = arith.mulf %136, %137 : vector<4x8x32xf32>
    %139 = vector.shape_cast %44 : vector<32x32xf32> to vector<4x8x32xf32>
    %140 = arith.mulf %138, %139 : vector<4x8x32xf32>
    %c0_76 = arith.constant 0 : index
    %c0_77 = arith.constant 0 : index
    %c0_78 = arith.constant 0 : index
    %141 = vector.load %arg21[%c0_76, %c0_77, %c0_78] : memref<4x8x32xf32, #tpu.memory_space<vmem>>, vector<4x8x32xf32>
    tpu.vector_store %arg21[%c0_76, %c0_77, %c0_78], %140 {strides = array<i32>} : memref<4x8x32xf32, #tpu.memory_space<vmem>>, vector<4x8x32xf32>,
    return
  }
  func.func @transform_0(%arg0: i32) -> (i32, i32, i32) {
    %c0_i32 = arith.constant 0 : i32
    %c0_i32_0 = arith.constant 0 : i32
    %c0_i32_1 = arith.constant 0 : i32
    return %arg0, %c0_i32, %c0_i32_0 : i32, i32, i32
  }
  func.func @transform_1(%arg0: i32) -> (i32, i32, i32) {
    %c0_i32 = arith.constant 0 : i32
    %c0_i32_0 = arith.constant 0 : i32
    %c0_i32_1 = arith.constant 0 : i32
    return %arg0, %c0_i32, %c0_i32_0 : i32, i32, i32
  }
  func.func @transform_2(%arg0: i32) -> (i32, i32) {
    %c0_i32 = arith.constant 0 : i32
    %c0_i32_0 = arith.constant 0 : i32
    %c0_i32_1 = arith.constant 0 : i32
    return %c0_i32, %c0_i32_0 : i32, i32
  }
  func.func @transform_3(%arg0: i32) -> (i32, i32) {
    %c0_i32 = arith.constant 0 : i32
    %c0_i32_0 = arith.constant 0 : i32
    %c0_i32_1 = arith.constant 0 : i32
    return %c0_i32, %c0_i32_0 : i32, i32
  }
  func.func @transform_4(%arg0: i32) -> (i32, i32) {
    %c0_i32 = arith.constant 0 : i32
    %c0_i32_0 = arith.constant 0 : i32
    %c0_i32_1 = arith.constant 0 : i32
    return %c0_i32, %c0_i32_0 : i32, i32
  }
  func.func @transform_5(%arg0: i32) -> (i32, i32) {
    %c0_i32 = arith.constant 0 : i32
    %c0_i32_0 = arith.constant 0 : i32
    %c0_i32_1 = arith.constant 0 : i32
    return %c0_i32, %c0_i32_0 : i32, i32
  }
  func.func @transform_6(%arg0: i32) -> (i32, i32) {
    %c0_i32 = arith.constant 0 : i32
    %c0_i32_0 = arith.constant 0 : i32
    %c0_i32_1 = arith.constant 0 : i32
    return %c0_i32, %c0_i32_0 : i32, i32
  }
  func.func @transform_7(%arg0: i32) -> (i32, i32) {
    %c0_i32 = arith.constant 0 : i32
    %c0_i32_0 = arith.constant 0 : i32
    %c0_i32_1 = arith.constant 0 : i32
    return %c0_i32, %c0_i32_0 : i32, i32
  }
  func.func @transform_8(%arg0: i32) -> (i32, i32) {
    %c0_i32 = arith.constant 0 : i32
    %c0_i32_0 = arith.constant 0 : i32
    %c0_i32_1 = arith.constant 0 : i32
    return %c0_i32, %c0_i32_0 : i32, i32
  }
  func.func @transform_9(%arg0: i32) -> (i32, i32) {
    %c0_i32 = arith.constant 0 : i32
    %c0_i32_0 = arith.constant 0 : i32
    %c0_i32_1 = arith.constant 0 : i32
    return %c0_i32, %c0_i32_0 : i32, i32
  }
  func.func @transform_10(%arg0: i32) -> (i32, i32) {
    %c0_i32 = arith.constant 0 : i32
    %c0_i32_0 = arith.constant 0 : i32
    %c0_i32_1 = arith.constant 0 : i32
    return %c0_i32, %c0_i32_0 : i32, i32
  }
  func.func @transform_11(%arg0: i32) -> (i32, i32) {
    %c0_i32 = arith.constant 0 : i32
    %c0_i32_0 = arith.constant 0 : i32
    %c0_i32_1 = arith.constant 0 : i32
    return %c0_i32, %c0_i32_0 : i32, i32
  }
  func.func @transform_12(%arg0: i32) -> (i32, i32) {
    %c0_i32 = arith.constant 0 : i32
    %c0_i32_0 = arith.constant 0 : i32
    %c0_i32_1 = arith.constant 0 : i32
    return %c0_i32, %c0_i32_0 : i32, i32
  }
  func.func @transform_13(%arg0: i32) -> (i32, i32) {
    %c0_i32 = arith.constant 0 : i32
    %c0_i32_0 = arith.constant 0 : i32
    %c0_i32_1 = arith.constant 0 : i32
    return %c0_i32, %c0_i32_0 : i32, i32
  }
  func.func @transform_14(%arg0: i32) -> (i32, i32) {
    %c0_i32 = arith.constant 0 : i32
    %c0_i32_0 = arith.constant 0 : i32
    %c0_i32_1 = arith.constant 0 : i32
    return %c0_i32, %c0_i32_0 : i32, i32
  }
  func.func @transform_15(%arg0: i32) -> (i32, i32) {
    %c0_i32 = arith.constant 0 : i32
    %c0_i32_0 = arith.constant 0 : i32
    %c0_i32_1 = arith.constant 0 : i32
    return %c0_i32, %c0_i32_0 : i32, i32
  }
  func.func @transform_16(%arg0: i32) -> (i32, i32) {
    %c0_i32 = arith.constant 0 : i32
    %c0_i32_0 = arith.constant 0 : i32
    %c0_i32_1 = arith.constant 0 : i32
    return %c0_i32, %c0_i32_0 : i32, i32
  }
  func.func @transform_17(%arg0: i32) -> (i32, i32) {
    %c0_i32 = arith.constant 0 : i32
    %c0_i32_0 = arith.constant 0 : i32
    %c0_i32_1 = arith.constant 0 : i32
    return %c0_i32, %c0_i32_0 : i32, i32
  }
  func.func @transform_18(%arg0: i32) -> (i32, i32) {
    %c0_i32 = arith.constant 0 : i32
    %c0_i32_0 = arith.constant 0 : i32
    %c0_i32_1 = arith.constant 0 : i32
    return %c0_i32, %c0_i32_0 : i32, i32
  }
  func.func @transform_19(%arg0: i32) -> (i32, i32) {
    %c0_i32 = arith.constant 0 : i32
    %c0_i32_0 = arith.constant 0 : i32
    %c0_i32_1 = arith.constant 0 : i32
    return %c0_i32, %c0_i32_0 : i32, i32
  }
  func.func @transform_20(%arg0: i32) -> (i32, i32, i32) {
    %c0_i32 = arith.constant 0 : i32
    %c0_i32_0 = arith.constant 0 : i32
    %c0_i32_1 = arith.constant 0 : i32
    return %arg0, %c0_i32, %c0_i32_0 : i32, i32, i32
  }
}

</mosaic_0001>

<bundles_post_ra>
// kernel: tpu_custom_call.1
= control target key start
LH: loop header
LB: loop body
LE: loop exit
PB: predicated region body
PF: predicated region fallthrough
CT: control target
= control target key end

     0   :  { %s4961_s0 = inlined_call_operand.vmem [shape: f32[8,8,3], index: 0, kind: input, shape index: {}]   ;;  %s4962_s1 = inlined_call_operand.vmem [shape: f32[8,8,4], index: 1, kind: input, shape index: {}]   ;;  %s4963_s2 = inlined_call_operand.hbm [shape: f32[3,64], index: 2, kind: input, shape index: {}]   ;;  %s4964_s3 = inlined_call_operand.hbm [shape: f32[1,64], index: 3, kind: input, shape index: {}]   ;;  %s4965_s4 = inlined_call_operand.vmem [shape: f32[32,32], index: 4, kind: input, shape index: {}]   ;;  %s4966_s5 = inlined_call_operand.hbm [shape: f32[1,32], index: 5, kind: input, shape index: {}]   ;;  %s4967_s6 = inlined_call_operand.vmem [shape: f32[32,32], index: 6, kind: input, shape index: {}]   ;;  %s4968_s7 = inlined_call_operand.hbm [shape: f32[1,32], index: 7, kind: input, shape index: {}]   ;;  %s4969_s8 = inlined_call_operand.hbm [shape: f32[3,32], index: 8, kind: input, shape index: {}]   ;;  %s4970_s9 = inlined_call_operand.hbm [shape: f32[1,32], index: 9, kind: input, shape index: {}]   ;;  %s4971_s10 = inlined_call_operand.vmem [shape: f32[32,32], index: 10, kind: input, shape index: {}]   ;;  %s4972_s11 = inlined_call_operand.hbm [shape: f32[1,32], index: 11, kind: input, shape index: {}]   ;;  %s4973_s12 = inlined_call_operand.vmem [shape: f32[32,32], index: 12, kind: input, shape index: {}]   ;;  %s4974_s13 = inlined_call_operand.vmem [shape: f32[1,32], index: 13, kind: input, shape index: {}]   ;;  %s4975_s14 = inlined_call_operand.vmem [shape: f32[32,32], index: 14, kind: input, shape index: {}]   ;;  %s4976_s15 = inlined_call_operand.vmem [shape: f32[1,32], index: 15, kind: input, shape index: {}]   ;;  %s4977_s16 = inlined_call_operand.vmem [shape: f32[4,32], index: 16, kind: input, shape index: {}]   ;;  %s4978_s17 = inlined_call_operand.hbm [shape: f32[1,32], index: 17, kind: input, shape index: {}]   ;;  %s4979_s18 = inlined_call_operand.hbm [shape: f32[32,32], index: 18, kind: input, shape index: {}]   ;;  %s4980_s19 = inlined_call_operand.vmem [shape: f32[1,32], index: 19, kind: input, shape index: {}]   ;;  %s4981_s20 = inlined_call_operand.hbm [shape: f32[8,8,32], index: 20, kind: output, shape index: {}]  }
   0x1   :  { %4993 = sst [smem:[#allocation31_spill]] %s4961_s0 }
   0x2   :  { %4994 = sst [smem:[#allocation32_spill]] %s4962_s1 }
   0x3   :  { %4995 = sst [smem:[#allocation33_spill]] %s4963_s2 }
   0x4   :  { %4996 = sst [smem:[#allocation34_spill]] %s4964_s3 }
   0x5   :  { %4997 = sst [smem:[#allocation35_spill]] %s4965_s4 }
   0x6   :  { %4998 = sst [smem:[#allocation36_spill]] %s4968_s7 }
   0x7   :  { %4999 = sst [smem:[#allocation37_spill]] %s4970_s9 }
   0x8   :  { %5000 = sst [smem:[#allocation38_spill]] %s4981_s20 }
   0x9   :  { %25 = vsyncpa [#allocation3], 0 }
   0xa   :  { %26 = vsyncpa [#allocation6], 0 }
   0xb   :  { %27 = vsyncpa [#allocation9], 0 }
   0xc   :  { %28 = vsyncpa [#allocation12], 0 }
   0xd   :  { %29 = vsyncpa [#allocation15], 0 }
   0xe   :  { %30 = vsyncpa [#allocation4], 0 }
   0xf   :  { %32 = vsyncpa [#allocation4 + $0x1], 0  ;;  %s3937_s1 = smov 0   ;;  %s3939_s22 = smov 0  }
  0x10   :  { %s3941_s23 = smov 0   ;;  %s3943_s24 = smov 0  }
  0x11 LB: > { %5001 = sst [smem:[#allocation24_spill]] %s3803_s1  ;;  %s3958_s2 = sadd.s32 4294967295, %s3815_s24   ;;  %s3815_s24 = sphi %s3943_s24, %s5024_s24   ;;  %s3811_s23 = sphi %s3941_s23, %s5026_s23   ;;  %s3807_s22 = sphi %s3939_s22, %s5028_s22   ;;  %s3803_s1 = sphi %s3937_s1, %s5027_s1  }
  0x12   : > { %5002 = sst [smem:[#allocation25_spill]] %s3811_s23  ;;  %s3066_s25 = sadd.s32 4294967294, %s3815_s24  }
  0x13   : > { %5003 = sst [smem:[#allocation26_spill]] %s3815_s24  ;;  %s3962_s3 = sadd.s32 1, %s3815_s24  }
  0x14   : > { %5004 = sst [smem:[#allocation27_spill]] %s3962_s3  ;;  %s475_s26 = sadd.s32 1, %s3811_s23 }
  0x15   : > { %s472_s27 = ssub.s32 %s3815_s24, %s3962_s3  ;;  %p485_p0 = scmp.ne.s32.totalorder %s3811_s23, %s3807_s22 }
  0x16   : > { %p473_p1 = scmp.eq.s32.totalorder %s472_s27, 0  ;;  %p486_p2 = scmp.eq.s32.totalorder %s3958_s2, 1 }
  0x17   : > { %p491_p3 = scmp.ne.s32.totalorder %s3807_s22, %s3803_s1  ;;  %p492_p4 = scmp.eq.s32.totalorder %s3066_s25, 1 }
  0x18   : > { %s3973_s28 = scalar_select %p473_p1, %s3811_s23, %s475_s26  }
  0x19   : > { %p3975_p5 = por %p486_p2, %p485_p0  ;;  %p3979_p6 = por %p492_p4, %p491_p3 }
  0x1a   : > { %5005 = sst [smem:[#allocation28_spill]] %s3973_s28  ;;  %p3067_p7 = scmp.ge.s32.totalorder %s3815_s24, 1 }
  0x1b   : > { %s5006_s4 = scalar_select %p3975_p5, 1, 0 }
  0x1c   : > { %s5008_s29 = scalar_select %p3979_p6, 1, 0 }
  0x1d   : > { %5007 = sst [smem:[#allocation29_spill]] %s5006_s4  ;;  %p499_p8 = scmp.lt.s32.totalorder %s3815_s24, 3 }
  0x1e   : > { %5009 = sst [smem:[#allocation30_spill]] %s5008_s29  ;;  %p3250_p9 = scmp.eq.s32.totalorder %s3958_s2, 0 }
  0x1f   : > { %p3986_p10 = pnand %p3067_p7, %p499_p8  ;;  %s5011_s25 = sld [smem:[#allocation34_spill]] }
  0x20   : > { %s3817_s27 = smov [#allocation5]   ;;  %s5012_s7 = sld [smem:[#allocation36_spill]] }
  0x21   : > { %p3218_p11 = pneg %p3986_p10  ;;  %s525_s28 = sshll.u32 %s3817_s27, 4  ;;  %s526_s28 = int_to_ptr.vmem [resolvable:$true] %s525_s28 }
  0x22   : > { %s5014_s9 = sld [smem:[#allocation37_spill]]  ;;  %s3818_s24 = smov [#allocation8]  }
  0x23   : > { %p4000_p12 = pnand %p3250_p9, %p3218_p11  ;;  %s555_s27 = sshll.u32 %s3818_s24, 4  ;;  %s556_s27 = int_to_ptr.vmem [resolvable:$true] %s555_s27 }
  0x24   : > { %s3819_s4 = smov [#allocation11]   ;;  %s3820_s0 = smov [#allocation14]  }
  0x25   : > { %s523_s26 = sshll.u32 %s5011_s25, 4  ;;  %s579_s20 = sshll.u32 %s3819_s4, 4  ;;  %s524_s26 = int_to_ptr.hbm [resolvable:$true] %s523_s26  ;;  %s580_s20 = int_to_ptr.vmem [resolvable:$true] %s579_s20 }
  0x26   : > { %s553_s29 = sshll.u32 %s5012_s7, 4  ;;  %s619_s7 = sshll.u32 %s4978_s17, 4  ;;  %s554_s29 = int_to_ptr.hbm [resolvable:$true] %s553_s29  ;;  %s620_s7 = int_to_ptr.hbm [resolvable:$true] %s619_s7 }
  0x27   : > { %3224 = dma.hbm_to_vmem [thread:$0]  (!%p4000_p12), %s524_s26, 16, %s526_s28, [#allocation6]  }
  0x28   : > { %s577_s25 = sshll.u32 %s5014_s9, 4  ;;  %s621_s24 = sshll.u32 %s3820_s0, 4  ;;  %s578_s25 = int_to_ptr.hbm [resolvable:$true] %s577_s25  ;;  %s622_s24 = int_to_ptr.vmem [resolvable:$true] %s621_s24 }
  0x29   : > { %3230 = dma.hbm_to_vmem [thread:$0]  (!%p4000_p12), %s554_s29, 16, %s556_s27, [#allocation9]  }
  0x2a   : > { %3236 = dma.hbm_to_vmem [thread:$0]  (!%p4000_p12), %s578_s25, 16, %s580_s20, [#allocation12]  }
  0x2b   : > { %s5015_s28 = sld [smem:[#allocation33_spill]]  ;;  %s538_s23 = sshll.u32 %s4966_s5, 4  ;;  %s539_s23 = int_to_ptr.hbm [resolvable:$true] %s538_s23 }
  0x2c   : > { %3242 = dma.hbm_to_vmem [thread:$0]  (!%p4000_p12), %s620_s7, 16, %s622_s24, [#allocation15]  }
  0x2d   : > { %s3821_s4 = smov [#allocation2]   ;;  %s3822_s20 = smov [#allocation7]  }
  0x2e   : > { %s513_s3 = sshll.u32 %s3821_s4, 4  ;;  %s540_s25 = sshll.u32 %s3822_s20, 4  ;;  %s514_s3 = int_to_ptr.vmem [resolvable:$true] %s513_s3  ;;  %s541_s25 = int_to_ptr.vmem [resolvable:$true] %s540_s25 }
  0x2f   : > { %s565_s21 = sshll.u32 %s4969_s8, 4  ;;  %s3823_s29 = smov [#allocation10]   ;;  %s566_s21 = int_to_ptr.hbm [resolvable:$true] %s565_s21 }
  0x30   : > { %3227 = dma.hbm_to_vmem [thread:$0]  (!%p4000_p12), %s539_s23, 16, %s541_s25, [#allocation6]  }
  0x31   : > { %s511_s26 = sshll.u32 %s5015_s28, 4  ;;  %s592_s28 = sshll.u32 %s4972_s11, 4  ;;  %s512_s26 = int_to_ptr.hbm [resolvable:$true] %s511_s26  ;;  %s593_s28 = int_to_ptr.hbm [resolvable:$true] %s592_s28 }
  0x32   : > { %3221 = dma.hbm_to_vmem [thread:$0]  (!%p4000_p12), %s512_s26, 64, %s514_s3, [#allocation3]  }
  0x33   : > { %s567_s27 = sshll.u32 %s3823_s29, 4  ;;  %s3824_s26 = smov [#allocation13]   ;;  %s568_s27 = int_to_ptr.vmem [resolvable:$true] %s567_s27 }
  0x34   : > { %3233 = dma.hbm_to_vmem [thread:$0]  (!%p4000_p12), %s566_s21, 64, %s568_s27, [#allocation9]  }
  0x35   : > { %s594_s4 = sshll.u32 %s3824_s26, 4  ;;  %s630_s9 = sshll.u32 %s4979_s18, 4  ;;  %s595_s4 = int_to_ptr.vmem [resolvable:$true] %s594_s4  ;;  %s631_s9 = int_to_ptr.hbm [resolvable:$true] %s630_s9 }
  0x36   : > { %3239 = dma.hbm_to_vmem [thread:$0]  (!%p4000_p12), %s593_s28, 16, %s595_s4, [#allocation12]  }
  0x37   : > { %s3825_s23 = smov [#allocation16]   ;;  %s3826_s0 = smov 128  }
  0x38   : > { %s632_s25 = sshll.u32 %s3825_s23, 4  ;;  %s3827_s7 = smov 8   ;;  %s633_s25 = int_to_ptr.vmem [resolvable:$true] %s632_s25 }
  0x39   : > { %3245 = dma.hbm_to_vmem [thread:$0]  (!%p4000_p12), %s631_s9, 512, %s633_s25, [#allocation15], %s3826_s0, %s3826_s0, %s3827_s7  }
  0x3a   : > { %669 = sbr.rel (%p3986_p10) target bundleno = 1055 (0x41f), region = 100 }
  0x3f   : > { %3778 = dma.done.wait (%p3250_p9), [#allocation3], 64  }
  0x40   : > { %3780 = vsyncadd (%p3250_p9), [#allocation3], 4294967232 }
  0x41   : > { %3782 = dma.done.wait (%p3250_p9), [#allocation6], 32  }
  0x42   : > { %3784 = vsyncadd (%p3250_p9), [#allocation6], 4294967264 }
  0x43   : > { %3786 = dma.done.wait (%p3250_p9), [#allocation9], 80  }
  0x44   : > { %3788 = vsyncadd (%p3250_p9), [#allocation9], 4294967216 }
  0x45   : > { %3790 = dma.done.wait (%p3250_p9), [#allocation12], 32  }
  0x46   : > { %3792 = vsyncadd (%p3250_p9), [#allocation12], 4294967264 }
  0x47   : > { %3794 = dma.done.wait (%p3250_p9), [#allocation15], 528  }
  0x48   : > { %3796 = vsyncadd (%p3250_p9), [#allocation15], 4294966768  ;;  %s3089_s1 = sshll.u32 %s3958_s2, 2  ;;  %vm810_vm0 = vcmask 1040384   ;;  %vm811_vm1 = vcmask 1041408   ;;  %v3828_v0 = vmov 65535  }
  0x49   : > { %p774_p13 = scmp.lt.s32.totalorder %s3089_s1, 7  ;;  %v812_v1 = vsel %vm810_vm0, 4294967295, %v3828_v0  ;;  %s5016_s28 = sld [smem:[#allocation31_spill]]  ;;  %v921_v2 = vld [vmem:[%s4977_s16] sm:$0xf]  ;;  %vm927_vm2 = vcmask 31744  }
  0x4a   : > { %s5017_s4 = sld [smem:[#allocation32_spill]]  ;;  %v797_v3 = vld [vmem:[#allocation2] sm:$0x7]  ;;  %v813_v4 = vsel %vm811_vm1, %v812_v1, 0  ;;  %v922_v5 = vpack.c.bf16 %v921_v2, %v921_v2  ;;  %vm803_vm3 = vcmask 23552   ;;  %vm852_vm4 = vcmask 261120  }
  0x4b   : > { %s5030_s1 = smov (!%p774_p13, %s3089_s1), 7  ;;  %v798_v6 = vpack.c.bf16 %v797_v3, %v797_v3  ;;  %v1173_v14 = vld [vmem:[#allocation10] sm:$0x7]  ;;  %s5018_s0 = sld [smem:[#allocation35_spill]]  ;;  %vm2729_vm5 = vcmask 1041409   ;;  %vm2731_vm6 = vcmask 1042434  }
  0x4c   : > { %s3090_s30 = sshll.u32 %s5030_s1, 3  ;;  %v935_v11 = vsel %vm811_vm1, %v922_v5, 0  ;;  %v1174_v16 = vpack.c.bf16 %v1173_v14, %v1173_v14  ;;  %s3829_s25 = smov 96   ;;  %vm2733_vm7 = vcmask 1043459   ;;  %vm2735_vm8 = vcmask 1044484  }
  0x4d   : > { %v815_v12 = vand.u32 %v813_v4, %v798_v6  ;;  %944 = vmatpush.bf16.msra.mxu3 %v935_v11  ;;  %vm2737_vm9 = vcmask 1045509   ;;  %vm2739_vm10 = vcmask 1046534   ;;  %vm2741_vm11 = vcmask 1047559   ;;  %s770_s7 = sand.u32 1, %s3807_s22   ;;  %s3177_s27 = sshll.u32 %s3958_s2, 5 }
  0x4e   : > { %v1228_v17 = vand.u32 %v1174_v16, %v813_v4  ;;  %s3088_s21 = sshll.u32 %s770_s7, 5 }
  0x4f   : > { %s777_s29 = scalar_lea.vmem %s5016_s28, %s3090_s30  ;;  %824 = vmatpush.bf16.msra.mxu0 %v815_v12  ;;  %s4716_s24 = scalar_lea.vmem [#allocation17], %s3088_s21 }
  0x50   : > { %s783_s3 = scalar_lea.vmem %s5017_s4, %s3090_s30  ;;  %v787_v7 = vld [vmem:[%s777_s29] sm:$0xff]  ;;  %v4076_v8 = vld [vmem:[%s777_s29 + $0x8] sm:$0xff]  ;;  %v4082_v20 = vld [vmem:[%s777_s29 + $0x10] sm:$0xff]  ;;  %s2901_s9 = sshll.u32 %s4716_s24, 4  ;;  %s2902_s9 = int_to_ptr.vmem [resolvable:$true] %s2901_s9 }
  0x51   : > { %v791_v9 = vld [vmem:[%s783_s3] sm:$0xff]  ;;  %v792_v10 = vld [vmem:[%s783_s3 + $0x8] sm:$0xff]  ;;  %v795_v15 = vpack.c.bf16 %v4076_v8, %v787_v7  ;;  %1237 = vmatpush.bf16.msrb.mxu3 %v1228_v17  ;;  %v793_v18 = vld [vmem:[%s783_s3 + $0x10] sm:$0xff]  ;;  %v1001_v23 = vrot.slane %v787_v7, 1  ;;  %v1029_v25 = vperm.slane %v787_v7, 0  ;;  %v1002_v32 = vrot.slane %v787_v7, 2 }
  0x52   : > { %v919_v13 = vpack.c.bf16 %v792_v10, %v791_v9  ;;  %v794_v19 = vld [vmem:[%s783_s3 + $0x18] sm:$0xff]  ;;  %v1003_v33 = vrot.slane %v787_v7, 3  ;;  %v1004_v41 = vrot.slane %v787_v7, 4  ;;  %v1005_v42 = vrot.slane %v787_v7, 5  ;;  %v843_v14 = vld [vmem:[%s5018_s0 + $0x8] sm:$0xff]  ;;  %s5019_s3 = sld [smem:[#allocation38_spill]] }
  0x53   : > { %3093 = vmatmul.msk.bf16.vlgmr.msra.gmra.mxu0 %vm803_vm3, %v795_v15  ;;  %v4084_v21 = vld [vmem:[%s777_s29 + $0x18] sm:$0xff]  ;;  %v920_v22 = vpack.c.bf16 %v794_v19, %v793_v18  ;;  %v1030_v26 = vperm.slane %v1001_v23, 0  ;;  %v1093_v27 = vsub.f32 %v1029_v25, %v787_v7  ;;  %v1031_v34 = vperm.slane %v1002_v32, 0 }
  0x54   : > { %3099 = vmatmul.msk.bf16.vlgmr.msra.gmra.mxu3 %vm927_vm2, %v919_v13  ;;  %v796_v24 = vpack.c.bf16 %v4084_v21, %v4082_v20  ;;  %v1032_v35 = vperm.slane %v1003_v33, 0  ;;  %v1033_v43 = vperm.slane %v1004_v41, 0  ;;  %v1034_v44 = vperm.slane %v1005_v42, 0  ;;  %v845_v9 = vld [vmem:[%s5018_s0 + $0x18] sm:$0xff]  ;;  %v842_v13 = vld [vmem:[%s5018_s0] sm:$0xff] }
  0x55   : > { %v1094_v28 = vsub.f32 %v1030_v26, %v787_v7  ;;  %v1125_v29 = vand.u32 2147483647, %v1093_v27  ;;  %v1095_v36 = vsub.f32 %v1031_v34, %v787_v7  ;;  %v1006_v50 = vrot.slane %v787_v7, 6 }
  0x56   : > { %v1096_v37 = vsub.f32 %v1032_v35, %v787_v7  ;;  %v1097_v45 = vsub.f32 %v1033_v43, %v787_v7  ;;  %v1098_v46 = vsub.f32 %v1034_v44, %v787_v7  ;;  %v1007_v51 = vrot.slane %v787_v7, 7  ;;  %v3316_v35 = vld [vmem:[#allocation5] ss:$0 sm:$0xff]  ;;  %v1369_v44 = vld [vmem:[%s4971_s10 + $0x10] sm:$0xff] }
  0x57   : > { %v1126_v30 = vand.u32 2147483647, %v1094_v28  ;;  %v1127_v38 = vand.u32 2147483647, %v1095_v36  ;;  %v1035_v52 = vperm.slane %v1006_v50, 0  ;;  %v1008_v59 = vrot.slane %v4076_v8, 1 }
  0x58   : > { %v1128_v39 = vand.u32 2147483647, %v1096_v37  ;;  %v1129_v47 = vand.u32 2147483647, %v1097_v45  ;;  %v1130_v48 = vand.u32 2147483647, %v1098_v46  ;;  %v846_v17 = vpack.c.bf16 %v843_v14, %v842_v13  ;;  %s2900_s20 = scalar_lea.hbm %s5019_s3, %s3177_s27 }
  0x59   : > { %v1157_v31 = vpack.c.bf16 %v1126_v30, %v1125_v29  ;;  %v1036_v53 = vperm.slane %v1007_v51, 0  ;;  %v1099_v54 = vsub.f32 %v1035_v52, %v787_v7  ;;  %v1037_v60 = vperm.slane %v4076_v8, 0  ;;  %v1370_v45 = vld [vmem:[%s4971_s10 + $0x18] sm:$0xff]  ;;  %v1367_v52 = vld [vmem:[%s4971_s10] sm:$0xff]  ;;  %s2903_s23 = sshll.u32 %s2900_s20, 4  ;;  %s3753_s29 = scalar_lea.hbm %s5019_s3, 64  ;;  %s2904_s23 = int_to_ptr.hbm [resolvable:$true] %s2903_s23 }
  0x5a   : > { %v1158_v40 = vpack.c.bf16 %v1128_v39, %v1127_v38  ;;  %v1159_v49 = vpack.c.bf16 %v1130_v48, %v1129_v47  ;;  %v1038_v61 = vperm.slane %v1008_v59, 0  ;;  %v1009_v3 = vrot.slane %v4076_v8, 2  ;;  %s3747_s1 = sshra.s32 %s2904_s23, 4  ;;  %s3748_s1 = int_to_ptr.hbm [resolvable:$true] %s3747_s1 }
  0x5b   : > { %v1100_v55 = vsub.f32 %v1036_v53, %v787_v7  ;;  %v1131_v56 = vand.u32 2147483647, %v1099_v54  ;;  %v1101_v62 = vsub.f32 %v1037_v60, %v4076_v8  ;;  %v1010_v4 = vrot.slane %v4076_v8, 3  ;;  %v844_v7 = vld [vmem:[%s5018_s0 + $0x10] sm:$0xff]  ;;  %v1368_v53 = vld [vmem:[%s4971_s10 + $0x8] sm:$0xff]  ;;  %s3749_s30 = scalar_lea.hbm %s3748_s1, 32  ;;  %p3754_p3 = scmp.lt.s32.totalorder %s3748_s1, %s5019_s3 }
  0x5c   : > { %v1102_v63 = vsub.f32 %v1038_v61, %v4076_v8  ;;  %v1039_v5 = vperm.slane %v1009_v3, 0  ;;  %v847_v12 = vpack.c.bf16 %v845_v9, %v844_v7  ;;  %v1011_v19 = vrot.slane %v4076_v8, 4  ;;  %p3750_p0 = scmp.ne.s32.totalorder %s3748_s1, %s3749_s30  ;;  %p3755_p4 = scmp.lt.s32.totalorder %s3753_s29, %s3749_s30 }
  0x5d   : > { %v1132_v57 = vand.u32 2147483647, %v1100_v55  ;;  %v1133_v0 = vand.u32 2147483647, %v1101_v62  ;;  %v1040_v6 = vperm.slane %v1010_v4, 0  ;;  %v1013_v30 = vrot.slane %v4076_v8, 6 }
  0x5e   : > { %v1134_v1 = vand.u32 2147483647, %v1102_v63  ;;  %v1103_v10 = vsub.f32 %v1039_v5, %v4076_v8  ;;  %865 = vmatpush.bf16.msra.mxu1 %v847_v12  ;;  %v1041_v23 = vperm.slane %v1011_v19, 0  ;;  %v1372_v48 = vpack.c.bf16 %v1370_v45, %v1369_v44  ;;  %v964_v19 = vld [vmem:[#allocation16 + $0x10] sm:$0xff]  ;;  %p3751_p1 = pnand %p3750_p0, %p3975_p5  ;;  %p3756_p7 = por %p3755_p4, %p3754_p3 }
  0x5f   : > { %v1160_v58 = vpack.c.bf16 %v1132_v57, %v1131_v56  ;;  %v1104_v11 = vsub.f32 %v1040_v6, %v4076_v8  ;;  %v1043_v33 = vperm.slane %v1013_v30, 0  ;;  %v1015_v51 = vrot.slane %v4082_v20, 1  ;;  %v963_v30 = vld [vmem:[#allocation16 + $0x8] sm:$0xff] }
  0x60   : > { %v1161_v2 = vpack.c.bf16 %v1134_v1, %v1133_v0  ;;  %v1135_v15 = vand.u32 2147483647, %v1103_v10  ;;  %v1105_v25 = vsub.f32 %v1041_v23, %v4076_v8  ;;  %2619 = vmatpush.bf16.msra.mxu3 %v1372_v48  ;;  %v1371_v54 = vpack.c.bf16 %v1368_v53, %v1367_v52  ;;  %v3317_v10 = vld [vmem:[#allocation14] ss:$0 sm:$0xff]  ;;  %p3752_p2 = pneg %p3751_p1 }
  0x61   : > { %v1136_v16 = vand.u32 2147483647, %v1104_v11  ;;  %v1107_v37 = vsub.f32 %v1043_v33, %v4076_v8  ;;  %v1045_v56 = vperm.slane %v4082_v20, 0  ;;  %v1046_v57 = vperm.slane %v1015_v51, 0 }
  0x62   : > { %866 = vmatpush.bf16.msra.mxu1 %v846_v17  ;;  %v1137_v27 = vand.u32 2147483647, %v1105_v25  ;;  %v1016_v7 = vrot.slane %v4082_v20, 2  ;;  %v1017_v9 = vrot.slane %v4082_v20, 3  ;;  %v1019_v33 = vrot.slane %v4082_v20, 5  ;;  %p3757_p8 = pnand %p3756_p7, %p3752_p2 }
  0x63   : > { %3094 = vmatmul.msk.bf16.gmra.mxu0 %vm803_vm3, %v796_v24  ;;  %v1162_v18 = vpack.c.bf16 %v1136_v16, %v1135_v15  ;;  %v1139_v42 = vand.u32 2147483647, %v1107_v37  ;;  %v1109_v60 = vsub.f32 %v1045_v56, %v4082_v20  ;;  %v1110_v61 = vsub.f32 %v1046_v57, %v4082_v20  ;;  %v4147_v16 = vld [vmem:[#allocation11] ss:$0 sm:$0xff] }
  0x64   : > { %3100 = vmatmul.msk.bf16.gmra.mxu3 %vm927_vm2, %v920_v22  ;;  %v1012_v22 = vrot.slane %v4076_v8, 5  ;;  %v1047_v11 = vperm.slane %v1016_v7, 0  ;;  %v1048_v12 = vperm.slane %v1017_v9, 0  ;;  %v1020_v56 = vrot.slane %v4082_v20, 6 }
  0x65   : > { %2620 = vmatpush.bf16.msra.mxu3 %v1371_v54  ;;  %v1141_v1 = vand.u32 2147483647, %v1109_v60  ;;  %v1021_v57 = vrot.slane %v4082_v20, 7 }
  0x66   : > { %v1042_v24 = vperm.slane %v1012_v22, 0  ;;  %1431 = vmatpush.bf16.msrb.mxu1 %v1372_v48  ;;  %v1111_v17 = vsub.f32 %v1047_v11, %v4082_v20  ;;  %v965_v22 = vld [vmem:[#allocation16 + $0x18] sm:$0xff] }
  0x68   : > { %v1106_v26 = vsub.f32 %v1042_v24, %v4076_v8  ;;  %v967_v24 = vpack.c.bf16 %v965_v22, %v964_v19  ;;  %v881_v19 = vld [vmem:[%s4967_s6 + $0x18] sm:$0xff] }
  0x6a   : > { %v1138_v28 = vand.u32 2147483647, %v1106_v26  ;;  %1432 = vmatpush.bf16.msrb.mxu1 %v1371_v54  ;;  %984 = vmatpush.bf16.msrb.mxu0 %v967_v24 }
  0x6c   : > { %v1163_v29 = vpack.c.bf16 %v1138_v28, %v1137_v27  ;;  %v1143_v27 = vand.u32 2147483647, %v1111_v17 }
  0x74   : > { %3103 = vmatmul.msk.bf16.vlgmr.msrb.gmra.mxu3 %vm803_vm3, %v1157_v31  ;;  %v1014_v31 = vrot.slane %v4076_v8, 7 }
  0x76   : > { %v1044_v34 = vperm.slane %v1014_v31, 0 }
  0x78   : > { %v1108_v38 = vsub.f32 %v1044_v34, %v4076_v8 }
  0x7a   : > { %v1140_v43 = vand.u32 2147483647, %v1108_v38 }
  0x7c   : > { %v1164_v8 = vpack.c.bf16 %v1140_v43, %v1139_v42 }
  0x84   : > { %3104 = vmatmul.msk.bf16.gmra.mxu3 %vm803_vm3, %v1158_v40 }
  0x94   : > { %3105 = vmatmul.msk.bf16.gmra.mxu3 %vm803_vm3, %v1159_v49 }
  0xa4   : > { %3106 = vmatmul.msk.bf16.gmra.mxu3 %vm803_vm3, %v1160_v58 }
  0xb4   : > { %3107 = vmatmul.msk.bf16.gmra.mxu3 %vm803_vm3, %v1161_v2  ;;  %v1142_v2 = vand.u32 2147483647, %v1110_v61  ;;  %v1051_v61 = vperm.slane %v1020_v56, 0 }
  0xb6   : > { %v1165_v6 = vpack.c.bf16 %v1142_v2, %v1141_v1 }
  0xc4   : > { %3108 = vmatmul.msk.bf16.gmra.mxu3 %vm803_vm3, %v1162_v18  ;;  %v1112_v18 = vsub.f32 %v1048_v12, %v4082_v20  ;;  %v1053_v12 = vperm.slane %v4084_v21, 0 }
  0xc6   : > { %v1144_v28 = vand.u32 2147483647, %v1112_v18  ;;  %v880_v18 = vld [vmem:[%s4967_s6 + $0x10] sm:$0xff] }
  0xc7   : > { %v883_v24 = vpack.c.bf16 %v881_v19, %v880_v18 }
  0xc8   : > { %v1166_v38 = vpack.c.bf16 %v1144_v28, %v1143_v27  ;;  %v879_v27 = vld [vmem:[%s4967_s6 + $0x8] sm:$0xff] }
  0xc9   : > { %906 = vmatpush.bf16.msra.mxu2 %v883_v24  ;;  %v1175_v24 = vld [vmem:[#allocation11] sm:$0x1] }
  0xd0   : > { %v826_v32 = vpop.f32.mrf.mxu0 }
  0xd1   : > { %v827_v39 = vadd.f32 %v3316_v35, %v826_v32  ;;  %v1018_v32 = vrot.slane %v4082_v20, 4 }
  0xd3   : > { %v836_v46 = vmax.f32 %v827_v39, 0.0 }
  0xd4   : > { %3109 = vmatmul.msk.bf16.gmra.mxu3 %vm803_vm3, %v1163_v29  ;;  %v962_v29 = vld [vmem:[#allocation16] sm:$0xff] }
  0xd5   : > { %v966_v34 = vpack.c.bf16 %v963_v30, %v962_v29 }
  0xd7   : > { %v946_v36 = vpop.f32.mrf.mxu3  ;;  %985 = vmatpush.bf16.msrb.mxu0 %v966_v34  ;;  %v1024_v34 = vrot.slane %v4084_v21, 3 }
  0xd8   : > { %v828_v40 = vpop.f32.mrf.mxu0  ;;  %v947_v13 = vadd.f32 %v3317_v10, %v946_v36 }
  0xd9   : > { %v829_v41 = vadd.f32 %v3316_v35, %v828_v40  ;;  %v1049_v40 = vperm.slane %v1018_v32, 0 }
  0xda   : > { %v956_v23 = vmax.f32 %v947_v13, 0.0 }
  0xdb   : > { %v837_v47 = vmax.f32 %v829_v41, 0.0  ;;  %v1050_v41 = vperm.slane %v1019_v33, 0  ;;  %v1113_v44 = vsub.f32 %v1049_v40, %v4082_v20  ;;  %v1023_v33 = vrot.slane %v4084_v21, 2 }
  0xdd   : > { %v840_v50 = vpack.c.bf16 %v837_v47, %v836_v46  ;;  %v1114_v45 = vsub.f32 %v1050_v41, %v4082_v20  ;;  %v1145_v48 = vand.u32 2147483647, %v1113_v44 }
  0xdf   : > { %v948_v49 = vpop.f32.mrf.mxu3  ;;  %890 = vrot.lane.b32.xlu0 %v840_v50, %s3829_s25  ;;  %3095 = vmatmul.msk.bf16.vlgmr.msra.gmra.mxu1 %vm852_vm4, %v840_v50 }
  0xe0   : > { %v831_v55 = vpop.f32.mrf.mxu0  ;;  %v949_v15 = vadd.f32 %v3317_v10, %v948_v49  ;;  %v1146_v49 = vand.u32 2147483647, %v1114_v45 }
  0xe1   : > { %v832_v58 = vadd.f32 %v3316_v35, %v831_v55 }
  0xe2   : > { %v957_v25 = vmax.f32 %v949_v15, 0.0  ;;  %v1167_v53 = vpack.c.bf16 %v1146_v49, %v1145_v48  ;;  %v1117_v15 = vsub.f32 %v1053_v12, %v4084_v21 }
  0xe3   : > { %v838_v63 = vmax.f32 %v832_v58, 0.0 }
  0xe4   : > { %3110 = vmatmul.msk.bf16.gmra.mxu3 %vm803_vm3, %v1164_v8  ;;  %v1149_v22 = vand.u32 2147483647, %v1117_v15 }
  0xe7   : > { %v951_v59 = vpop.f32.mrf.mxu3 }
  0xe8   : > { %v833_v62 = vpop.f32.mrf.mxu0  ;;  %v952_v46 = vadd.f32 %v3317_v10, %v951_v59 }
  0xe9   : > { %v834_v0 = vadd.f32 %v3316_v35, %v833_v62  ;;  %v960_v35 = vpack.c.bf16 %v957_v25, %v956_v23  ;;  %v1052_v62 = vperm.slane %v1021_v57, 0 }
  0xea   : > { %v958_v8 = vmax.f32 %v952_v46, 0.0  ;;  %v1025_v46 = vrot.slane %v4084_v21, 4 }
  0xeb   : > { %v839_v3 = vmax.f32 %v834_v0, 0.0  ;;  %3101 = vmatmul.msk.bf16.vlgmr.msrb.gmra.mxu0 %vm852_vm4, %v960_v35  ;;  %v1115_v0 = vsub.f32 %v1051_v61, %v4082_v20  ;;  %v1116_v1 = vsub.f32 %v1052_v62, %v4082_v20 }
  0xed   : > { %v841_v5 = vpack.c.bf16 %v839_v3, %v838_v63  ;;  %v1147_v3 = vand.u32 2147483647, %v1115_v0  ;;  %v1027_v0 = vrot.slane %v4084_v21, 6 }
  0xef   : > { %v953_v4 = vpop.f32.mrf.mxu3  ;;  %892 = vrot.lane.b32.xlu0 %v841_v5, %s3829_s25  ;;  %3096 = vmatmul.msk.bf16.gmra.mxu1 %vm852_vm4, %v841_v5  ;;  %s2889_s25 = scalar_lea.sflag [#allocation4], %s770_s7 }
  0xf0   : > { %v954_v47 = vadd.f32 %v3317_v10, %v953_v4  ;;  %v1148_v4 = vand.u32 2147483647, %v1116_v1  ;;  %v1028_v1 = vrot.slane %v4084_v21, 7 }
  0xf2   : > { %v959_v51 = vmax.f32 %v954_v47, 0.0  ;;  %v1168_v10 = vpack.c.bf16 %v1148_v4, %v1147_v3  ;;  %v1026_v47 = vrot.slane %v4084_v21, 5 }
  0xf4   : > { %3111 = vmatmul.msk.bf16.gmra.mxu3 %vm803_vm3, %v1165_v6  ;;  %v961_v60 = vpack.c.bf16 %v959_v51, %v958_v8  ;;  %v1022_v6 = vrot.slane %v4084_v21, 1  ;;  %v1057_v51 = vperm.slane %v1025_v46, 0 }
  0xf6   : > { %v1054_v13 = vperm.slane %v1022_v6, 0  ;;  %v1060_v6 = vperm.slane %v1028_v1, 0  ;;  %v1725_v1 = vld [vmem:[%s4973_s12 + $0x18] sm:$0xff] }
  0xf7   : > { %v1239_v14 = vpop.f32.mrf.mxu3 }
  0xf8   : > { %v1240_v26 = vadd.f32 %v4147_v16, %v1239_v14  ;;  %v1118_v17 = vsub.f32 %v1054_v13, %v4084_v21 }
  0xfa   : > { %v1319_v36 = vmax.f32 %v1240_v26, 0.0  ;;  %v1150_v23 = vand.u32 2147483647, %v1118_v17  ;;  %v878_v26 = vld [vmem:[%s4967_s6] sm:$0xff] }
  0xfb   : > { %3102 = vmatmul.msk.bf16.gmra.mxu0 %vm852_vm4, %v961_v60  ;;  %v882_v30 = vpack.c.bf16 %v879_v27, %v878_v26  ;;  %v2608_v26 = vmax.f32 %v1175_v24, 0.0 }
  0xfc   : > { %v1169_v29 = vpack.c.bf16 %v1150_v23, %v1149_v22 }
  0xfd   : > { %907 = vmatpush.bf16.msra.mxu2 %v882_v30 }
  0xff   : > { %v1241_v31 = vpop.f32.mrf.mxu3 }
 0x100   : > { %v1242_v37 = vadd.f32 %v4147_v16, %v1241_v31 }
 0x102   : > { %v1320_v39 = vmax.f32 %v1242_v37, 0.0  ;;  %v1055_v37 = vperm.slane %v1023_v33, 0 }
 0x104   : > { %v1351_v42 = vpack.c.bf16 %v1320_v39, %v1319_v36  ;;  %3112 = vmatmul.msk.bf16.gmra.mxu3 %vm803_vm3, %v1166_v38  ;;  %v1056_v38 = vperm.slane %v1024_v34, 0  ;;  %v1119_v40 = vsub.f32 %v1055_v37, %v4084_v21 }
 0x106   : > { %3119 = vmatmul.msk.bf16.vlgmr.msrb.gmra.mxu1 %vm852_vm4, %v1351_v42  ;;  %v1120_v41 = vsub.f32 %v1056_v38, %v4084_v21 }
 0x107   : > { %v1244_v43 = vpop.f32.mrf.mxu3 }
 0x108   : > { %v1245_v50 = vadd.f32 %v4147_v16, %v1244_v43  ;;  %v1151_v43 = vand.u32 2147483647, %v1119_v40  ;;  %v1152_v44 = vand.u32 2147483647, %v1120_v41 }
 0x10a   : > { %v1321_v54 = vmax.f32 %v1245_v50, 0.0  ;;  %v1170_v50 = vpack.c.bf16 %v1152_v44, %v1151_v43 }
 0x10f   : > { %v1246_v52 = vpop.f32.mrf.mxu3 }
 0x110   : > { %v1247_v55 = vadd.f32 %v4147_v16, %v1246_v52  ;;  %v1058_v52 = vperm.slane %v1026_v47, 0 }
 0x112   : > { %v1322_v58 = vmax.f32 %v1247_v55, 0.0  ;;  %v1121_v55 = vsub.f32 %v1057_v51, %v4084_v21  ;;  %v1122_v56 = vsub.f32 %v1058_v52, %v4084_v21  ;;  %v3321_v51 = vld [vmem:[%s4980_s19] ss:$0 sm:$0xff] }
 0x114   : > { %3113 = vmatmul.msk.bf16.gmra.mxu3 %vm803_vm3, %v1167_v53  ;;  %v1352_v59 = vpack.c.bf16 %v1322_v58, %v1321_v54  ;;  %v1153_v57 = vand.u32 2147483647, %v1121_v55  ;;  %v1154_v58 = vand.u32 2147483647, %v1122_v56 }
 0x116   : > { %3120 = vmatmul.msk.bf16.gmra.mxu1 %vm852_vm4, %v1352_v59  ;;  %v1171_v61 = vpack.c.bf16 %v1154_v58, %v1153_v57 }
 0x117   : > { %v1249_v63 = vpop.f32.mrf.mxu3 }
 0x118   : > { %v1250_v2 = vadd.f32 %v4147_v16, %v1249_v63 }
 0x11a   : > { %v1323_v7 = vmax.f32 %v1250_v2, 0.0 }
 0x11f   : > { %v1251_v5 = vpop.f32.mrf.mxu3 }
 0x120   : > { %v1252_v9 = vadd.f32 %v4147_v16, %v1251_v5  ;;  %v1059_v5 = vperm.slane %v1027_v0, 0  ;;  %v1724_v0 = vld [vmem:[%s4973_s12 + $0x10] sm:$0xff] }
 0x122   : > { %v1324_v11 = vmax.f32 %v1252_v9, 0.0  ;;  %v1123_v9 = vsub.f32 %v1059_v5, %v4084_v21 }
 0x124   : > { %3114 = vmatmul.msk.bf16.gmra.mxu3 %vm803_vm3, %v1168_v10  ;;  %v1353_v14 = vpack.c.bf16 %v1324_v11, %v1323_v7  ;;  %v1124_v10 = vsub.f32 %v1060_v6, %v4084_v21  ;;  %v1155_v12 = vand.u32 2147483647, %v1123_v9 }
 0x126   : > { %3121 = vmatmul.msk.bf16.gmra.mxu1 %vm852_vm4, %v1353_v14  ;;  %v1156_v13 = vand.u32 2147483647, %v1124_v10 }
 0x127   : > { %v1254_v20 = vpop.f32.mrf.mxu3 }
 0x128   : > { %v1255_v25 = vadd.f32 %v4147_v16, %v1254_v20  ;;  %v1172_v17 = vpack.c.bf16 %v1156_v13, %v1155_v12  ;;  %v1722_v13 = vld [vmem:[%s4973_s12] sm:$0xff] }
 0x12a   : > { %v1325_v31 = vmax.f32 %v1255_v25, 0.0 }
 0x12f   : > { %v1256_v28 = vpop.f32.mrf.mxu3 }
 0x130   : > { %v1257_v32 = vadd.f32 %v4147_v16, %v1256_v28 }
 0x132   : > { %v1326_v35 = vmax.f32 %v1257_v32, 0.0 }
 0x134   : > { %3115 = vmatmul.msk.bf16.gmra.mxu3 %vm803_vm3, %v1169_v29  ;;  %v1354_v36 = vpack.c.bf16 %v1326_v35, %v1325_v31  ;;  %v2609_v31 = vpack.c.bf16 %v2608_v26, %v2608_v26 }
 0x136   : > { %3122 = vmatmul.msk.bf16.gmra.mxu1 %vm852_vm4, %v1354_v36 }
 0x137   : > { %v1259_v39 = vpop.f32.mrf.mxu3 }
 0x138   : > { %v1260_v42 = vadd.f32 %v4147_v16, %v1259_v39 }
 0x13a   : > { %v1327_v48 = vmax.f32 %v1260_v42, 0.0 }
 0x13f   : > { %v1261_v45 = vpop.f32.mrf.mxu3 }
 0x140   : > { %v1262_v49 = vadd.f32 %v4147_v16, %v1261_v45 }
 0x142   : > { %v1328_v8 = vmax.f32 %v1262_v49, 0.0 }
 0x144   : > { %3116 = vmatmul.msk.bf16.gmra.mxu3 %vm803_vm3, %v1170_v50  ;;  %v1355_v53 = vpack.c.bf16 %v1328_v8, %v1327_v48 }
 0x146   : > { %3123 = vmatmul.msk.bf16.gmra.mxu1 %vm852_vm4, %v1355_v53 }
 0x147   : > { %v1264_v54 = vpop.f32.mrf.mxu3 }
 0x148   : > { %v1265_v60 = vadd.f32 %v4147_v16, %v1264_v54 }
 0x14a   : > { %v1329_v62 = vmax.f32 %v1265_v60, 0.0 }
 0x14f   : > { %v1266_v59 = vpop.f32.mrf.mxu3 }
 0x150   : > { %v1267_v63 = vadd.f32 %v4147_v16, %v1266_v59 }
 0x151   : > { %v891_v3 = vpop.permute.xlu0 %890 }
 0x152   : > { %v1330_v2 = vmax.f32 %v1267_v63, 0.0  ;;  %3097 = vmatmul.msk.bf16.vlgmr.msra.gmra.mxu2 %vm852_vm4, %v891_v3 }
 0x154   : > { %3117 = vmatmul.msk.bf16.gmra.mxu3 %vm803_vm3, %v1171_v61  ;;  %v1356_v4 = vpack.c.bf16 %v1330_v2, %v1329_v62  ;;  %v1727_v2 = vpack.c.bf16 %v1725_v1, %v1724_v0 }
 0x156   : > { %3124 = vmatmul.msk.bf16.gmra.mxu1 %vm852_vm4, %v1356_v4  ;;  %1786 = vmatpush.bf16.msrb.mxu2 %v1727_v2 }
 0x157   : > { %v1269_v7 = vpop.f32.mrf.mxu3  ;;  %2653 = vmatpush.bf16.msra.mxu1 %v1727_v2  ;;  %3178 = vmatpush.bf16.msrb.mxu3 %v1727_v2 }
 0x158   : > { %v1270_v11 = vadd.f32 %v4147_v16, %v1269_v7 }
 0x15a   : > { %v1331_v20 = vmax.f32 %v1270_v11, 0.0 }
 0x15c   : > { %v4218_v23 = vpop.f32.mrf.mxu1 }
 0x15f   : > { %v1271_v14 = vpop.f32.mrf.mxu3 }
 0x160   : > { %v1272_v15 = vadd.f32 %v4147_v16, %v1271_v14  ;;  %v1723_v14 = vld [vmem:[%s4973_s12 + $0x8] sm:$0xff] }
 0x161   : > { %v893_v19 = vpop.permute.xlu0 %892 }
 0x162   : > { %v1332_v18 = vmax.f32 %v1272_v15, 0.0  ;;  %3098 = vmatmul.msk.bf16.gmra.mxu2 %vm852_vm4, %v893_v19 }
 0x164   : > { %v1357_v22 = vpack.c.bf16 %v1332_v18, %v1331_v20  ;;  %3118 = vmatmul.msk.bf16.gmra.mxu3 %vm803_vm3, %v1172_v17  ;;  %v4222_v27 = vpop.f32.mrf.mxu1  ;;  %v1726_v20 = vpack.c.bf16 %v1723_v14, %v1722_v13 }
 0x166   : > { %3125 = vmatmul.msk.bf16.gmra.mxu1 %vm852_vm4, %v1357_v22  ;;  %1787 = vmatpush.bf16.msrb.mxu2 %v1726_v20 }
 0x167   : > { %v1274_v21 = vpop.f32.mrf.mxu3  ;;  %3179 = vmatpush.bf16.msrb.mxu3 %v1726_v20  ;;  %2654 = vmatpush.bf16.msra.mxu1 %v1726_v20 }
 0x168   : > { %v1275_v25 = vadd.f32 %v4147_v16, %v1274_v21  ;;  %v4233_v41 = vpop.f32.mrf.mxu0 }
 0x16a   : > { %v1333_v29 = vmax.f32 %v1275_v25, 0.0 }
 0x16c   : > { %v4227_v34 = vpop.f32.mrf.mxu1 }
 0x16f   : > { %v1276_v28 = vpop.f32.mrf.mxu3 }
 0x170   : > { %v1277_v30 = vadd.f32 %v4147_v16, %v1276_v28  ;;  %v4236_v45 = vpop.f32.mrf.mxu0 }
 0x172   : > { %v1334_v32 = vmax.f32 %v1277_v30, 0.0 }
 0x174   : > { %v1358_v33 = vpack.c.bf16 %v1334_v32, %v1333_v29  ;;  %3167 = vmatmul.msk.bf16.vlgmr.msra.gmra.mxu3 %vm852_vm4, %v2609_v31  ;;  %v4231_v40 = vpop.f32.mrf.mxu1  ;;  %v4281_v29 = vld [vmem:[#allocation7] ss:$0 sm:$0xff] }
 0x175   : > { %v4286_v32 = vadd.f32 %v4281_v29, %v4218_v23 }
 0x176   : > { %3126 = vmatmul.msk.bf16.gmra.mxu1 %vm852_vm4, %v1358_v33 }
 0x177   : > { %v1279_v35 = vpop.f32.mrf.mxu3 }
 0x178   : > { %v1280_v36 = vadd.f32 %v4147_v16, %v1279_v35  ;;  %v992_v52 = vpop.f32.mrf.mxu0 }
 0x179   : > { %v4245_v54 = vadd.f32 %v3321_v51, %v992_v52 }
 0x17a   : > { %v1335_v38 = vmax.f32 %v1280_v36, 0.0 }
 0x17f   : > { %v1281_v37 = vpop.f32.mrf.mxu3 }
 0x180   : > { %v1282_v39 = vadd.f32 %v4147_v16, %v1281_v37 }
 0x182   : > { %v1336_v42 = vmax.f32 %v1282_v39, 0.0  ;;  %v4291_v39 = vld [vmem:[#allocation8] ss:$0 sm:$0xff] }
 0x183   : > { %v4238_v46 = vpop.f32.mrf.mxu1 }
 0x184   : > { %v1359_v43 = vpack.c.bf16 %v1336_v42, %v1335_v38  ;;  %v1518_v42 = vrot.slane %v4286_v32, 1 }
 0x186   : > { %3127 = vmatmul.msk.bf16.gmra.mxu1 %vm852_vm4, %v1359_v43  ;;  %v4294_v43 = vld [vmem:[#allocation13] ss:$0 sm:$0xff] }
 0x187   : > { %v1284_v44 = vpop.f32.mrf.mxu3 }
 0x188   : > { %v1285_v47 = vadd.f32 %v4147_v16, %v1284_v44 }
 0x18a   : > { %v1337_v49 = vmax.f32 %v1285_v47, 0.0 }
 0x18b   : > { %v4247_v55 = vpop.f32.mrf.mxu1 }
 0x18f   : > { %v1286_v48 = vpop.f32.mrf.mxu3 }
 0x190   : > { %v1287_v50 = vadd.f32 %v4147_v16, %v1286_v48  ;;  %v1546_v48 = vperm.slane %v4286_v32, 0 }
 0x192   : > { %v1338_v8 = vmax.f32 %v1287_v50, 0.0  ;;  %v1435_v50 = vadd.f32 %v4294_v43, %v4238_v46 }
 0x193   : > { %v4251_v58 = vpop.f32.mrf.mxu1 }
 0x194   : > { %v1360_v53 = vpack.c.bf16 %v1338_v8, %v1337_v49  ;;  %v1547_v49 = vperm.slane %v1518_v42, 0  ;;  %v1437_v8 = vadd.f32 %v4294_v43, %v4247_v55 }
 0x196   : > { %3128 = vmatmul.msk.bf16.gmra.mxu1 %vm852_vm4, %v1360_v53 }
 0x197   : > { %v1289_v56 = vpop.f32.mrf.mxu3 }
 0x198   : > { %v1290_v57 = vadd.f32 %v4147_v16, %v1289_v56 }
 0x19a   : > { %v1339_v59 = vmax.f32 %v1290_v57, 0.0 }
 0x19b   : > { %v4261_v4 = vpop.f32.mrf.mxu1 }
 0x19f   : > { %v1291_v60 = vpop.f32.mrf.mxu3 }
 0x1a0   : > { %v1292_v61 = vadd.f32 %v4147_v16, %v1291_v60 }
 0x1a2   : > { %v1340_v62 = vmax.f32 %v1292_v61, 0.0 }
 0x1a3   : > { %v4265_v11 = vpop.f32.mrf.mxu1 }
 0x1a4   : > { %v1361_v63 = vpack.c.bf16 %v1340_v62, %v1339_v59  ;;  %v1519_v62 = vrot.slane %v4286_v32, 2  ;;  %v1445_v42 = vadd.f32 %v4294_v43, %v4265_v11 }
 0x1a6   : > { %3129 = vmatmul.msk.bf16.gmra.mxu1 %vm852_vm4, %v1361_v63  ;;  %v1520_v63 = vrot.slane %v4286_v32, 3 }
 0x1a7   : > { %v1294_v3 = vpop.f32.mrf.mxu3 }
 0x1a8   : > { %v1295_v5 = vadd.f32 %v4147_v16, %v1294_v3 }
 0x1aa   : > { %v1341_v7 = vmax.f32 %v1295_v5, 0.0  ;;  %v1548_v5 = vperm.slane %v1519_v62, 0 }
 0x1ab   : > { %v4275_v18 = vpop.f32.mrf.mxu1 }
 0x1af   : > { %v1296_v6 = vpop.f32.mrf.mxu3 }
 0x1b0   : > { %v1297_v9 = vadd.f32 %v4147_v16, %v1296_v6  ;;  %v1549_v6 = vperm.slane %v1520_v63, 0 }
 0x1b2   : > { %v1342_v10 = vmax.f32 %v1297_v9, 0.0  ;;  %v1442_v9 = vadd.f32 %v4294_v43, %v4261_v4  ;;  %v1522_v4 = vrot.slane %v4286_v32, 5 }
 0x1b3   : > { %v4279_v26 = vpop.f32.mrf.mxu1 }
 0x1b4   : > { %v1362_v12 = vpack.c.bf16 %v1342_v10, %v1341_v7  ;;  %v1440_v7 = vadd.f32 %v4294_v43, %v4251_v58 }
 0x1b6   : > { %3130 = vmatmul.msk.bf16.gmra.mxu1 %vm852_vm4, %v1362_v12 }
 0x1b7   : > { %v1299_v15 = vpop.f32.mrf.mxu3 }
 0x1b8   : > { %v1300_v17 = vadd.f32 %v4147_v16, %v1299_v15 }
 0x1ba   : > { %v1343_v22 = vmax.f32 %v1300_v17, 0.0 }
 0x1bb   : > { %v4289_v36 = vpop.f32.mrf.mxu1 }
 0x1bf   : > { %v1301_v19 = vpop.f32.mrf.mxu3 }
 0x1c0   : > { %v1302_v21 = vadd.f32 %v4147_v16, %v1301_v19 }
 0x1c2   : > { %v1344_v24 = vmax.f32 %v1302_v21, 0.0 }
 0x1c3   : > { %v4307_v53 = vpop.f32.mrf.mxu1 }
 0x1c4   : > { %v1363_v25 = vpack.c.bf16 %v1344_v24, %v1343_v22  ;;  %v1521_v24 = vrot.slane %v4286_v32, 4 }
 0x1c6   : > { %3131 = vmatmul.msk.bf16.gmra.mxu1 %vm852_vm4, %v1363_v25 }
 0x1c7   : > { %v1304_v28 = vpop.f32.mrf.mxu3 }
 0x1c8   : > { %v1305_v30 = vadd.f32 %v4147_v16, %v1304_v28 }
 0x1ca   : > { %v1345_v33 = vmax.f32 %v1305_v30, 0.0 }
 0x1cb   : > { %v4320_v14 = vpop.f32.mrf.mxu1 }
 0x1cf   : > { %v1306_v31 = vpop.f32.mrf.mxu3 }
 0x1d0   : > { %v1307_v35 = vadd.f32 %v4147_v16, %v1306_v31 }
 0x1d2   : > { %v1346_v37 = vmax.f32 %v1307_v35, 0.0  ;;  %v1550_v35 = vperm.slane %v1521_v24, 0 }
 0x1d3   : > { %v4326_v25 = vpop.f32.mrf.mxu1 }
 0x1d4   : > { %v1364_v38 = vpack.c.bf16 %v1346_v37, %v1345_v33  ;;  %v1551_v37 = vperm.slane %v1522_v4, 0 }
 0x1d5   : > { %v909_v44 = vpop.f32.mrf.mxu2 }
 0x1d6   : > { %3132 = vmatmul.msk.bf16.gmra.mxu1 %vm852_vm4, %v1364_v38  ;;  %v4298_v23 = vadd.f32 %v4291_v39, %v909_v44  ;;  %v1447_v44 = vadd.f32 %v4294_v43, %v4275_v18 }
 0x1d7   : > { %v1309_v47 = vpop.f32.mrf.mxu3 }
 0x1d8   : > { %v1610_v51 = vsub.f32 %v1546_v48, %v4298_v23  ;;  %v1611_v52 = vsub.f32 %v1547_v49, %v4298_v23  ;;  %v1310_v56 = vadd.f32 %v4147_v16, %v1309_v47  ;;  %v1612_v12 = vsub.f32 %v1548_v5, %v4298_v23 }
 0x1d9   : > { %v1613_v13 = vsub.f32 %v1549_v6, %v4298_v23  ;;  %v1614_v48 = vsub.f32 %v1550_v35, %v4298_v23  ;;  %v1615_v49 = vsub.f32 %v1551_v37, %v4298_v23  ;;  %v2626_v62 = vsub.f32 %v4286_v32, %v4298_v23 }
 0x1da   : > { %v1642_v57 = vadd.f32 %v1610_v51, %v1435_v50  ;;  %v1643_v60 = vadd.f32 %v1611_v52, %v1437_v8  ;;  %v1347_v1 = vmax.f32 %v1310_v56, 0.0  ;;  %v1644_v15 = vadd.f32 %v1612_v12, %v1440_v7  ;;  %v1373_v8 = vld [vmem:[#allocation13] sm:$0x1] }
 0x1db   : > { %v1645_v17 = vadd.f32 %v1613_v13, %v1442_v9  ;;  %v1646_v18 = vadd.f32 %v1614_v48, %v1445_v42  ;;  %v1647_v56 = vadd.f32 %v1615_v49, %v1447_v44  ;;  %v1523_v5 = vrot.slane %v4286_v32, 6 }
 0x1dc   : > { %v1674_v59 = vmul.f32 0.17677669, %v1642_v57  ;;  %v1675_v61 = vmul.f32 0.17677669, %v1643_v60  ;;  %v1676_v21 = vmul.f32 0.17677669, %v1644_v15  ;;  %v4348_v57 = vadd.f32 %v4281_v29, %v4222_v27 }
 0x1dd   : > { %v911_v46 = vpop.f32.mrf.mxu2  ;;  %v1677_v58 = vmul.f32 0.17677669, %v1645_v17  ;;  %v4352_v60 = vadd.f32 %v4281_v29, %v4227_v34  ;;  %v1524_v6 = vrot.slane %v4286_v32, 7  ;;  %v1552_v15 = vperm.slane %v1523_v5, 0 }
 0x1de   : > { %v1706_v2 = vpack.c.bf16 %v1675_v61, %v1674_v59  ;;  %v4356_v59 = vadd.f32 %v4281_v29, %v4231_v40  ;;  %v1554_v37 = vperm.slane %v4348_v57, 0 }
 0x1df   : > { %v1311_v0 = vpop.f32.mrf.mxu3  ;;  %v1707_v33 = vpack.c.bf16 %v1677_v58, %v1676_v21  ;;  %v1553_v17 = vperm.slane %v1524_v6, 0  ;;  %v1452_v21 = vadd.f32 %v4294_v43, %v4289_v36  ;;  %v1616_v58 = vsub.f32 %v1552_v15, %v4298_v23 }
 0x1e0   : > { %v1312_v55 = vadd.f32 %v4147_v16, %v1311_v0  ;;  %3135 = vmatmul.msk.bf16.vlgmr.msrb.gmra.mxu2 %vm852_vm4, %v1706_v2  ;;  %v1678_v0 = vmul.f32 0.17677669, %v1646_v18  ;;  %v1527_v18 = vrot.slane %v4348_v57, 3 }
 0x1e1   : > { %v1617_v24 = vsub.f32 %v1553_v17, %v4298_v23  ;;  %v1457_v23 = vadd.f32 %v4294_v43, %v4320_v14  ;;  %v1460_v14 = vadd.f32 %v4294_v43, %v4326_v25 }
 0x1e2   : > { %v1348_v3 = vmax.f32 %v1312_v55, 0.0 }
 0x1e4   : > { %v1365_v10 = vpack.c.bf16 %v1348_v3, %v1347_v1  ;;  %v1679_v1 = vmul.f32 0.17677669, %v1647_v56 }
 0x1e5   : > { %v914_v19 = vpop.f32.mrf.mxu2 }
 0x1e6   : > { %3133 = vmatmul.msk.bf16.gmra.mxu1 %vm852_vm4, %v1365_v10  ;;  %v4340_v51 = vadd.f32 %v4291_v39, %v914_v19  ;;  %v1708_v13 = vpack.c.bf16 %v1679_v1, %v1678_v0  ;;  %v1450_v19 = vadd.f32 %v4294_v43, %v4279_v26  ;;  %v1525_v26 = vrot.slane %v4348_v57, 1 }
 0x1e7   : > { %v1314_v20 = vpop.f32.mrf.mxu3 }
 0x1e8   : > { %v1315_v22 = vadd.f32 %v4147_v16, %v1314_v20  ;;  %v2628_v27 = vsub.f32 %v4352_v60, %v4340_v51  ;;  %v1648_v4 = vadd.f32 %v1616_v58, %v1450_v19  ;;  %v1555_v36 = vperm.slane %v1525_v26, 0 }
 0x1ea   : > { %v1349_v30 = vmax.f32 %v1315_v22, 0.0 }
 0x1ed   : > { %v916_v47 = vpop.f32.mrf.mxu2 }
 0x1ee   : > { %v4343_v52 = vadd.f32 %v4291_v39, %v916_v47 }
 0x1ef   : > { %v1316_v28 = vpop.f32.mrf.mxu3 }
 0x1f0   : > { %v1317_v31 = vadd.f32 %v4147_v16, %v1316_v28  ;;  %3136 = vmatmul.msk.bf16.gmra.mxu2 %vm852_vm4, %v1707_v33  ;;  %v4337_v16 = vadd.f32 %v4291_v39, %v911_v46  ;;  %v1461_v39 = vpop.f32.mrf.mxu1  ;;  %v2629_v46 = vsub.f32 %v4356_v59, %v4343_v52  ;;  %v1649_v28 = vadd.f32 %v1617_v24, %v1452_v21 }
 0x1f1   : > { %v1530_v24 = vrot.slane %v4348_v57, 6 }
 0x1f2   : > { %v1350_v38 = vmax.f32 %v1317_v31, 0.0  ;;  %v2627_v63 = vsub.f32 %v4348_v57, %v4337_v16  ;;  %v1681_v31 = vmul.f32 0.17677669, %v1649_v28  ;;  %v1618_v42 = vsub.f32 %v1554_v37, %v4337_v16  ;;  %v1917_v37 = vld [vmem:[%s4975_s14] sm:$0xff] }
 0x1f3   : > { %v1619_v44 = vsub.f32 %v1555_v36, %v4337_v16 }
 0x1f4   : > { %v1366_v50 = vpack.c.bf16 %v1350_v38, %v1349_v30  ;;  %v1680_v30 = vmul.f32 0.17677669, %v1648_v4  ;;  %v1455_v38 = vadd.f32 %v4294_v43, %v4307_v53 }
 0x1f5   : > { %v1651_v49 = vadd.f32 %v1619_v44, %v1457_v23 }
 0x1f6   : > { %3134 = vmatmul.msk.bf16.gmra.mxu1 %vm852_vm4, %v1366_v50  ;;  %v1709_v35 = vpack.c.bf16 %v1681_v31, %v1680_v30  ;;  %v1650_v48 = vadd.f32 %v1618_v42, %v1455_v38  ;;  %v1560_v31 = vperm.slane %v1530_v24, 0 }
 0x1f7   : > { %v2622_v11 = vpop.f32.mrf.mxu3 }
 0x1f8   : > { %v2623_v61 = vadd.f32 %v2622_v11, %v1373_v8  ;;  %v1464_v22 = vpop.f32.mrf.mxu1  ;;  %v1682_v50 = vmul.f32 0.17677669, %v1650_v48  ;;  %v1683_v8 = vmul.f32 0.17677669, %v1651_v49  ;;  %v1526_v11 = vrot.slane %v4348_v57, 2 }
 0x1f9   : > { %v1465_v6 = vadd.f32 %v4294_v43, %v1464_v22  ;;  %v1624_v26 = vsub.f32 %v1560_v31, %v4337_v16 }
 0x1fa   : > { %v2630_v34 = vperm.slane %v2623_v61, 0  ;;  %v1710_v56 = vpack.c.bf16 %v1683_v8, %v1682_v50  ;;  %v1556_v53 = vperm.slane %v1526_v11, 0  ;;  %v1562_v11 = vperm.slane %v4352_v60, 0 }
 0x1fc   : > { %v2631_v55 = vadd.f32 %v2630_v34, %v2626_v62  ;;  %v2632_v40 = vadd.f32 %v2630_v34, %v2627_v63  ;;  %v2633_v29 = vadd.f32 %v2630_v34, %v2628_v27  ;;  %v2634_v2 = vadd.f32 %v2630_v34, %v2629_v46 }
 0x1fd   : > { %v1557_v62 = vperm.slane %v1527_v18, 0  ;;  %v1462_v63 = vadd.f32 %v4294_v43, %v1461_v39  ;;  %v1620_v27 = vsub.f32 %v1556_v53, %v4337_v16 }
 0x1fe   : > { %v2637_v3 = vmul.f32 0.17677669, %v2633_v29  ;;  %v2638_v7 = vmul.f32 0.17677669, %v2634_v2  ;;  %v2635_v10 = vmul.f32 0.17677669, %v2631_v55 }
 0x1ff   : > { %v2624_v9 = vpop.f32.mrf.mxu3  ;;  %v2636_v12 = vmul.f32 0.17677669, %v2632_v40  ;;  %v1621_v46 = vsub.f32 %v1557_v62, %v4337_v16  ;;  %v1652_v34 = vadd.f32 %v1620_v27, %v1460_v14  ;;  %v1529_v29 = vrot.slane %v4348_v57, 5 }
 0x200   : > { %v2640_v20 = vpack.c.bf16 %v2638_v7, %v2637_v3  ;;  %3137 = vmatmul.msk.bf16.gmra.mxu2 %vm852_vm4, %v1708_v13  ;;  %v1466_v33 = vpop.f32.mrf.mxu1  ;;  %v1528_v3 = vrot.slane %v4348_v57, 4  ;;  %v1919_v13 = vld [vmem:[%s4975_s14 + $0x10] sm:$0xff]  ;;  %v1534_v27 = vrot.slane %v4352_v60, 3 }
 0x201   : > { %v2639_v32 = vpack.c.bf16 %v2636_v12, %v2635_v10  ;;  %v1653_v0 = vadd.f32 %v1621_v46, %v1462_v63  ;;  %v1684_v55 = vmul.f32 0.17677669, %v1652_v34  ;;  %v1467_v25 = vadd.f32 %v4294_v43, %v1466_v33 }
 0x202   : > { %3169 = vmatmul.msk.bf16.vlgmr.msrb.gmra.mxu3 %vm852_vm4, %v2640_v20  ;;  %v1559_v5 = vperm.slane %v1529_v29, 0  ;;  %v1558_v7 = vperm.slane %v1528_v3, 0  ;;  %v1920_v20 = vld [vmem:[%s4975_s14 + $0x18] sm:$0xff]  ;;  %v1533_v34 = vrot.slane %v4352_v60, 2 }
 0x203   : > { %v1685_v40 = vmul.f32 0.17677669, %v1653_v0  ;;  %v1922_v15 = vpack.c.bf16 %v1920_v20, %v1919_v13  ;;  %v1536_v20 = vrot.slane %v4352_v60, 5 }
 0x204   : > { %v1623_v9 = vsub.f32 %v1559_v5, %v4337_v16  ;;  %v1622_v10 = vsub.f32 %v1558_v7, %v4337_v16  ;;  %v1564_v29 = vperm.slane %v1533_v34, 0 }
 0x205   : > { %v1711_v2 = vpack.c.bf16 %v1685_v40, %v1684_v55  ;;  %1981 = vmatpush.bf16.msra.mxu0 %v1922_v15  ;;  %2684 = vmatpush.bf16.msra.mxu2 %v1922_v15  ;;  %v1567_v24 = vperm.slane %v1536_v20, 0 }
 0x206   : > { %3168 = vmatmul.msk.bf16.vlgmr.msra.gmra.mxu1 %vm852_vm4, %v2639_v32  ;;  %v1655_v12 = vadd.f32 %v1623_v9, %v1467_v25  ;;  %v1654_v17 = vadd.f32 %v1622_v10, %v1465_v6  ;;  %v1531_v32 = vrot.slane %v4348_v57, 7  ;;  %v1918_v57 = vld [vmem:[%s4975_s14 + $0x8] sm:$0xff]  ;;  %v1628_v25 = vsub.f32 %v1564_v29, %v4340_v51 }
 0x207   : > { %v1921_v38 = vpack.c.bf16 %v1918_v57, %v1917_v37  ;;  %v1631_v31 = vsub.f32 %v1567_v24, %v4340_v51  ;;  %v1539_v29 = vrot.slane %v4356_v59, 1  ;;  %v1541_v24 = vrot.slane %v4356_v59, 3 }
 0x208   : > { %v1469_v47 = vpop.f32.mrf.mxu1  ;;  %v1687_v19 = vmul.f32 0.17677669, %v1655_v12  ;;  %v1686_v22 = vmul.f32 0.17677669, %v1654_v17  ;;  %v1561_v28 = vperm.slane %v1531_v32, 0 }
 0x209   : > { %v1470_v30 = vadd.f32 %v4294_v43, %v1469_v47  ;;  %1982 = vmatpush.bf16.msra.mxu0 %v1921_v38  ;;  %2685 = vmatpush.bf16.msra.mxu2 %v1921_v38  ;;  %v1532_v47 = vrot.slane %v4352_v60, 1 }
 0x20a   : > { %v1712_v58 = vpack.c.bf16 %v1687_v19, %v1686_v22  ;;  %v1625_v33 = vsub.f32 %v1561_v28, %v4337_v16 }
 0x20b   : > { %v1656_v23 = vadd.f32 %v1624_v26, %v1470_v30  ;;  %v1563_v50 = vperm.slane %v1532_v47, 0  ;;  %v1538_v47 = vrot.slane %v4352_v60, 7 }
 0x20d   : > { %v1688_v44 = vmul.f32 0.17677669, %v1656_v23  ;;  %v1627_v18 = vsub.f32 %v1563_v50, %v4340_v51 }
 0x210   : > { %3138 = vmatmul.msk.bf16.gmra.mxu2 %vm852_vm4, %v1709_v35  ;;  %v1471_v61 = vpop.f32.mrf.mxu1 }
 0x211   : > { %v1472_v4 = vadd.f32 %v4294_v43, %v1471_v61 }
 0x213   : > { %v1657_v35 = vadd.f32 %v1625_v33, %v1472_v4 }
 0x215   : > { %v1689_v42 = vmul.f32 0.17677669, %v1657_v35 }
 0x217   : > { %v1713_v48 = vpack.c.bf16 %v1689_v42, %v1688_v44 }
 0x218   : > { %v1474_v1 = vpop.f32.mrf.mxu1 }
 0x219   : > { %v1475_v8 = vadd.f32 %v4294_v43, %v1474_v1  ;;  %v1565_v1 = vperm.slane %v1534_v27, 0 }
 0x220   : > { %3139 = vmatmul.msk.bf16.gmra.mxu2 %vm852_vm4, %v1710_v56  ;;  %v1476_v39 = vpop.f32.mrf.mxu1  ;;  %v1626_v56 = vsub.f32 %v1562_v11, %v4340_v51  ;;  %v1569_v11 = vperm.slane %v1538_v47, 0 }
 0x221   : > { %v1477_v49 = vadd.f32 %v4294_v43, %v1476_v39  ;;  %v4437_v39 = vld [vmem:[%s4974_s13] ss:$0 sm:$0xff] }
 0x222   : > { %v1658_v53 = vadd.f32 %v1626_v56, %v1475_v8 }
 0x223   : > { %v1659_v61 = vadd.f32 %v1627_v18, %v1477_v49  ;;  %v1537_v49 = vrot.slane %v4352_v60, 6 }
 0x224   : > { %v1690_v63 = vmul.f32 0.17677669, %v1658_v53 }
 0x225   : > { %v1691_v62 = vmul.f32 0.17677669, %v1659_v61  ;;  %v1568_v53 = vperm.slane %v1537_v49, 0 }
 0x227   : > { %v1714_v46 = vpack.c.bf16 %v1691_v62, %v1690_v63  ;;  %v1633_v62 = vsub.f32 %v1569_v11, %v4340_v51 }
 0x228   : > { %v1479_v21 = vpop.f32.mrf.mxu1 }
 0x229   : > { %v1480_v40 = vadd.f32 %v4294_v43, %v1479_v21  ;;  %v1535_v21 = vrot.slane %v4352_v60, 4 }
 0x22b   : > { %v1660_v6 = vadd.f32 %v1628_v25, %v1480_v40  ;;  %v1566_v30 = vperm.slane %v1535_v21, 0 }
 0x22d   : > { %v1692_v12 = vmul.f32 0.17677669, %v1660_v6  ;;  %v1630_v33 = vsub.f32 %v1566_v30, %v4340_v51  ;;  %v1540_v30 = vrot.slane %v4356_v59, 2 }
 0x230   : > { %3140 = vmatmul.msk.bf16.gmra.mxu2 %vm852_vm4, %v1711_v2  ;;  %v1481_v36 = vpop.f32.mrf.mxu1  ;;  %v1629_v2 = vsub.f32 %v1565_v1, %v4340_v51 }
 0x231   : > { %v1482_v0 = vadd.f32 %v4294_v43, %v1481_v36 }
 0x233   : > { %v1661_v5 = vadd.f32 %v1629_v2, %v1482_v0 }
 0x235   : > { %v1693_v7 = vmul.f32 0.17677669, %v1661_v5  ;;  %v1571_v5 = vperm.slane %v1539_v29, 0 }
 0x237   : > { %v1715_v19 = vpack.c.bf16 %v1693_v7, %v1692_v12 }
 0x238   : > { %v1484_v16 = vpop.f32.mrf.mxu1 }
 0x239   : > { %v1485_v28 = vadd.f32 %v4294_v43, %v1484_v16 }
 0x23b   : > { %v1662_v35 = vadd.f32 %v1630_v33, %v1485_v28 }
 0x23d   : > { %v1694_v23 = vmul.f32 0.17677669, %v1662_v35  ;;  %v1573_v35 = vperm.slane %v1541_v24, 0 }
 0x240   : > { %3141 = vmatmul.msk.bf16.gmra.mxu2 %vm852_vm4, %v1712_v58  ;;  %v1486_v14 = vpop.f32.mrf.mxu1 }
 0x241   : > { %v1487_v58 = vadd.f32 %v4294_v43, %v1486_v14  ;;  %v1632_v14 = vsub.f32 %v1568_v53, %v4340_v51  ;;  %v1542_v53 = vrot.slane %v4356_v59, 4 }
 0x243   : > { %v1663_v26 = vadd.f32 %v1631_v31, %v1487_v58 }
 0x245   : > { %v1695_v57 = vmul.f32 0.17677669, %v1663_v26 }
 0x247   : > { %v1716_v44 = vpack.c.bf16 %v1695_v57, %v1694_v23 }
 0x248   : > { %v1489_v3 = vpop.f32.mrf.mxu1 }
 0x249   : > { %v1490_v61 = vadd.f32 %v4294_v43, %v1489_v3 }
 0x24b   : > { %v1664_v27 = vadd.f32 %v1632_v14, %v1490_v61 }
 0x24d   : > { %v1696_v0 = vmul.f32 0.17677669, %v1664_v27 }
 0x250   : > { %3142 = vmatmul.msk.bf16.gmra.mxu2 %vm852_vm4, %v1713_v48  ;;  %v1491_v22 = vpop.f32.mrf.mxu1 }
 0x251   : > { %v1492_v8 = vadd.f32 %v4294_v43, %v1491_v22 }
 0x253   : > { %v1665_v63 = vadd.f32 %v1633_v62, %v1492_v8 }
 0x255   : > { %v1697_v60 = vmul.f32 0.17677669, %v1665_v63 }
 0x257   : > { %v1717_v40 = vpack.c.bf16 %v1697_v60, %v1696_v0 }
 0x258   : > { %v1494_v37 = vpop.f32.mrf.mxu1 }
 0x259   : > { %v1495_v7 = vadd.f32 %v4294_v43, %v1494_v37 }
 0x260   : > { %3143 = vmatmul.msk.bf16.gmra.mxu2 %vm852_vm4, %v1714_v46  ;;  %v1496_v18 = vpop.f32.mrf.mxu1 }
 0x261   : > { %v1497_v51 = vadd.f32 %v4294_v43, %v1496_v18  ;;  %v1543_v18 = vrot.slane %v4356_v59, 5 }
 0x263   : > { %v1789_v55 = vpop.f32.mrf.mxu2  ;;  %v1575_v63 = vperm.slane %v1543_v18, 0 }
 0x264   : > { %v1790_v9 = vadd.f32 %v4437_v39, %v1789_v55 }
 0x266   : > { %v1869_v15 = vmax.f32 %v1790_v9, 0.0  ;;  %v1570_v9 = vperm.slane %v4356_v59, 0 }
 0x268   : > { %v1499_v55 = vpop.f32.mrf.mxu1  ;;  %v1634_v12 = vsub.f32 %v1570_v9, %v4343_v52 }
 0x269   : > { %v1500_v57 = vadd.f32 %v4294_v43, %v1499_v55 }
 0x26b   : > { %v1791_v10 = vpop.f32.mrf.mxu2 }
 0x26c   : > { %v1792_v13 = vadd.f32 %v4437_v39, %v1791_v10  ;;  %v1635_v10 = vsub.f32 %v1571_v5, %v4343_v52 }
 0x26e   : > { %v1870_v17 = vmax.f32 %v1792_v13, 0.0  ;;  %v1667_v13 = vadd.f32 %v1635_v10, %v1497_v51 }
 0x270   : > { %v1901_v32 = vpack.c.bf16 %v1870_v17, %v1869_v15  ;;  %3144 = vmatmul.msk.bf16.gmra.mxu2 %vm852_vm4, %v1715_v19  ;;  %v1501_v20 = vpop.f32.mrf.mxu1  ;;  %v1666_v15 = vadd.f32 %v1634_v12, %v1495_v7  ;;  %v1699_v17 = vmul.f32 0.17677669, %v1667_v13  ;;  %v1544_v12 = vrot.slane %v4356_v59, 6 }
 0x271   : > { %v1502_v26 = vadd.f32 %v4294_v43, %v1501_v20 }
 0x272   : > { %3151 = vmatmul.msk.bf16.vlgmr.msra.gmra.mxu0 %vm852_vm4, %v1901_v32  ;;  %v1698_v21 = vmul.f32 0.17677669, %v1666_v15 }
 0x273   : > { %v1794_v4 = vpop.f32.mrf.mxu2 }
 0x274   : > { %v1795_v36 = vadd.f32 %v4437_v39, %v1794_v4  ;;  %v1718_v58 = vpack.c.bf16 %v1699_v17, %v1698_v21 }
 0x276   : > { %v1871_v48 = vmax.f32 %v1795_v36, 0.0  ;;  %v1572_v36 = vperm.slane %v1540_v30, 0 }
 0x278   : > { %v1504_v33 = vpop.f32.mrf.mxu1  ;;  %v1636_v23 = vsub.f32 %v1572_v36, %v4343_v52 }
 0x279   : > { %v1505_v60 = vadd.f32 %v4294_v43, %v1504_v33 }
 0x27b   : > { %v1796_v38 = vpop.f32.mrf.mxu2 }
 0x27c   : > { %v1797_v42 = vadd.f32 %v4437_v39, %v1796_v38  ;;  %v1637_v38 = vsub.f32 %v1573_v35, %v4343_v52 }
 0x27e   : > { %v1872_v16 = vmax.f32 %v1797_v42, 0.0  ;;  %v1669_v42 = vadd.f32 %v1637_v38, %v1502_v26 }
 0x280   : > { %3145 = vmatmul.msk.bf16.gmra.mxu2 %vm852_vm4, %v1716_v44  ;;  %v1902_v50 = vpack.c.bf16 %v1872_v16, %v1871_v48  ;;  %v1668_v44 = vadd.f32 %v1636_v23, %v1500_v57  ;;  %v1701_v47 = vmul.f32 0.17677669, %v1669_v42  ;;  %v1506_v16 = vpop.f32.mrf.mxu1 }
 0x281   : > { %v1507_v14 = vadd.f32 %v4294_v43, %v1506_v16 }
 0x282   : > { %3152 = vmatmul.msk.bf16.gmra.mxu0 %vm852_vm4, %v1902_v50  ;;  %v1700_v50 = vmul.f32 0.17677669, %v1668_v44 }
 0x283   : > { %v1799_v56 = vpop.f32.mrf.mxu2 }
 0x284   : > { %v1800_v46 = vadd.f32 %v4437_v39, %v1799_v56  ;;  %v1719_v11 = vpack.c.bf16 %v1701_v47, %v1700_v50 }
 0x285   : > { %v2661_v23 = vpop.f32.mrf.mxu3 }
 0x286   : > { %v1873_v2 = vmax.f32 %v1800_v46, 0.0  ;;  %v1574_v46 = vperm.slane %v1542_v53, 0  ;;  %v4510_v53 = vpop.f32.mrf.mxu0 }
 0x288   : > { %v1509_v0 = vpop.f32.mrf.mxu1 }
 0x28b   : > { %v1801_v34 = vpop.f32.mrf.mxu2 }
 0x28c   : > { %v1802_v1 = vadd.f32 %v4437_v39, %v1801_v34  ;;  %v1639_v34 = vsub.f32 %v1575_v63, %v4343_v52 }
 0x28d   : > { %v2663_v18 = vpop.f32.mrf.mxu3 }
 0x28e   : > { %v1874_v3 = vmax.f32 %v1802_v1, 0.0  ;;  %v1638_v1 = vsub.f32 %v1574_v46, %v4343_v52  ;;  %v1671_v55 = vadd.f32 %v1639_v34, %v1507_v14  ;;  %v4518_v34 = vld [vmem:[%s4976_s15] ss:$0 sm:$0xff] }
 0x290   : > { %3146 = vmatmul.msk.bf16.gmra.mxu2 %vm852_vm4, %v1717_v40  ;;  %v1903_v25 = vpack.c.bf16 %v1874_v3, %v1873_v2  ;;  %v1670_v40 = vadd.f32 %v1638_v1, %v1505_v60  ;;  %v1703_v29 = vmul.f32 0.17677669, %v1671_v55  ;;  %v1511_v10 = vpop.f32.mrf.mxu1 }
 0x291   : > { %v1512_v20 = vadd.f32 %v4294_v43, %v1511_v10 }
 0x292   : > { %3153 = vmatmul.msk.bf16.gmra.mxu0 %vm852_vm4, %v1903_v25  ;;  %v1702_v25 = vmul.f32 0.17677669, %v1670_v40 }
 0x293   : > { %v1804_v6 = vpop.f32.mrf.mxu2 }
 0x294   : > { %v1805_v19 = vadd.f32 %v4437_v39, %v1804_v6  ;;  %v1720_v5 = vpack.c.bf16 %v1703_v29, %v1702_v25  ;;  %v1545_v6 = vrot.slane %v4356_v59, 7 }
 0x296   : > { %v1875_v4 = vmax.f32 %v1805_v19, 0.0  ;;  %v1577_v15 = vperm.slane %v1545_v6, 0  ;;  %v1510_v19 = vadd.f32 %v4294_v43, %v1509_v0 }
 0x298   : > { %v1641_v21 = vsub.f32 %v1577_v15, %v4343_v52 }
 0x29b   : > { %v1806_v22 = vpop.f32.mrf.mxu2 }
 0x29c   : > { %v1807_v32 = vadd.f32 %v4437_v39, %v1806_v22  ;;  %v1576_v22 = vperm.slane %v1544_v12, 0 }
 0x29e   : > { %v1876_v28 = vmax.f32 %v1807_v32, 0.0  ;;  %v1640_v32 = vsub.f32 %v1576_v22, %v4343_v52 }
 0x2a0   : > { %3147 = vmatmul.msk.bf16.gmra.mxu2 %vm852_vm4, %v1718_v58  ;;  %v1904_v31 = vpack.c.bf16 %v1876_v28, %v1875_v4  ;;  %v1673_v58 = vadd.f32 %v1641_v21, %v1512_v20  ;;  %v1672_v24 = vadd.f32 %v1640_v32, %v1510_v19  ;;  %v2656_v4 = vpop.f32.mrf.mxu1 }
 0x2a1   : > { %v2657_v38 = vadd.f32 %v4437_v39, %v2656_v4 }
 0x2a2   : > { %3154 = vmatmul.msk.bf16.gmra.mxu0 %vm852_vm4, %v1904_v31  ;;  %v1705_v59 = vmul.f32 0.17677669, %v1673_v58  ;;  %v1704_v31 = vmul.f32 0.17677669, %v1672_v24 }
 0x2a3   : > { %v1809_v37 = vpop.f32.mrf.mxu2 }
 0x2a4   : > { %v1810_v48 = vadd.f32 %v4437_v39, %v1809_v37  ;;  %v1721_v26 = vpack.c.bf16 %v1705_v59, %v1704_v31 }
 0x2a6   : > { %v1877_v56 = vmax.f32 %v1810_v48, 0.0  ;;  %v2666_v48 = vmax.f32 %v2657_v38, 0.0 }
 0x2a8   : > { %v2658_v43 = vpop.f32.mrf.mxu1 }
 0x2a9   : > { %v2659_v36 = vadd.f32 %v4437_v39, %v2658_v43 }
 0x2ab   : > { %v1811_v49 = vpop.f32.mrf.mxu2  ;;  %v2667_v42 = vmax.f32 %v2659_v36, 0.0 }
 0x2ac   : > { %v1812_v8 = vadd.f32 %v4437_v39, %v1811_v49 }
 0x2ad   : > { %v2670_v49 = vpack.c.bf16 %v2667_v42, %v2666_v48 }
 0x2ae   : > { %v1878_v61 = vmax.f32 %v1812_v8, 0.0 }
 0x2b0   : > { %3148 = vmatmul.msk.bf16.gmra.mxu2 %vm852_vm4, %v1719_v11  ;;  %v1905_v62 = vpack.c.bf16 %v1878_v61, %v1877_v56  ;;  %v2664_v61 = vadd.f32 %v4437_v39, %v2663_v18 }
 0x2b2   : > { %3155 = vmatmul.msk.bf16.gmra.mxu0 %vm852_vm4, %v1905_v62  ;;  %v2662_v62 = vadd.f32 %v4437_v39, %v2661_v23  ;;  %v2669_v14 = vmax.f32 %v2664_v61, 0.0 }
 0x2b3   : > { %v1814_v27 = vpop.f32.mrf.mxu2 }
 0x2b4   : > { %v1815_v2 = vadd.f32 %v4437_v39, %v1814_v27  ;;  %v2668_v60 = vmax.f32 %v2662_v62, 0.0 }
 0x2b6   : > { %v1879_v7 = vmax.f32 %v1815_v2, 0.0  ;;  %v2671_v0 = vpack.c.bf16 %v2669_v14, %v2668_v60 }
 0x2bb   : > { %v1816_v3 = vpop.f32.mrf.mxu2 }
 0x2bc   : > { %v1817_v51 = vadd.f32 %v4437_v39, %v1816_v3 }
 0x2be   : > { %v1880_v9 = vmax.f32 %v1817_v51, 0.0 }
 0x2c0   : > { %3149 = vmatmul.msk.bf16.gmra.mxu2 %vm852_vm4, %v1720_v5  ;;  %v1906_v13 = vpack.c.bf16 %v1880_v9, %v1879_v7 }
 0x2c2   : > { %3156 = vmatmul.msk.bf16.gmra.mxu0 %vm852_vm4, %v1906_v13 }
 0x2c3   : > { %v1819_v17 = vpop.f32.mrf.mxu2 }
 0x2c4   : > { %v1820_v28 = vadd.f32 %v4437_v39, %v1819_v17 }
 0x2c6   : > { %v1881_v35 = vmax.f32 %v1820_v28, 0.0 }
 0x2cb   : > { %v1821_v30 = vpop.f32.mrf.mxu2 }
 0x2cc   : > { %v1822_v33 = vadd.f32 %v4437_v39, %v1821_v30 }
 0x2ce   : > { %v1882_v37 = vmax.f32 %v1822_v33, 0.0 }
 0x2d0   : > { %v1907_v57 = vpack.c.bf16 %v1882_v37, %v1881_v35  ;;  %3150 = vmatmul.msk.bf16.gmra.mxu2 %vm852_vm4, %v1721_v26 }
 0x2d2   : > { %3157 = vmatmul.msk.bf16.gmra.mxu0 %vm852_vm4, %v1907_v57 }
 0x2d3   : > { %v1824_v52 = vpop.f32.mrf.mxu2 }
 0x2d4   : > { %v1825_v44 = vadd.f32 %v4437_v39, %v1824_v52 }
 0x2d6   : > { %v1883_v50 = vmax.f32 %v1825_v44, 0.0 }
 0x2db   : > { %v1826_v47 = vpop.f32.mrf.mxu2 }
 0x2dc   : > { %v1827_v16 = vadd.f32 %v4437_v39, %v1826_v47 }
 0x2de   : > { %v1884_v8 = vmax.f32 %v1827_v16, 0.0 }
 0x2e0   : > { %v1908_v11 = vpack.c.bf16 %v1884_v8, %v1883_v50  ;;  %3170 = vmatmul.msk.bf16.vlgmr.msra.gmra.mxu2 %vm852_vm4, %v2670_v49 }
 0x2e2   : > { %3158 = vmatmul.msk.bf16.gmra.mxu0 %vm852_vm4, %v1908_v11 }
 0x2e3   : > { %v1829_v56 = vpop.f32.mrf.mxu2 }
 0x2e4   : > { %v1830_v63 = vadd.f32 %v4437_v39, %v1829_v56 }
 0x2e6   : > { %v1885_v1 = vmax.f32 %v1830_v63, 0.0 }
 0x2eb   : > { %v1831_v27 = vpop.f32.mrf.mxu2 }
 0x2ec   : > { %v1832_v46 = vadd.f32 %v4437_v39, %v1831_v27 }
 0x2ee   : > { %v1886_v55 = vmax.f32 %v1832_v46, 0.0 }
 0x2ef   : > { %v1984_v40 = vpop.f32.mrf.mxu0 }
 0x2f0   : > { %v1909_v29 = vpack.c.bf16 %v1886_v55, %v1885_v1  ;;  %v1985_v2 = vadd.f32 %v4518_v34, %v1984_v40  ;;  %3171 = vmatmul.msk.bf16.gmra.mxu2 %vm852_vm4, %v2671_v0 }
 0x2f2   : > { %v2064_v3 = vsel %vm852_vm4, %v1985_v2, -inf  ;;  %3159 = vmatmul.msk.bf16.gmra.mxu0 %vm852_vm4, %v1909_v29 }
 0x2f3   : > { %v2065_v25 = vrot.slane %v2064_v3, 4  ;;  %v1834_v51 = vpop.f32.mrf.mxu2 }
 0x2f4   : > { %v1835_v12 = vadd.f32 %v4437_v39, %v1834_v51 }
 0x2f5   : > { %v2066_v5 = vmax.f32 %v2064_v3, %v2065_v25 }
 0x2f6   : > { %v1887_v32 = vmax.f32 %v1835_v12, 0.0 }
 0x2f7   : > { %v2067_v6 = vrot.slane %v2066_v5, 2  ;;  %v1986_v7 = vpop.f32.mrf.mxu0 }
 0x2f8   : > { %v1987_v9 = vadd.f32 %v4518_v34, %v1986_v7 }
 0x2f9   : > { %v2068_v10 = vmax.f32 %v2066_v5, %v2067_v6 }
 0x2fa   : > { %v2071_v13 = vsel %vm852_vm4, %v1987_v9, -inf }
 0x2fb   : > { %v2069_v20 = vrot.slane %v2068_v10, 1  ;;  %v2072_v15 = vrot.slane %v2071_v13, 4  ;;  %v1836_v17 = vpop.f32.mrf.mxu2 }
 0x2fc   : > { %v1837_v19 = vadd.f32 %v4437_v39, %v1836_v17 }
 0x2fd   : > { %v2070_v22 = vmax.f32 %v2068_v10, %v2069_v20  ;;  %v2073_v21 = vmax.f32 %v2071_v13, %v2072_v15 }
 0x2fe   : > { %v1888_v58 = vmax.f32 %v1837_v19, 0.0 }
 0x2ff   : > { %v2288_v24 = vsub.f32 %v1985_v2, %v2070_v22  ;;  %v2074_v4 = vrot.slane %v2073_v21, 2  ;;  %v1989_v59 = vpop.f32.mrf.mxu0 }
 0x300   : > { %v1910_v28 = vpack.c.bf16 %v1888_v58, %v1887_v32  ;;  %v4535_v47 = vadd.f32 %v4518_v34, %v1989_v59 }
 0x301   : > { %v2320_v30 = vmul.f32 1.442695, %v2288_v24  ;;  %v2075_v31 = vmax.f32 %v2073_v21, %v2074_v4 }
 0x302   : > { %3160 = vmatmul.msk.bf16.gmra.mxu0 %vm852_vm4, %v1910_v28  ;;  %v2078_v18 = vsel %vm852_vm4, %v4535_v47, -inf }
 0x303   : > { %3325 = vpow2.f32 %v2320_v30  ;;  %v2076_v33 = vrot.slane %v2075_v31, 1  ;;  %v1839_v26 = vpop.f32.mrf.mxu2  ;;  %v2079_v27 = vrot.slane %v2078_v18, 4 }
 0x304   : > { %v1840_v23 = vadd.f32 %v4437_v39, %v1839_v26 }
 0x305   : > { %v2077_v35 = vmax.f32 %v2075_v31, %v2076_v33  ;;  %v2080_v29 = vmax.f32 %v2078_v18, %v2079_v27 }
 0x306   : > { %v1889_v49 = vmax.f32 %v1840_v23, 0.0 }
 0x307   : > { %v2289_v37 = vsub.f32 %v1987_v9, %v2077_v35  ;;  %v4530_v57 = vsel %vm2729_vm5, %v2077_v35, %v2070_v22  ;;  %v1991_v43 = vpop.f32.mrf.mxu0  ;;  %v2081_v10 = vrot.slane %v2080_v29, 2 }
 0x308   : > { %v4543_v0 = vadd.f32 %v4518_v34, %v1991_v43 }
 0x309   : > { %v3326_v52 = vpop.eup %3325  ;;  %v2322_v36 = vmul.f32 1.442695, %v2289_v37  ;;  %v2082_v32 = vmax.f32 %v2080_v29, %v2081_v10 }
 0x30a   : > { %v2384_v38 = vsel %vm852_vm4, %v3326_v52, 0.0  ;;  %v2085_v51 = vsel %vm852_vm4, %v4543_v0, -inf }
 0x30b   : > { %v2385_v42 = vrot.slane %v2384_v38, 4  ;;  %3327 = vpow2.f32 %v2322_v36  ;;  %v1841_v44 = vpop.f32.mrf.mxu2  ;;  %v2086_v13 = vrot.slane %v2085_v51, 4  ;;  %v2083_v33 = vrot.slane %v2082_v32, 1 }
 0x30c   : > { %v1842_v48 = vadd.f32 %v4437_v39, %v1841_v44 }
 0x30d   : > { %v2386_v16 = vadd.f32 %v2385_v42, %v2384_v38  ;;  %v2087_v4 = vmax.f32 %v2085_v51, %v2086_v13  ;;  %v4568_v44 = vmax.f32 %v2082_v32, %v2083_v33 }
 0x30e   : > { %v1890_v50 = vmax.f32 %v1842_v48, 0.0 }
 0x30f   : > { %v2387_v8 = vrot.slane %v2386_v16, 2  ;;  %v1994_v11 = vpop.f32.mrf.mxu0  ;;  %v2088_v52 = vrot.slane %v2087_v4, 2 }
 0x310   : > { %v1911_v56 = vpack.c.bf16 %v1890_v50, %v1889_v49  ;;  %v4546_v55 = vadd.f32 %v4518_v34, %v1994_v11 }
 0x311   : > { %v3328_v61 = vpop.eup %3327  ;;  %v2388_v62 = vadd.f32 %v2387_v8, %v2386_v16  ;;  %v2089_v49 = vmax.f32 %v2087_v4, %v2088_v52 }
 0x312   : > { %v2391_v14 = vsel %vm852_vm4, %v3328_v61, 0.0  ;;  %3161 = vmatmul.msk.bf16.gmra.mxu0 %vm852_vm4, %v1911_v56  ;;  %v2092_v6 = vsel %vm852_vm4, %v4546_v55, -inf  ;;  %v2290_v61 = vsub.f32 %v4535_v47, %v4568_v44 }
 0x313   : > { %v2392_v63 = vrot.slane %v2391_v14, 4  ;;  %v1844_v60 = vpop.f32.mrf.mxu2  ;;  %v2389_v1 = vrot.slane %v2388_v62, 1  ;;  %v2093_v19 = vrot.slane %v2092_v6, 4 }
 0x314   : > { %v1845_v7 = vadd.f32 %v4437_v39, %v1844_v60 }
 0x315   : > { %v2393_v46 = vadd.f32 %v2392_v63, %v2391_v14  ;;  %v2390_v5 = vadd.f32 %v2389_v1, %v2388_v62  ;;  %v2094_v30 = vmax.f32 %v2092_v6, %v2093_v19  ;;  %v2090_v63 = vrot.slane %v2089_v49, 1 }
 0x316   : > { %v1891_v22 = vmax.f32 %v1845_v7, 0.0 }
 0x317   : > { %v2394_v40 = vrot.slane %v2393_v46, 2  ;;  %v1996_v2 = vpop.f32.mrf.mxu0  ;;  %3329 = vrcp.f32 %v2390_v5  ;;  %v2095_v38 = vrot.slane %v2094_v30, 2  ;;  %v4576_v6 = vmax.f32 %v2089_v49, %v2090_v63 }
 0x318   : > { %v4549_v3 = vadd.f32 %v4518_v34, %v1996_v2 }
 0x319   : > { %v2395_v25 = vadd.f32 %v2394_v40, %v2393_v46  ;;  %v2096_v8 = vmax.f32 %v2094_v30, %v2095_v38 }
 0x31a   : > { %v2099_v20 = vsel %vm852_vm4, %v4549_v3, -inf }
 0x31b   : > { %v2396_v9 = vrot.slane %v2395_v25, 1  ;;  %v1846_v12 = vpop.f32.mrf.mxu2  ;;  %v2100_v58 = vrot.slane %v2099_v20, 4  ;;  %v2097_v46 = vrot.slane %v2096_v8, 1 }
 0x31c   : > { %v1847_v15 = vadd.f32 %v4437_v39, %v1846_v12 }
 0x31d   : > { %v2397_v17 = vadd.f32 %v2396_v9, %v2395_v25  ;;  %v2101_v26 = vmax.f32 %v2099_v20, %v2100_v58  ;;  %v3330_v43 = vpop.eup %3329  ;;  %v2324_v25 = vmul.f32 1.442695, %v2290_v61  ;;  %v4578_v10 = vmax.f32 %v2096_v8, %v2097_v46 }
 0x31e   : > { %v1892_v21 = vmax.f32 %v1847_v15, 0.0  ;;  %v2291_v15 = vsub.f32 %v4543_v0, %v4576_v6 }
 0x31f   : > { %3331 = vrcp.f32 %v2397_v17  ;;  %v1999_v24 = vpop.f32.mrf.mxu0  ;;  %v2102_v48 = vrot.slane %v2101_v26, 2  ;;  %v2292_v19 = vsub.f32 %v4546_v55, %v4578_v10 }
 0x320   : > { %v1912_v59 = vpack.c.bf16 %v1892_v21, %v1891_v22  ;;  %v4560_v28 = vadd.f32 %v4518_v34, %v1999_v24  ;;  %3333 = vpow2.f32 %v2324_v25  ;;  %v2326_v4 = vmul.f32 1.442695, %v2291_v15 }
 0x321   : > { %v2103_v62 = vmax.f32 %v2101_v26, %v2102_v48  ;;  %v2328_v30 = vmul.f32 1.442695, %v2292_v19 }
 0x322   : > { %v2106_v31 = vsel %vm852_vm4, %v4560_v28, -inf  ;;  %3162 = vmatmul.msk.bf16.gmra.mxu0 %vm852_vm4, %v1912_v59  ;;  %3335 = vpow2.f32 %v2326_v4 }
 0x323   : > { %v2107_v35 = vrot.slane %v2106_v31, 4  ;;  %v1849_v37 = vpop.f32.mrf.mxu2  ;;  %v2104_v51 = vrot.slane %v2103_v62, 1  ;;  %3337 = vpow2.f32 %v2328_v30 }
 0x324   : > { %v1850_v18 = vadd.f32 %v4437_v39, %v1849_v37 }
 0x325   : > { %v3332_v36 = vpop.eup %3331  ;;  %v2108_v23 = vmax.f32 %v2106_v31, %v2107_v35  ;;  %v4581_v13 = vmax.f32 %v2103_v62, %v2104_v51 }
 0x326   : > { %v4566_v42 = vsel %vm2729_vm5, %v3332_v36, %v3330_v43  ;;  %v1893_v40 = vmax.f32 %v1850_v18, 0.0  ;;  %v3334_v0 = vpop.eup %3333 }
 0x327   : > { %v2001_v16 = vpop.f32.mrf.mxu0  ;;  %v2109_v11 = vrot.slane %v2108_v23, 2  ;;  %v2293_v21 = vsub.f32 %v4549_v3, %v4581_v13  ;;  %v2398_v37 = vsel %vm852_vm4, %v3334_v0, 0.0 }
 0x328   : > { %v2002_v50 = vadd.f32 %v4518_v34, %v2001_v16  ;;  %v2399_v48 = vrot.slane %v2398_v37, 4  ;;  %v3336_v18 = vpop.eup %3335 }
 0x329   : > { %v2110_v1 = vmax.f32 %v2108_v23, %v2109_v11  ;;  %v2330_v33 = vmul.f32 1.442695, %v2293_v21  ;;  %v3338_v62 = vpop.eup %3337 }
 0x32a   : > { %v2113_v56 = vsel %vm852_vm4, %v2002_v50, -inf }
 0x32b   : > { %v1851_v14 = vpop.f32.mrf.mxu2  ;;  %v2114_v27 = vrot.slane %v2113_v56, 4  ;;  %v2111_v47 = vrot.slane %v2110_v1, 1  ;;  %3339 = vpow2.f32 %v2330_v33 }
 0x32c   : > { %v1852_v60 = vadd.f32 %v4437_v39, %v1851_v14  ;;  %v2400_v14 = vadd.f32 %v2399_v48, %v2398_v37 }
 0x32d   : > { %v2115_v29 = vmax.f32 %v2113_v56, %v2114_v27  ;;  %v4587_v22 = vmax.f32 %v2110_v1, %v2111_v47  ;;  %v2405_v1 = vsel %vm852_vm4, %v3336_v18, 0.0 }
 0x32e   : > { %v1894_v2 = vmax.f32 %v1852_v60, 0.0  ;;  %v2401_v51 = vrot.slane %v2400_v14, 2 }
 0x32f   : > { %v2004_v5 = vpop.f32.mrf.mxu0  ;;  %v2116_v7 = vrot.slane %v2115_v29, 2  ;;  %v2294_v55 = vsub.f32 %v4560_v28, %v4587_v22 }
 0x330   : > { %v1913_v9 = vpack.c.bf16 %v1894_v2, %v1893_v40  ;;  %v4594_v58 = vadd.f32 %v4518_v34, %v2004_v5  ;;  %v2412_v40 = vsel %vm852_vm4, %v3338_v62, 0.0  ;;  %v2402_v0 = vadd.f32 %v2401_v51, %v2400_v14 }
 0x331   : > { %v2117_v12 = vmax.f32 %v2115_v29, %v2116_v7  ;;  %v2332_v36 = vmul.f32 1.442695, %v2294_v55  ;;  %v3340_v46 = vpop.eup %3339 }
 0x332   : > { %3163 = vmatmul.msk.bf16.gmra.mxu0 %vm852_vm4, %v1913_v9  ;;  %v2120_v26 = vsel %vm852_vm4, %v4594_v58, -inf  ;;  %v2406_v9 = vrot.slane %v2405_v1, 4  ;;  %v2419_v47 = vsel %vm852_vm4, %v3340_v46, 0.0  ;;  %v2403_v18 = vrot.slane %v2402_v0, 1 }
 0x333   : > { %v1854_v20 = vpop.f32.mrf.mxu2  ;;  %v2118_v17 = vrot.slane %v2117_v12, 1  ;;  %v2121_v28 = vrot.slane %v2120_v26, 4  ;;  %3341 = vpow2.f32 %v2332_v36  ;;  %v2420_v30 = vrot.slane %v2419_v47, 4 }
 0x334   : > { %v1855_v31 = vadd.f32 %v4437_v39, %v1854_v20 }
 0x335   : > { %v4591_v32 = vmax.f32 %v2117_v12, %v2118_v17  ;;  %v2122_v56 = vmax.f32 %v2120_v26, %v2121_v28  ;;  %v2413_v17 = vrot.slane %v2412_v40, 4  ;;  %v2421_v48 = vadd.f32 %v2420_v30, %v2419_v47 }
 0x336   : > { %v1895_v38 = vmax.f32 %v1855_v31, 0.0 }
 0x337   : > { %v2006_v24 = vpop.f32.mrf.mxu0  ;;  %v2295_v3 = vsub.f32 %v2002_v50, %v4591_v32  ;;  %v2123_v29 = vrot.slane %v2122_v56, 2 }
 0x338   : > { %v4597_v59 = vadd.f32 %v4518_v34, %v2006_v24 }
 0x339   : > { %v2334_v16 = vmul.f32 1.442695, %v2295_v3  ;;  %v3342_v25 = vpop.eup %3341  ;;  %v2124_v21 = vmax.f32 %v2122_v56, %v2123_v29  ;;  %v2407_v3 = vadd.f32 %v2406_v9, %v2405_v1  ;;  %v2422_v1 = vrot.slane %v2421_v48, 2 }
 0x33a   : > { %v2127_v43 = vsel %vm852_vm4, %v4597_v59, -inf  ;;  %v2426_v19 = vsel %vm852_vm4, %v3342_v25, 0.0  ;;  %v2404_v9 = vadd.f32 %v2403_v18, %v2402_v0 }
 0x33b   : > { %v1856_v35 = vpop.f32.mrf.mxu2  ;;  %v2128_v49 = vrot.slane %v2127_v43, 4  ;;  %3343 = vpow2.f32 %v2334_v16  ;;  %v2125_v28 = vrot.slane %v2124_v21, 1  ;;  %v2408_v56 = vrot.slane %v2407_v3, 2 }
 0x33c   : > { %v1857_v52 = vadd.f32 %v4437_v39, %v1856_v35  ;;  %3345 = vrcp.f32 %v2404_v9 }
 0x33d   : > { %v2129_v63 = vmax.f32 %v2127_v43, %v2128_v49  ;;  %v2414_v43 = vadd.f32 %v2413_v17, %v2412_v40  ;;  %v4630_v46 = vmax.f32 %v2124_v21, %v2125_v28  ;;  %v2409_v47 = vadd.f32 %v2408_v56, %v2407_v3 }
 0x33e   : > { %v1896_v23 = vmax.f32 %v1857_v52, 0.0  ;;  %v2427_v52 = vrot.slane %v2426_v19, 4  ;;  %v2732_v17 = vsel %vm2731_vm6, %v4568_v44, %v4530_v57 }
 0x33f   : > { %v2009_v50 = vpop.f32.mrf.mxu0  ;;  %v2130_v5 = vrot.slane %v2129_v63, 2  ;;  %v2415_v14 = vrot.slane %v2414_v43, 2 }
 0x340   : > { %v1914_v8 = vpack.c.bf16 %v1896_v23, %v1895_v38  ;;  %v4610_v11 = vadd.f32 %v4518_v34, %v2009_v50 }
 0x341   : > { %v3344_v15 = vpop.eup %3343  ;;  %v2131_v55 = vmax.f32 %v2129_v63, %v2130_v5  ;;  %v2428_v63 = vadd.f32 %v2427_v52, %v2426_v19  ;;  %v2296_v19 = vsub.f32 %v4594_v58, %v4630_v46  ;;  %v2410_v58 = vrot.slane %v2409_v47, 1 }
 0x342   : > { %v2134_v61 = vsel %vm852_vm4, %v4610_v11, -inf  ;;  %3164 = vmatmul.msk.bf16.gmra.mxu0 %vm852_vm4, %v1914_v8  ;;  %v2433_v26 = vsel %vm852_vm4, %v3344_v15, 0.0 }
 0x343   : > { %v1859_v27 = vpop.f32.mrf.mxu2  ;;  %v2135_v60 = vrot.slane %v2134_v61, 4  ;;  %v2434_v16 = vrot.slane %v2433_v26, 4  ;;  %v2132_v49 = vrot.slane %v2131_v55, 1  ;;  %v2429_v15 = vrot.slane %v2428_v63, 2 }
 0x344   : > { %v1860_v24 = vadd.f32 %v4437_v39, %v1859_v27 }
 0x345   : > { %v2136_v2 = vmax.f32 %v2134_v61, %v2135_v60  ;;  %v2435_v40 = vadd.f32 %v2434_v16, %v2433_v26  ;;  %v4633_v29 = vmax.f32 %v2131_v55, %v2132_v49  ;;  %v2336_v26 = vmul.f32 1.442695, %v2296_v19 }
 0x346   : > { %v1897_v38 = vmax.f32 %v1860_v24, 0.0  ;;  %v2734_v24 = vsel %vm2733_vm7, %v4576_v6, %v2732_v17  ;;  %v2430_v6 = vadd.f32 %v2429_v15, %v2428_v63  ;;  %v2411_v49 = vadd.f32 %v2410_v58, %v2409_v47 }
 0x347   : > { %v2011_v7 = vpop.f32.mrf.mxu0  ;;  %v2137_v12 = vrot.slane %v2136_v2, 2  ;;  %v2436_v30 = vrot.slane %v2435_v40, 2  ;;  %v2297_v0 = vsub.f32 %v4597_v59, %v4633_v29  ;;  %3347 = vpow2.f32 %v2336_v26 }
 0x348   : > { %v4619_v20 = vadd.f32 %v4518_v34, %v2011_v7 }
 0x349   : > { %v2138_v35 = vmax.f32 %v2136_v2, %v2137_v12  ;;  %v2416_v12 = vadd.f32 %v2415_v14, %v2414_v43  ;;  %v2437_v43 = vadd.f32 %v2436_v30, %v2435_v40  ;;  %v2338_v52 = vmul.f32 1.442695, %v2297_v0  ;;  %v3346_v14 = vpop.eup %3345 }
 0x34a   : > { %v2141_v4 = vsel %vm852_vm4, %v4619_v20, -inf }
 0x34b   : > { %v2142_v31 = vrot.slane %v2141_v4, 4  ;;  %v1861_v33 = vpop.f32.mrf.mxu2  ;;  %v2139_v61 = vrot.slane %v2138_v35, 1  ;;  %v2417_v3 = vrot.slane %v2416_v12, 1  ;;  %3349 = vpow2.f32 %v2338_v52 }
 0x34c   : > { %v1862_v37 = vadd.f32 %v4437_v39, %v1861_v33 }
 0x34d   : > { %v2143_v36 = vmax.f32 %v2141_v4, %v2142_v31  ;;  %v4637_v51 = vmax.f32 %v2138_v35, %v2139_v61  ;;  %v2423_v4 = vadd.f32 %v2422_v1, %v2421_v48 }
 0x34e   : > { %v1898_v23 = vmax.f32 %v1862_v37, 0.0 }
 0x34f   : > { %v2144_v50 = vrot.slane %v2143_v36, 2  ;;  %v2014_v8 = vpop.f32.mrf.mxu0  ;;  %v2298_v31 = vsub.f32 %v4610_v11, %v4637_v51  ;;  %v2424_v11 = vrot.slane %v2423_v4, 1 }
 0x350   : > { %v1915_v62 = vpack.c.bf16 %v1898_v23, %v1897_v38  ;;  %v4628_v60 = vadd.f32 %v4518_v34, %v2014_v8  ;;  %v2431_v8 = vrot.slane %v2430_v6, 1 }
 0x351   : > { %v2145_v27 = vmax.f32 %v2143_v36, %v2144_v50  ;;  %v2340_v38 = vmul.f32 1.442695, %v2298_v31  ;;  %v2418_v50 = vadd.f32 %v2417_v3, %v2416_v12  ;;  %v2425_v63 = vadd.f32 %v2424_v11, %v2423_v4 }
 0x352   : > { %3165 = vmatmul.msk.bf16.gmra.mxu0 %vm852_vm4, %v1915_v62  ;;  %v2148_v2 = vsel %vm852_vm4, %v4628_v60, -inf  ;;  %v2432_v9 = vadd.f32 %v2431_v8, %v2430_v6 }
 0x353   : > { %v1864_v25 = vpop.f32.mrf.mxu2  ;;  %v2146_v5 = vrot.slane %v2145_v27, 1  ;;  %v2149_v7 = vrot.slane %v2148_v2, 4  ;;  %3351 = vpow2.f32 %v2340_v38 }
 0x354   : > { %v1865_v59 = vadd.f32 %v4437_v39, %v1864_v25  ;;  %3353 = vrcp.f32 %v2411_v49  ;;  %v2736_v25 = vsel %vm2735_vm8, %v4578_v10, %v2734_v24  ;;  %v3348_v10 = vpop.eup %3347 }
 0x355   : > { %v2150_v21 = vmax.f32 %v2148_v2, %v2149_v7  ;;  %v4650_v33 = vmax.f32 %v2145_v27, %v2146_v5  ;;  %v2438_v27 = vrot.slane %v2437_v43, 1  ;;  %3355 = vrcp.f32 %v2418_v50  ;;  %v3350_v30 = vpop.eup %3349 }
 0x356   : > { %v1899_v61 = vmax.f32 %v1865_v59, 0.0  ;;  %v2738_v12 = vsel %vm2737_vm9, %v4581_v13, %v2736_v25  ;;  %3357 = vrcp.f32 %v2425_v63  ;;  %v2440_v3 = vsel %vm852_vm4, %v3348_v10, 0.0 }
 0x357   : > { %v2016_v55 = vpop.f32.mrf.mxu0  ;;  %v2151_v57 = vrot.slane %v2150_v21, 2  ;;  %v2299_v23 = vsub.f32 %v4619_v20, %v4650_v33  ;;  %v2439_v15 = vadd.f32 %v2438_v27, %v2437_v43  ;;  %v2740_v4 = vsel %vm2739_vm10, %v4587_v22, %v2738_v12 }
 0x358   : > { %v4653_v44 = vadd.f32 %v4518_v34, %v2016_v55  ;;  %v2742_v13 = vsel %vm2741_vm11, %v4591_v32, %v2740_v4  ;;  %v2447_v32 = vsel %vm852_vm4, %v3350_v30, 0.0  ;;  %v2441_v38 = vrot.slane %v2440_v3, 4 }
 0x359   : > { %v2152_v35 = vmax.f32 %v2150_v21, %v2151_v57  ;;  %v2342_v20 = vmul.f32 1.442695, %v2299_v23  ;;  %v3352_v55 = vpop.eup %3351  ;;  %v2448_v8 = vrot.slane %v2447_v32, 4 }
 0x35a   : > { %v2155_v37 = vsel %vm852_vm4, %v4653_v44, -inf  ;;  %v3354_v58 = vpop.eup %3353  ;;  %v2454_v43 = vsel %vm852_vm4, %v3352_v55, 0.0  ;;  %v2442_v27 = vadd.f32 %v2441_v38, %v2440_v3 }
 0x35b   : > { %v2156_v36 = vrot.slane %v2155_v37, 4  ;;  %v1866_v28 = vpop.f32.mrf.mxu2  ;;  %v2153_v48 = vrot.slane %v2152_v35, 1  ;;  %3359 = vpow2.f32 %v2342_v20  ;;  %v3356_v22 = vpop.eup %3355  ;;  %v2449_v12 = vadd.f32 %v2448_v8, %v2447_v32 }
 0x35c   : > { %v1867_v16 = vadd.f32 %v4437_v39, %v1866_v28  ;;  %v3358_v11 = vpop.eup %3357  ;;  %v2743_v8 = vsel %vm2729_vm5, %v4633_v29, %v4630_v46 }
 0x35d   : > { %v2157_v18 = vmax.f32 %v2155_v37, %v2156_v36  ;;  %v4661_v56 = vmax.f32 %v2152_v35, %v2153_v48  ;;  %v2845_v36 = vsel %vm2731_vm6, %v3346_v14, %v4566_v42 }
 0x35e   : > { %v1900_v62 = vmax.f32 %v1867_v16, 0.0  ;;  %v2846_v16 = vsel %vm2733_vm7, %v3354_v58, %v2845_v36  ;;  %v2450_v58 = vrot.slane %v2449_v12, 2 }
 0x35f   : > { %v2158_v1 = vrot.slane %v2157_v18, 2  ;;  %v2019_v40 = vpop.f32.mrf.mxu0  ;;  %v2300_v39 = vsub.f32 %v4628_v60, %v4661_v56  ;;  %v2847_v42 = vsel %vm2735_vm8, %v3356_v22, %v2846_v16 }
 0x360   : > { %v1916_v2 = vpack.c.bf16 %v1900_v62, %v1899_v61  ;;  %v4668_v7 = vadd.f32 %v4518_v34, %v2019_v40  ;;  %v2848_v14 = vsel %vm2737_vm9, %v3358_v11, %v2847_v42 }
 0x361   : > { %v2159_v5 = vmax.f32 %v2157_v18, %v2158_v1  ;;  %v2344_v47 = vmul.f32 1.442695, %v2300_v39  ;;  %v3360_v28 = vpop.eup %3359  ;;  %v2455_v18 = vrot.slane %v2454_v43, 4  ;;  %v4705_v39 = vld [vmem:[%s4980_s19] ss:$0 sm:$0xff] }
 0x362   : > { %3166 = vmatmul.msk.bf16.gmra.mxu0 %vm852_vm4, %v1916_v2  ;;  %v2162_v17 = vsel %vm852_vm4, %v4668_v7, -inf  ;;  %v2461_v1 = vsel %vm852_vm4, %v3360_v28, 0.0  ;;  %v988_v2 = vadd.f32 %v4705_v39, %v4233_v41  ;;  %v2443_v41 = vrot.slane %v2442_v27, 2 }
 0x363   : > { %v2160_v60 = vrot.slane %v2159_v5, 1  ;;  %v2687_v19 = vpop.f32.mrf.mxu2  ;;  %v2163_v21 = vrot.slane %v2162_v17, 4  ;;  %3361 = vpow2.f32 %v2344_v47  ;;  %v2462_v10 = vrot.slane %v2461_v1, 4 }
 0x364   : > { %v2688_v24 = vadd.f32 %v4518_v34, %v2687_v19  ;;  %3363 = vrcp.f32 %v2432_v9  ;;  %v2444_v22 = vadd.f32 %v2443_v41, %v2442_v27 }
 0x365   : > { %v4678_v0 = vmax.f32 %v2159_v5, %v2160_v60  ;;  %v2164_v31 = vmax.f32 %v2162_v17, %v2163_v21  ;;  %3365 = vrcp.f32 %v2439_v15  ;;  %v2456_v15 = vadd.f32 %v2455_v18, %v2454_v43 }
 0x366   : > { %v2768_v57 = vsub.f32 %v2688_v24, %v2742_v13  ;;  %v2451_v43 = vadd.f32 %v2450_v58, %v2449_v12 }
 0x367   : > { %v2301_v6 = vsub.f32 %v4653_v44, %v4678_v0  ;;  %v2021_v26 = vpop.f32.mrf.mxu0  ;;  %v2165_v35 = vrot.slane %v2164_v31, 2  ;;  %v2457_v3 = vrot.slane %v2456_v15, 2 }
 0x368   : > { %v2772_v59 = vmul.f32 1.442695, %v2768_v57  ;;  %v4686_v37 = vadd.f32 %v4518_v34, %v2021_v26 }
 0x369   : > { %v2346_v52 = vmul.f32 1.442695, %v2301_v6  ;;  %v2166_v44 = vmax.f32 %v2164_v31, %v2165_v35  ;;  %v3362_v48 = vpop.eup %3361  ;;  %v2463_v6 = vadd.f32 %v2462_v10, %v2461_v1 }
 0x36a   : > { %3367 = vpow2.f32 %v2772_v59  ;;  %v2169_v23 = vsel %vm852_vm4, %v4686_v37, -inf  ;;  %v3364_v50 = vpop.eup %3363  ;;  %v2468_v40 = vsel %vm852_vm4, %v3362_v48, 0.0  ;;  %v2445_v48 = vrot.slane %v2444_v22, 1 }
 0x36b   : > { %3369 = vpow2.f32 %v2346_v52  ;;  %v2170_v49 = vrot.slane %v2169_v23, 4  ;;  %v2167_v61 = vrot.slane %v2166_v44, 1  ;;  %v3366_v62 = vpop.eup %3365  ;;  %v2849_v25 = vsel %vm2739_vm10, %v3364_v50, %v2848_v14  ;;  %v2689_v41 = vpop.f32.mrf.mxu2 }
 0x36c   : > { %v2850_v17 = vsel %vm2741_vm11, %v3366_v62, %v2849_v25  ;;  %v2469_v21 = vrot.slane %v2468_v40, 4  ;;  %v2458_v52 = vadd.f32 %v2457_v3, %v2456_v15  ;;  %v2464_v36 = vrot.slane %v2463_v6, 2 }
 0x36d   : > { %v2171_v63 = vmax.f32 %v2169_v23, %v2170_v49  ;;  %v4700_v20 = vmax.f32 %v2166_v44, %v2167_v61  ;;  %v2452_v50 = vrot.slane %v2451_v43, 1 }
 0x36e   : > { %v2470_v26 = vadd.f32 %v2469_v21, %v2468_v40  ;;  %v2459_v61 = vrot.slane %v2458_v52, 1  ;;  %v2465_v42 = vadd.f32 %v2464_v36, %v2463_v6  ;;  %v2446_v40 = vadd.f32 %v2445_v48, %v2444_v22 }
 0x36f   : > { %v2172_v5 = vrot.slane %v2171_v63, 2  ;;  %v2024_v9 = vpop.f32.mrf.mxu0  ;;  %v2302_v60 = vsub.f32 %v4668_v7, %v4700_v20  ;;  %v2690_v22 = vadd.f32 %v4518_v34, %v2689_v41 }
 0x370   : > { %v3368_v47 = vpop.eup %3367  ;;  %v4722_v11 = vadd.f32 %v4518_v34, %v2024_v9  ;;  %v2471_v28 = vrot.slane %v2470_v26, 2  ;;  %v2453_v9 = vadd.f32 %v2452_v50, %v2451_v43  ;;  %v2460_v15 = vadd.f32 %v2459_v61, %v2458_v52 }
 0x371   : > { %v3370_v19 = vpop.eup %3369  ;;  %v2876_v24 = vmul.f32 %v3368_v47, %v2850_v17  ;;  %v2173_v4 = vmax.f32 %v2171_v63, %v2172_v5  ;;  %v2348_v13 = vmul.f32 1.442695, %v2302_v60  ;;  %v2744_v63 = vsel %vm2731_vm6, %v4637_v51, %v2743_v8 }
 0x372   : > { %v2475_v30 = vsel %vm852_vm4, %v3370_v19, 0.0  ;;  %v2472_v62 = vadd.f32 %v2471_v28, %v2470_v26  ;;  %v2466_v60 = vrot.slane %v2465_v42, 1 }
 0x373   : > { %v2476_v55 = vrot.slane %v2475_v30, 4  ;;  %v2880_v31 = vmul.f32 %v2876_v24, %v988_v2  ;;  %v2174_v57 = vrot.slane %v2173_v4, 1  ;;  %3371 = vpow2.f32 %v2348_v13 }
 0x374   : > { %v2745_v2 = vsel %vm2733_vm7, %v4650_v33, %v2744_v63  ;;  %v2473_v17 = vrot.slane %v2472_v62, 1 }
 0x375   : > { %2884 = vst.msk [vmem:[%s4716_s24] sm:$0xff] %vm852_vm4, %v2880_v31  ;;  %v2175_v7 = vmax.f32 %v2173_v4, %v2174_v57  ;;  %v2477_v35 = vadd.f32 %v2476_v55, %v2475_v30  ;;  %v2746_v51 = vsel %vm2735_vm8, %v4661_v56, %v2745_v2  ;;  %v2467_v57 = vadd.f32 %v2466_v60, %v2465_v42 }
 0x376   : > { %v2747_v30 = vsel %vm2737_vm9, %v4678_v0, %v2746_v51  ;;  %v2474_v26 = vadd.f32 %v2473_v17, %v2472_v62 }
 0x377   : > { %v2303_v59 = vsub.f32 %v4686_v37, %v2175_v7  ;;  %v2026_v32 = vpop.f32.mrf.mxu0  ;;  %v2478_v16 = vrot.slane %v2477_v35, 2  ;;  %v2176_v37 = vsel %vm852_vm4, %v4722_v11, -inf  ;;  %v2748_v31 = vsel %vm2739_vm10, %v4700_v20, %v2747_v30 }
 0x378   : > { %v4725_v44 = vadd.f32 %v4518_v34, %v2026_v32  ;;  %v2177_v1 = vrot.slane %v2176_v37, 4  ;;  %v2749_v3 = vsel %vm2741_vm11, %v2175_v7, %v2748_v31 }
 0x379   : > { %v2350_v38 = vmul.f32 1.442695, %v2303_v59  ;;  %v3372_v23 = vpop.eup %3371  ;;  %v2479_v25 = vadd.f32 %v2478_v16, %v2477_v35  ;;  %v2769_v52 = vsub.f32 %v2690_v22, %v2749_v3  ;;  %v4784_v22 = vld [vmem:[%s4976_s15] ss:$0 sm:$0xff] }
 0x37a   : > { %v2482_v49 = vsel %vm852_vm4, %v3372_v23, 0.0  ;;  %v2183_v14 = vsel %vm852_vm4, %v4725_v44, -inf  ;;  %v2178_v21 = vmax.f32 %v2176_v37, %v2177_v1 }
 0x37b   : > { %3373 = vpow2.f32 %v2350_v38  ;;  %v2483_v18 = vrot.slane %v2482_v49, 4  ;;  %v2184_v29 = vrot.slane %v2183_v14, 4  ;;  %v2480_v24 = vrot.slane %v2479_v25, 1 }
 0x37c   : > { %3375 = vrcp.f32 %v2446_v40  ;;  %v2179_v35 = vrot.slane %v2178_v21, 2  ;;  %v2774_v50 = vmul.f32 1.442695, %v2769_v52 }
 0x37d   : > { %v2484_v27 = vadd.f32 %v2483_v18, %v2482_v49  ;;  %v2185_v56 = vmax.f32 %v2183_v14, %v2184_v29  ;;  %3377 = vrcp.f32 %v2453_v9  ;;  %v2481_v59 = vadd.f32 %v2480_v24, %v2479_v25 }
 0x37e   : > { %3379 = vrcp.f32 %v2460_v15  ;;  %v2180_v23 = vmax.f32 %v2178_v21, %v2179_v35 }
 0x37f   : > { %v2029_v5 = vpop.f32.mrf.mxu0  ;;  %v2485_v46 = vrot.slane %v2484_v27, 2  ;;  %v2186_v36 = vrot.slane %v2185_v56, 2  ;;  %3381 = vrcp.f32 %v2467_v57 }
 0x380   : > { %v4740_v47 = vadd.f32 %v4518_v34, %v2029_v5  ;;  %3383 = vrcp.f32 %v2474_v26  ;;  %v2181_v14 = vrot.slane %v2180_v23, 1 }
 0x381   : > { %v3374_v12 = vpop.eup %3373  ;;  %v2486_v19 = vadd.f32 %v2485_v46, %v2484_v27  ;;  %3385 = vrcp.f32 %v2481_v59  ;;  %v2187_v8 = vmax.f32 %v2185_v56, %v2186_v36  ;;  %v990_v56 = vadd.f32 %v4705_v39, %v4236_v45 }
 0x382   : > { %v2489_v10 = vsel %vm852_vm4, %v3374_v12, 0.0  ;;  %v2190_v33 = vsel %vm852_vm4, %v4740_v47, -inf  ;;  %v3376_v7 = vpop.eup %3375  ;;  %v4762_v60 = vmax.f32 %v2180_v23, %v2181_v14 }
 0x383   : > { %v2490_v4 = vrot.slane %v2489_v10, 4  ;;  %v2191_v13 = vrot.slane %v2190_v33, 4  ;;  %v2487_v55 = vrot.slane %v2486_v19, 1  ;;  %v3378_v37 = vpop.eup %3377  ;;  %v2188_v2 = vrot.slane %v2187_v8, 1 }
 0x384   : > { %v3380_v18 = vpop.eup %3379  ;;  %v2851_v27 = vsel %vm2729_vm5, %v3378_v37, %v3376_v7  ;;  %v2304_v31 = vsub.f32 %v4722_v11, %v4762_v60 }
 0x385   : > { %v2491_v58 = vadd.f32 %v2490_v4, %v2489_v10  ;;  %v2192_v6 = vmax.f32 %v2190_v33, %v2191_v13  ;;  %v2488_v43 = vadd.f32 %v2487_v55, %v2486_v19  ;;  %v3382_v63 = vpop.eup %3381  ;;  %v2852_v46 = vsel %vm2731_vm6, %v3380_v18, %v2851_v27 }
 0x386   : > { %v3384_v40 = vpop.eup %3383  ;;  %v2853_v15 = vsel %vm2733_vm7, %v3382_v63, %v2852_v46  ;;  %v4767_v33 = vmax.f32 %v2187_v8, %v2188_v2 }
 0x387   : > { %v2492_v0 = vrot.slane %v2491_v58, 2  ;;  %v2031_v32 = vpop.f32.mrf.mxu0  ;;  %v2193_v38 = vrot.slane %v2192_v6, 2  ;;  %3387 = vrcp.f32 %v2488_v43  ;;  %v3386_v9 = vpop.eup %3385  ;;  %v2854_v19 = vsel %vm2735_vm8, %v3384_v40, %v2853_v15 }
 0x388   : > { %v4754_v20 = vadd.f32 %v4518_v34, %v2031_v32  ;;  %v2855_v21 = vsel %vm2737_vm9, %v3386_v9, %v2854_v19 }
 0x389   : > { %v2493_v28 = vadd.f32 %v2492_v0, %v2491_v58  ;;  %v2194_v42 = vmax.f32 %v2192_v6, %v2193_v38  ;;  %v2305_v6 = vsub.f32 %v4725_v44, %v4767_v33  ;;  %v2352_v0 = vmul.f32 1.442695, %v2304_v31 }
 0x38a   : > { %v2197_v48 = vsel %vm852_vm4, %v4754_v20, -inf }
 0x38b   : > { %v2494_v16 = vrot.slane %v2493_v28, 1  ;;  %v2198_v49 = vrot.slane %v2197_v48, 4  ;;  %v2195_v29 = vrot.slane %v2194_v42, 1  ;;  %v2354_v52 = vmul.f32 1.442695, %v2305_v6 }
 0x38d   : > { %v2495_v61 = vadd.f32 %v2494_v16, %v2493_v28  ;;  %v2199_v62 = vmax.f32 %v2197_v48, %v2198_v49  ;;  %v3388_v12 = vpop.eup %3387  ;;  %v4770_v41 = vmax.f32 %v2194_v42, %v2195_v29 }
 0x38e   : > { %v2856_v4 = vsel %vm2739_vm10, %v3388_v12, %v2855_v21 }
 0x38f   : > { %3389 = vrcp.f32 %v2495_v61  ;;  %v2034_v1 = vpop.f32.mrf.mxu0  ;;  %v2200_v25 = vrot.slane %v2199_v62, 2  ;;  %v2306_v11 = vsub.f32 %v4740_v47, %v4770_v41 }
 0x390   : > { %3391 = vpow2.f32 %v2774_v50  ;;  %v2035_v5 = vadd.f32 %v4518_v34, %v2034_v1 }
 0x391   : > { %v2201_v17 = vmax.f32 %v2199_v62, %v2200_v25  ;;  %v2356_v28 = vmul.f32 1.442695, %v2306_v11  ;;  %3393 = vpow2.f32 %v2352_v0 }
 0x392   : > { %v2204_v51 = vsel %vm852_vm4, %v2035_v5, -inf  ;;  %3395 = vpow2.f32 %v2354_v52 }
 0x393   : > { %v2205_v10 = vrot.slane %v2204_v51, 4  ;;  %v2202_v34 = vrot.slane %v2201_v17, 1  ;;  %3397 = vpow2.f32 %v2356_v28 }
 0x395   : > { %v3390_v24 = vpop.eup %3389  ;;  %v2206_v30 = vmax.f32 %v2204_v51, %v2205_v10  ;;  %v4779_v26 = vmax.f32 %v2201_v17, %v2202_v34 }
 0x396   : > { %v3392_v13 = vpop.eup %3391  ;;  %v2857_v55 = vsel %vm2741_vm11, %v3390_v24, %v2856_v4 }
 0x397   : > { %v2877_v57 = vmul.f32 %v3392_v13, %v2857_v55  ;;  %v2207_v58 = vrot.slane %v2206_v30, 2  ;;  %v2036_v3 = vpop.f32.mrf.mxu0  ;;  %v2307_v36 = vsub.f32 %v4754_v20, %v4779_v26  ;;  %v3394_v20 = vpop.eup %3393 }
 0x398   : > { %v2037_v35 = vadd.f32 %v4784_v22, %v2036_v3  ;;  %v3396_v62 = vpop.eup %3395  ;;  %v2496_v27 = vsel %vm852_vm4, %v3394_v20, 0.0 }
 0x399   : > { %v2881_v59 = vmul.f32 %v2877_v57, %v990_v56  ;;  %v2208_v45 = vmax.f32 %v2206_v30, %v2207_v58  ;;  %v2358_v16 = vmul.f32 1.442695, %v2307_v36  ;;  %v3398_v63 = vpop.eup %3397  ;;  %v2497_v29 = vrot.slane %v2496_v27, 4 }
 0x39a   : > { %v2211_v32 = vsel %vm852_vm4, %v2037_v35, -inf  ;;  %v2510_v12 = vsel %vm852_vm4, %v3398_v63, 0.0 }
 0x39b   : > { %2885 = vst.msk [vmem:[%s4716_s24 + $0x8] sm:$0xff] %vm852_vm4, %v2881_v59  ;;  %v2209_v44 = vrot.slane %v2208_v45, 1  ;;  %v2212_v43 = vrot.slane %v2211_v32, 4  ;;  %3399 = vpow2.f32 %v2358_v16  ;;  %v2511_v34 = vrot.slane %v2510_v12, 4 }
 0x39c   : > { %v2498_v4 = vadd.f32 %v2497_v29, %v2496_v27 }
 0x39d   : > { %v4794_v38 = vmax.f32 %v2208_v45, %v2209_v44  ;;  %v2213_v7 = vmax.f32 %v2211_v32, %v2212_v43  ;;  %v2512_v6 = vadd.f32 %v2511_v34, %v2510_v12 }
 0x39e   : > { %v2499_v45 = vrot.slane %v2498_v4, 2 }
 0x39f   : > { %v2308_v23 = vsub.f32 %v2035_v5, %v4794_v38  ;;  %v2214_v47 = vrot.slane %v2213_v7, 2  ;;  %v2039_v48 = vpop.f32.mrf.mxu0  ;;  %v2503_v5 = vsel %vm852_vm4, %v3396_v62, 0.0  ;;  %v2513_v36 = vrot.slane %v2512_v6, 2 }
 0x3a0   : > { %v2040_v49 = vadd.f32 %v4784_v22, %v2039_v48  ;;  %v2504_v10 = vrot.slane %v2503_v5, 4 }
 0x3a1   : > { %v2360_v37 = vmul.f32 1.442695, %v2308_v23  ;;  %v2215_v50 = vmax.f32 %v2213_v7, %v2214_v47  ;;  %v3400_v46 = vpop.eup %3399  ;;  %v2500_v47 = vadd.f32 %v2499_v45, %v2498_v4 }
 0x3a2   : > { %v2218_v8 = vsel %vm852_vm4, %v2040_v49, -inf  ;;  %v2517_v30 = vsel %vm852_vm4, %v3400_v46, 0.0  ;;  %v2505_v57 = vadd.f32 %v2504_v10, %v2503_v5 }
 0x3a3   : > { %v2216_v18 = vrot.slane %v2215_v50, 1  ;;  %v2219_v61 = vrot.slane %v2218_v8, 4  ;;  %3401 = vpow2.f32 %v2360_v37  ;;  %v2501_v62 = vrot.slane %v2500_v47, 1 }
 0x3a4   : > { %v2506_v52 = vrot.slane %v2505_v57, 2 }
 0x3a5   : > { %v4799_v42 = vmax.f32 %v2215_v50, %v2216_v18  ;;  %v2220_v14 = vmax.f32 %v2218_v8, %v2219_v61  ;;  %v2514_v50 = vadd.f32 %v2513_v36, %v2512_v6 }
 0x3a6   : > { %v2507_v37 = vadd.f32 %v2506_v52, %v2505_v57 }
 0x3a7   : > { %v2309_v1 = vsub.f32 %v2037_v35, %v4799_v42  ;;  %v2041_v40 = vpop.f32.mrf.mxu0  ;;  %v2221_v2 = vrot.slane %v2220_v14, 2  ;;  %v2518_v35 = vrot.slane %v2517_v30, 4  ;;  %v2515_v5 = vrot.slane %v2514_v50, 1 }
 0x3a8   : > { %v2042_v25 = vadd.f32 %v4784_v22, %v2041_v40 }
 0x3a9   : > { %v2362_v9 = vmul.f32 1.442695, %v2309_v1  ;;  %v2222_v15 = vmax.f32 %v2220_v14, %v2221_v2  ;;  %v3402_v51 = vpop.eup %3401  ;;  %v2519_v28 = vadd.f32 %v2518_v35, %v2517_v30  ;;  %v2508_v1 = vrot.slane %v2507_v37, 1 }
 0x3aa   : > { %v2225_v17 = vsel %vm852_vm4, %v2042_v25, -inf  ;;  %v2524_v13 = vsel %vm852_vm4, %v3402_v51, 0.0 }
 0x3ab   : > { %3403 = vpow2.f32 %v2362_v9  ;;  %v2226_v19 = vrot.slane %v2225_v17, 4  ;;  %v2223_v21 = vrot.slane %v2222_v15, 1  ;;  %v2525_v59 = vrot.slane %v2524_v13, 4 }
 0x3ac   : > { %v2520_v8 = vrot.slane %v2519_v28, 2 }
 0x3ad   : > { %v2227_v24 = vmax.f32 %v2225_v17, %v2226_v19  ;;  %v4809_v55 = vmax.f32 %v2222_v15, %v2223_v21  ;;  %v2526_v7 = vadd.f32 %v2525_v59, %v2524_v13  ;;  %v2502_v15 = vadd.f32 %v2501_v62, %v2500_v47 }
 0x3ae   : > { %v2521_v9 = vadd.f32 %v2520_v8, %v2519_v28  ;;  %v2509_v21 = vadd.f32 %v2508_v1, %v2507_v37 }
 0x3af   : > { %v2228_v31 = vrot.slane %v2227_v24, 2  ;;  %v2044_v56 = vpop.f32.mrf.mxu0  ;;  %v2310_v58 = vsub.f32 %v2040_v49, %v4809_v55  ;;  %v2527_v18 = vrot.slane %v2526_v7, 2 }
 0x3b0   : > { %v4815_v27 = vadd.f32 %v4784_v22, %v2044_v56  ;;  %v2522_v4 = vrot.slane %v2521_v9, 1 }
 0x3b1   : > { %v3404_v3 = vpop.eup %3403  ;;  %v2229_v11 = vmax.f32 %v2227_v24, %v2228_v31  ;;  %v2364_v32 = vmul.f32 1.442695, %v2310_v58  ;;  %v2528_v46 = vadd.f32 %v2527_v18, %v2526_v7  ;;  %v2692_v58 = vpop.f32.mrf.mxu2 }
 0x3b2   : > { %v2531_v0 = vsel %vm852_vm4, %v3404_v3, 0.0  ;;  %v2232_v19 = vsel %vm852_vm4, %v4815_v27, -inf }
 0x3b3   : > { %v2532_v44 = vrot.slane %v2531_v0, 4  ;;  %v2230_v43 = vrot.slane %v2229_v11, 1  ;;  %3405 = vpow2.f32 %v2364_v32  ;;  %v2529_v30 = vrot.slane %v2528_v46, 1 }
 0x3b4   : > { %v2233_v56 = vrot.slane %v2232_v19, 4 }
 0x3b5   : > { %v2231_v23 = vmax.f32 %v2229_v11, %v2230_v43  ;;  %v2533_v48 = vadd.f32 %v2532_v44, %v2531_v0  ;;  %v2693_v43 = vadd.f32 %v4784_v22, %v2692_v58  ;;  %v2530_v52 = vadd.f32 %v2529_v30, %v2528_v46 }
 0x3b6   : > { %v2234_v36 = vmax.f32 %v2232_v19, %v2233_v56 }
 0x3b7   : > { %v2311_v16 = vsub.f32 %v2042_v25, %v2231_v23  ;;  %v2046_v49 = vpop.f32.mrf.mxu0  ;;  %v2534_v14 = vrot.slane %v2533_v48, 2  ;;  %v2750_v25 = vsel %vm2729_vm5, %v4767_v33, %v4762_v60 }
 0x3b8   : > { %v4818_v2 = vadd.f32 %v4784_v22, %v2046_v49  ;;  %v2751_v29 = vsel %vm2731_vm6, %v4770_v41, %v2750_v25  ;;  %v2516_v41 = vadd.f32 %v2515_v5, %v2514_v50 }
 0x3b9   : > { %v2366_v20 = vmul.f32 1.442695, %v2311_v16  ;;  %v3406_v61 = vpop.eup %3405  ;;  %v2752_v17 = vsel %vm2733_vm7, %v4779_v26, %v2751_v29  ;;  %v2535_v51 = vadd.f32 %v2534_v14, %v2533_v48 }
 0x3ba   : > { %v2538_v63 = vsel %vm852_vm4, %v3406_v61, 0.0  ;;  %v2239_v60 = vsel %vm852_vm4, %v4818_v2, -inf  ;;  %v2753_v26 = vsel %vm2735_vm8, %v4794_v38, %v2752_v17  ;;  %v2523_v38 = vadd.f32 %v2522_v4, %v2521_v9 }
 0x3bb   : > { %3407 = vpow2.f32 %v2366_v20  ;;  %v2539_v40 = vrot.slane %v2538_v63, 4  ;;  %v2536_v3 = vrot.slane %v2535_v51, 1  ;;  %v2754_v6 = vsel %vm2737_vm9, %v4799_v42, %v2753_v26 }
 0x3bc   : > { %v2240_v59 = vrot.slane %v2239_v60, 4  ;;  %v2755_v45 = vsel %vm2739_vm10, %v4809_v55, %v2754_v6  ;;  %3409 = vrcp.f32 %v2502_v15 }
 0x3bd   : > { %v2540_v12 = vadd.f32 %v2539_v40, %v2538_v63  ;;  %v2756_v44 = vsel %vm2741_vm11, %v2231_v23, %v2755_v45  ;;  %3411 = vrcp.f32 %v2509_v21  ;;  %v2537_v28 = vadd.f32 %v2536_v3, %v2535_v51 }
 0x3be   : > { %3413 = vrcp.f32 %v2516_v41  ;;  %v2241_v7 = vmax.f32 %v2239_v60, %v2240_v59  ;;  %v2770_v16 = vsub.f32 %v2693_v43, %v2756_v44  ;;  %v2235_v23 = vrot.slane %v2234_v36, 2 }
 0x3bf   : > { %v2049_v10 = vpop.f32.mrf.mxu0  ;;  %v2541_v34 = vrot.slane %v2540_v12, 2  ;;  %3415 = vrcp.f32 %v2523_v38 }
 0x3c0   : > { %v4832_v33 = vadd.f32 %v4784_v22, %v2049_v10  ;;  %3417 = vrcp.f32 %v2530_v52  ;;  %v2242_v20 = vrot.slane %v2241_v7, 2  ;;  %v2776_v62 = vmul.f32 1.442695, %v2770_v16 }
 0x3c1   : > { %v3408_v24 = vpop.eup %3407  ;;  %v2542_v13 = vadd.f32 %v2541_v34, %v2540_v12  ;;  %3419 = vrcp.f32 %v2537_v28  ;;  %v2236_v25 = vmax.f32 %v2234_v36, %v2235_v23 }
 0x3c2   : > { %v2545_v31 = vsel %vm852_vm4, %v3408_v24, 0.0  ;;  %v2246_v57 = vsel %vm852_vm4, %v4832_v33, -inf  ;;  %v3410_v8 = vpop.eup %3409  ;;  %v2243_v29 = vmax.f32 %v2241_v7, %v2242_v20 }
 0x3c3   : > { %v2546_v35 = vrot.slane %v2545_v31, 4  ;;  %v2543_v11 = vrot.slane %v2542_v13, 1  ;;  %v2247_v0 = vrot.slane %v2246_v57, 4  ;;  %v3412_v61 = vpop.eup %3411  ;;  %v2237_v24 = vrot.slane %v2236_v25, 1 }
 0x3c4   : > { %v3414_v1 = vpop.eup %3413  ;;  %v2858_v46 = vsel %vm2729_vm5, %v3412_v61, %v3410_v8  ;;  %v2244_v26 = vrot.slane %v2243_v29, 1 }
 0x3c5   : > { %v2547_v32 = vadd.f32 %v2546_v35, %v2545_v31  ;;  %v2544_v48 = vadd.f32 %v2543_v11, %v2542_v13  ;;  %v2248_v49 = vmax.f32 %v2246_v57, %v2247_v0  ;;  %v3416_v9 = vpop.eup %3415  ;;  %v2859_v21 = vsel %vm2731_vm6, %v3414_v1, %v2858_v46 }
 0x3c6   : > { %v3418_v15 = vpop.eup %3417  ;;  %v2860_v60 = vsel %vm2733_vm7, %v3416_v9, %v2859_v21  ;;  %v4859_v11 = vmax.f32 %v2236_v25, %v2237_v24  ;;  %v4861_v0 = vmax.f32 %v2243_v29, %v2244_v26 }
 0x3c7   : > { %v2548_v42 = vrot.slane %v2547_v32, 2  ;;  %v2051_v47 = vpop.f32.mrf.mxu0  ;;  %3421 = vrcp.f32 %v2544_v48  ;;  %v2249_v14 = vrot.slane %v2248_v49, 2  ;;  %v3420_v10 = vpop.eup %3419  ;;  %v2861_v30 = vsel %vm2735_vm8, %v3418_v15, %v2860_v60 }
 0x3c8   : > { %v4846_v55 = vadd.f32 %v4784_v22, %v2051_v47  ;;  %v2862_v31 = vsel %vm2737_vm9, %v3420_v10, %v2861_v30  ;;  %v2313_v47 = vsub.f32 %v4818_v2, %v4861_v0 }
 0x3c9   : > { %v2549_v37 = vadd.f32 %v2548_v42, %v2547_v32  ;;  %v2250_v17 = vmax.f32 %v2248_v49, %v2249_v14  ;;  %v2312_v42 = vsub.f32 %v4815_v27, %v4859_v11 }
 0x3ca   : > { %v2253_v50 = vsel %vm852_vm4, %v4846_v55, -inf  ;;  %v2370_v27 = vmul.f32 1.442695, %v2313_v47 }
 0x3cb   : > { %v2550_v18 = vrot.slane %v2549_v37, 1  ;;  %v2254_v63 = vrot.slane %v2253_v50, 4  ;;  %v2251_v56 = vrot.slane %v2250_v17, 1 }
 0x3cd   : > { %v2551_v40 = vadd.f32 %v2550_v18, %v2549_v37  ;;  %v2255_v5 = vmax.f32 %v2253_v50, %v2254_v63  ;;  %v3422_v34 = vpop.eup %3421  ;;  %v4863_v44 = vmax.f32 %v2250_v17, %v2251_v56  ;;  %v2368_v50 = vmul.f32 1.442695, %v2312_v42 }
 0x3ce   : > { %v2863_v58 = vsel %vm2739_vm10, %v3422_v34, %v2862_v31 }
 0x3cf   : > { %3423 = vrcp.f32 %v2551_v40  ;;  %v2054_v12 = vpop.f32.mrf.mxu0  ;;  %v2256_v51 = vrot.slane %v2255_v5, 2  ;;  %v2314_v49 = vsub.f32 %v4832_v33, %v4863_v44 }
 0x3d0   : > { %3425 = vpow2.f32 %v2776_v62  ;;  %v2055_v19 = vadd.f32 %v4784_v22, %v2054_v12 }
 0x3d1   : > { %v2257_v41 = vmax.f32 %v2255_v5, %v2256_v51  ;;  %v2372_v20 = vmul.f32 1.442695, %v2314_v49  ;;  %3427 = vpow2.f32 %v2368_v50 }
 0x3d2   : > { %v2260_v4 = vsel %vm852_vm4, %v2055_v19, -inf  ;;  %3429 = vpow2.f32 %v2370_v27 }
 0x3d3   : > { %v2261_v13 = vrot.slane %v2260_v4, 4  ;;  %v2258_v3 = vrot.slane %v2257_v41, 1  ;;  %3431 = vpow2.f32 %v2372_v20 }
 0x3d5   : > { %v3424_v57 = vpop.eup %3423  ;;  %v2262_v6 = vmax.f32 %v2260_v4, %v2261_v13  ;;  %v4867_v36 = vmax.f32 %v2257_v41, %v2258_v3 }
 0x3d6   : > { %v3426_v35 = vpop.eup %3425  ;;  %v2864_v59 = vsel %vm2741_vm11, %v3424_v57, %v2863_v58 }
 0x3d7   : > { %v2878_v45 = vmul.f32 %v3426_v35, %v2864_v59  ;;  %v2263_v38 = vrot.slane %v2262_v6, 2  ;;  %v2056_v32 = vpop.f32.mrf.mxu0  ;;  %v3428_v46 = vpop.eup %3427 }
 0x3d8   : > { %v2057_v43 = vadd.f32 %v4784_v22, %v2056_v32  ;;  %v3430_v15 = vpop.eup %3429  ;;  %v2552_v34 = vsel %vm852_vm4, %v3428_v46, 0.0 }
 0x3d9   : > { %v2882_v52 = vmul.f32 %v2878_v45, %v4245_v54  ;;  %v2264_v28 = vmax.f32 %v2262_v6, %v2263_v38  ;;  %v2315_v54 = vsub.f32 %v4846_v55, %v4867_v36  ;;  %v3432_v51 = vpop.eup %3431  ;;  %v2559_v4 = vsel %vm852_vm4, %v3430_v15, 0.0 }
 0x3da   : > { %v2267_v7 = vsel %vm852_vm4, %v2057_v43, -inf  ;;  %v2566_v30 = vsel %vm852_vm4, %v3432_v51, 0.0  ;;  %v2553_v31 = vrot.slane %v2552_v34, 4  ;;  %v2560_v57 = vrot.slane %v2559_v4, 4 }
 0x3db   : > { %2886 = vst.msk [vmem:[%s4716_s24 + $0x10] sm:$0xff] %vm852_vm4, %v2882_v52  ;;  %v2265_v48 = vrot.slane %v2264_v28, 1  ;;  %v2268_v16 = vrot.slane %v2267_v7, 4  ;;  %v2374_v62 = vmul.f32 1.442695, %v2315_v54  ;;  %v2567_v35 = vrot.slane %v2566_v30, 4 }
 0x3dd   : > { %v4880_v37 = vmax.f32 %v2264_v28, %v2265_v48  ;;  %v2269_v23 = vmax.f32 %v2267_v7, %v2268_v16  ;;  %3433 = vpow2.f32 %v2374_v62  ;;  %v2561_v28 = vadd.f32 %v2560_v57, %v2559_v4 }
 0x3de   : > { %v2568_v47 = vadd.f32 %v2567_v35, %v2566_v30 }
 0x3df   : > { %v2316_v8 = vsub.f32 %v2055_v19, %v4880_v37  ;;  %v2059_v18 = vpop.f32.mrf.mxu0  ;;  %v2270_v61 = vrot.slane %v2269_v23, 2  ;;  %v2562_v50 = vrot.slane %v2561_v28, 2 }
 0x3e0   : > { %v2060_v2 = vadd.f32 %v4784_v22, %v2059_v18  ;;  %v2569_v18 = vrot.slane %v2568_v47, 2 }
 0x3e1   : > { %v2376_v14 = vmul.f32 1.442695, %v2316_v8  ;;  %v2271_v63 = vmax.f32 %v2269_v23, %v2270_v61 }
 0x3e2   : > { %v2274_v33 = vsel %vm852_vm4, %v2060_v2, -inf }
 0x3e3   : > { %v2275_v55 = vrot.slane %v2274_v33, 4  ;;  %v2272_v1 = vrot.slane %v2271_v63, 1  ;;  %3435 = vpow2.f32 %v2376_v14  ;;  %v3434_v21 = vpop.eup %3433 }
 0x3e4   : > { %v2573_v56 = vsel %vm852_vm4, %v3434_v21, 0.0 }
 0x3e5   : > { %v2276_v40 = vmax.f32 %v2274_v33, %v2275_v55  ;;  %v4885_v25 = vmax.f32 %v2271_v63, %v2272_v1  ;;  %v2574_v59 = vrot.slane %v2573_v56, 4  ;;  %v2563_v33 = vadd.f32 %v2562_v50, %v2561_v28 }
 0x3e7   : > { %v2277_v5 = vrot.slane %v2276_v40, 2  ;;  %v2061_v9 = vpop.f32.mrf.mxu0  ;;  %v2317_v29 = vsub.f32 %v2057_v43, %v4885_v25  ;;  %v2554_v43 = vadd.f32 %v2553_v31, %v2552_v34  ;;  %v2575_v16 = vadd.f32 %v2574_v59, %v2573_v56 }
 0x3e8   : > { %v2062_v12 = vadd.f32 %v4784_v22, %v2061_v9  ;;  %v2564_v15 = vrot.slane %v2563_v33, 1 }
 0x3e9   : > { %v2278_v17 = vmax.f32 %v2276_v40, %v2277_v5  ;;  %v2378_v19 = vmul.f32 1.442695, %v2317_v29  ;;  %v3436_v41 = vpop.eup %3435  ;;  %v2555_v54 = vrot.slane %v2554_v43, 2  ;;  %v2576_v61 = vrot.slane %v2575_v16, 2 }
 0x3ea   : > { %v2281_v10 = vsel %vm852_vm4, %v2062_v12, -inf  ;;  %v2580_v58 = vsel %vm852_vm4, %v3436_v41, 0.0  ;;  %v2570_v40 = vadd.f32 %v2569_v18, %v2568_v47 }
 0x3eb   : > { %v2279_v60 = vrot.slane %v2278_v17, 1  ;;  %v2282_v24 = vrot.slane %v2281_v10, 4  ;;  %3437 = vpow2.f32 %v2378_v19  ;;  %v2581_v52 = vrot.slane %v2580_v58, 4 }
 0x3ec   : > { %v2556_v62 = vadd.f32 %v2555_v54, %v2554_v43  ;;  %v2577_v5 = vadd.f32 %v2576_v61, %v2575_v16  ;;  %v2571_v19 = vrot.slane %v2570_v40, 1 }
 0x3ed   : > { %v4893_v26 = vmax.f32 %v2278_v17, %v2279_v60  ;;  %v2283_v13 = vmax.f32 %v2281_v10, %v2282_v24  ;;  %v2582_v23 = vadd.f32 %v2581_v52, %v2580_v58 }
 0x3ee   : > { %v2557_v46 = vrot.slane %v2556_v62, 1  ;;  %v2578_v34 = vrot.slane %v2577_v5, 1  ;;  %v2572_v57 = vadd.f32 %v2571_v19, %v2570_v40 }
 0x3ef   : > { %v2318_v3 = vsub.f32 %v2060_v2, %v4893_v26  ;;  %v2284_v6 = vrot.slane %v2283_v13, 2  ;;  %v2583_v14 = vrot.slane %v2582_v23, 2 }
 0x3f0   : > { %v2558_v41 = vadd.f32 %v2557_v46, %v2556_v62  ;;  %v995_v62 = vadd.f32 %v4705_v39, %v4510_v53 }
 0x3f1   : > { %v2380_v45 = vmul.f32 1.442695, %v2318_v3  ;;  %v2285_v38 = vmax.f32 %v2283_v13, %v2284_v6  ;;  %v3438_v32 = vpop.eup %3437  ;;  %v2584_v29 = vadd.f32 %v2583_v14, %v2582_v23  ;;  %v2579_v3 = vadd.f32 %v2578_v34, %v2577_v5 }
 0x3f2   : > { %v2587_v42 = vsel %vm852_vm4, %v3438_v32, 0.0 }
 0x3f3   : > { %3439 = vpow2.f32 %v2380_v45  ;;  %v2286_v7 = vrot.slane %v2285_v38, 1  ;;  %v2588_v48 = vrot.slane %v2587_v42, 4  ;;  %v2585_v4 = vrot.slane %v2584_v29, 1 }
 0x3f5   : > { %v2287_v49 = vmax.f32 %v2285_v38, %v2286_v7  ;;  %v2589_v27 = vadd.f32 %v2588_v48, %v2587_v42  ;;  %v2586_v59 = vadd.f32 %v2585_v4, %v2584_v29 }
 0x3f7   : > { %v2319_v8 = vsub.f32 %v2062_v12, %v2287_v49  ;;  %v2590_v55 = vrot.slane %v2589_v27, 2  ;;  %v2757_v12 = vsel %vm2729_vm5, %v4861_v0, %v4859_v11  ;;  %v2694_v11 = vpop.f32.mrf.mxu2  ;;  %v2565_v0 = vadd.f32 %v2564_v15, %v2563_v33 }
 0x3f8   : > { %v2758_v10 = vsel %vm2731_vm6, %v4863_v44, %v2757_v12 }
 0x3f9   : > { %v3440_v20 = vpop.eup %3439  ;;  %v2382_v2 = vmul.f32 1.442695, %v2319_v8  ;;  %v2591_v17 = vadd.f32 %v2590_v55, %v2589_v27  ;;  %v2759_v60 = vsel %vm2733_vm7, %v4867_v36, %v2758_v10 }
 0x3fa   : > { %v2594_v63 = vsel %vm852_vm4, %v3440_v20, 0.0  ;;  %v2760_v30 = vsel %vm2735_vm8, %v4880_v37, %v2759_v60  ;;  %v2695_v37 = vadd.f32 %v4784_v22, %v2694_v11 }
 0x3fb   : > { %v2595_v1 = vrot.slane %v2594_v63, 4  ;;  %3441 = vpow2.f32 %v2382_v2  ;;  %v2592_v31 = vrot.slane %v2591_v17, 1  ;;  %v2761_v56 = vsel %vm2737_vm9, %v4885_v25, %v2760_v30 }
 0x3fc   : > { %v2762_v36 = vsel %vm2739_vm10, %v4893_v26, %v2761_v56  ;;  %3443 = vrcp.f32 %v2558_v41 }
 0x3fd   : > { %v2596_v9 = vadd.f32 %v2595_v1, %v2594_v63  ;;  %v2763_v35 = vsel %vm2741_vm11, %v2287_v49, %v2762_v36  ;;  %3445 = vrcp.f32 %v2565_v0  ;;  %v2593_v45 = vadd.f32 %v2592_v31, %v2591_v17 }
 0x3fe   : > { %3447 = vrcp.f32 %v2572_v57  ;;  %v2771_v32 = vsub.f32 %v2695_v37, %v2763_v35 }
 0x3ff   : > { %v2597_v51 = vrot.slane %v2596_v9, 2  ;;  %3449 = vrcp.f32 %v2579_v3 }
 0x400   : > { %3451 = vrcp.f32 %v2586_v59  ;;  %v2778_v28 = vmul.f32 1.442695, %v2771_v32 }
 0x401   : > { %v3442_v21 = vpop.eup %3441  ;;  %v2598_v24 = vadd.f32 %v2597_v51, %v2596_v9  ;;  %3453 = vrcp.f32 %v2593_v45 }
 0x402   : > { %v2601_v13 = vsel %vm852_vm4, %v3442_v21, 0.0  ;;  %v3444_v52 = vpop.eup %3443 }
 0x403   : > { %v2602_v44 = vrot.slane %v2601_v13, 4  ;;  %v2599_v58 = vrot.slane %v2598_v24, 1  ;;  %v3446_v42 = vpop.eup %3445 }
 0x404   : > { %v3448_v22 = vpop.eup %3447  ;;  %v2865_v16 = vsel %vm2729_vm5, %v3446_v42, %v3444_v52 }
 0x405   : > { %v2603_v6 = vadd.f32 %v2602_v44, %v2601_v13  ;;  %v2600_v25 = vadd.f32 %v2599_v58, %v2598_v24  ;;  %v3450_v47 = vpop.eup %3449  ;;  %v2866_v54 = vsel %vm2731_vm6, %v3448_v22, %v2865_v16 }
 0x406   : > { %v3452_v48 = vpop.eup %3451  ;;  %v2867_v50 = vsel %vm2733_vm7, %v3450_v47, %v2866_v54 }
 0x407   : > { %v2604_v38 = vrot.slane %v2603_v6, 2  ;;  %3455 = vrcp.f32 %v2600_v25  ;;  %v3454_v49 = vpop.eup %3453  ;;  %v2868_v27 = vsel %vm2735_vm8, %v3452_v48, %v2867_v50 }
 0x408   : > { %v2869_v8 = vsel %vm2737_vm9, %v3454_v49, %v2868_v27 }
 0x409   : > { %v2605_v43 = vadd.f32 %v2604_v38, %v2603_v6 }
 0x40b   : > { %v2606_v26 = vrot.slane %v2605_v43, 1 }
 0x40d   : > { %v2607_v7 = vadd.f32 %v2606_v26, %v2605_v43  ;;  %v3456_v23 = vpop.eup %3455 }
 0x40e   : > { %v2870_v20 = vsel %vm2739_vm10, %v3456_v23, %v2869_v8 }
 0x40f   : > { %3457 = vrcp.f32 %v2607_v7 }
 0x410   : > { %3459 = vpow2.f32 %v2778_v28 }
 0x415   : > { %v3458_v18 = vpop.eup %3457 }
 0x416   : > { %v3460_v61 = vpop.eup %3459  ;;  %v2871_v2 = vsel %vm2741_vm11, %v3458_v18, %v2870_v20 }
 0x417   : > { %v2879_v14 = vmul.f32 %v3460_v61, %v2871_v2 }
 0x419   : > { %v2883_v63 = vmul.f32 %v2879_v14, %v995_v62 }
 0x41b   : > { %2887 = vst.msk [vmem:[%s4716_s24 + $0x18] sm:$0xff] %vm852_vm4, %v2883_v63 }
 0x41c   : > { %3760 = shalt.err (!%p3757_p8)
}
 0x41d   : > { %s3830_s7 = smov 128   ;;  %s3831_s24 = smov 8  }
 0x41e   : > { %3216 = dma.vmem_to_hbm [thread:$0]  (%p3975_p5), %s2902_s9, 512, %s2904_s23, %s2889_s25, %s3830_s7, %s3830_s7, %s3831_s24  }
 0x41f PF: > { %s5021_s4 = sld [smem:[#allocation26_spill]] }
 0x420   : > { %s5022_s20 = sld [smem:[#allocation24_spill]] }
 0x425   : > { %p3268_p9 = scmp.ge.s32.totalorder %s5021_s4, 2 }
 0x426   : > { %s2918_s21 = sand.u32 1, %s5022_s20  }
 0x427   : > { %p3247_p10 = pnand %p3268_p9, %p3979_p6  ;;  %s2919_s28 = scalar_lea.sflag [#allocation4], %s2918_s21 }
 0x429   : > { %p3248_p11 = pneg %p3247_p10 }
 0x42b   : > { %3798 = dma.done.wait (%p3248_p11), %s2919_s28, 512  }
 0x42c   : > { %3800 = vsyncadd (%p3248_p11), %s2919_s28, 4294966784  ;;  %s5024_s24 = sld [smem:[#allocation27_spill]]  ;;  %s5027_s1 = smov %s3807_s22 }
 0x42d   : > { %s5025_s30 = sld [smem:[#allocation25_spill]] }
 0x42e   : > { %s5026_s23 = sld [smem:[#allocation28_spill]] }
 0x432   : > { %p35_p12 = scmp.ge.s32.totalorder %s5024_s24, 4  }
 0x433   : > { %s5028_s22 = smov %s5025_s30 }
 0x434   :  { %37 = sbr.rel (!%p35_p12) target bundleno = 17 (0x11), region = 175 }
 0x439   :  { %2925 = vsyncpa [#allocation3], 1 }
 0x43a   :  { %2927 = vsyncpa [#allocation3 + $0x1], 1 }
 0x43b   :  { %2928 = vsyncpa [#allocation6], 1 }
 0x43c   :  { %2929 = vsyncpa [#allocation9], 1 }
 0x43d   :  { %2930 = vsyncpa [#allocation12], 1 }
 0x43e   :  { %2931 = vsyncpa [#allocation15], 1 }
 0x43f   :  { %2932 = vsyncpa [#allocation4], 1 }
 0x440   :  { %2934 = vsyncpa [#allocation4 + $0x1], 1 }

</bundles_post_ra>
